<compile_context>
chip_gen: v7x
topology: tpu7x:2x2x1
jax: 0.10.0
libtpu: 0.0.40
codegen_flags: <defaults>
</compile_context>

<pallas_src>
import functools

import jax
import jax.numpy as jnp
from jax import lax
from jax.experimental import pallas as pl
from jax.experimental.pallas import tpu as pltpu


# ---------------------------------------------------------------------------
# Kernel: one Conv2d(K, stride, pad=0, bias cancelled) + BatchNorm2d (training
# batch stats, biased variance, like PyTorch train()) + optional ReLU.
#
# Grid = (phase, batch_tile), iterated phase-major:
#   phase 0 : conv per image, accumulate per-channel S1/S2 into VMEM scratch.
#   phase 1 : recompute conv, normalize with the completed stats, affine+ReLU,
#             write the output tile.
# Conv per image (only plain 2-D dots, no in-kernel reshape/transpose/strided
# loads):
#   xh   = sel[kh] @ x          # picks rows oh*stride + kh       (OH, W*C)
#   acc += xh @ band[kh]        # banded weight folds (kw, C)->OC (OH, OW*OC)
# ---------------------------------------------------------------------------
def _conv_bn_act_kernel(x_ref, sel_ref, band_ref, g_ref, gamma_ref, beta_ref,
                        o_ref, s1_ref, s2_ref,
                        *, bt_size, ksize, out_w, count, eps, apply_relu):
    phase = pl.program_id(0)
    btile = pl.program_id(1)

    def conv(bt):
        x = x_ref[bt]                                              # (H, W*C) bf16
        acc = None
        for kh in range(ksize):
            xh = jnp.dot(sel_ref[kh], x,
                         preferred_element_type=jnp.float32)       # (OH, W*C)
            part = jnp.dot(xh.astype(jnp.bfloat16), band_ref[kh],
                           preferred_element_type=jnp.float32)     # (OH, OW*OC)
            acc = part if acc is None else acc + part
        return acc

    @pl.when(jnp.logical_and(phase == 0, btile == 0))
    def _init():
        s1_ref[...] = jnp.zeros_like(s1_ref)
        s2_ref[...] = jnp.zeros_like(s2_ref)

    @pl.when(phase == 0)
    def _accumulate_stats():
        for bt in range(bt_size):
            acc = conv(bt)
            # Fold the OW groups into per-channel sums with a 0/1 matrix on the
            # MXU (avoids an in-kernel strided lane reduction), then row-reduce.
            c1 = jnp.dot(acc, g_ref[...],
                         preferred_element_type=jnp.float32)       # (OH, OC)
            c2 = jnp.dot(acc * acc, g_ref[...],
                         preferred_element_type=jnp.float32)
            s1_ref[...] += jnp.sum(c1, axis=0, keepdims=True)      # (1, OC)
            s2_ref[...] += jnp.sum(c2, axis=0, keepdims=True)

    @pl.when(phase == 1)
    def _normalize_and_write():
        inv_n = 1.0 / count
        mean = s1_ref[...] * inv_n                                 # (1, OC)
        var = s2_ref[...] * inv_n - mean * mean                    # biased (PyTorch)
        inv = lax.rsqrt(var + eps)
        scale_c = gamma_ref[...] * inv                             # (1, OC)
        shift_c = beta_ref[...] - mean * scale_c
        # Broadcast per-channel scale/shift across the OW groups of the wide
        # (1, OW*OC) layout.
        scale_w = jnp.tile(scale_c, (1, out_w))                    # (1, OW*OC)
        shift_w = jnp.tile(shift_c, (1, out_w))
        for bt in range(bt_size):
            acc = conv(bt)
            y = acc * scale_w + shift_w
            if apply_relu:
                y = jnp.maximum(y, 0.0)
            o_ref[bt] = y.astype(o_ref.dtype)


# ---------------------------------------------------------------------------
# Host-side (tiny, constant-sized) operand builders.
# ---------------------------------------------------------------------------
def _build_selection(H, OH, K, stride):
    """sel[kh, oh, h] = 1 iff h == oh*stride + kh   -> (K, OH, H) bf16 (0/1)."""
    oh = jnp.arange(OH)
    h = jnp.arange(H)
    kh = jnp.arange(K)
    tgt = kh[:, None, None] + oh[None, :, None] * stride
    return (h[None, None, :] == tgt).astype(jnp.bfloat16)


def _build_band(w, stride, W, OW):
    """Banded weight: band[kh, (ow*s+kw)*IC+ic, ow*OC+oc] = w[oc, ic, kh, kw]."""
    OC, IC, K, _ = w.shape
    wt = jnp.transpose(w, (2, 3, 1, 0))                            # (KH, KW, IC, OC)
    kw_i, ow_i, ic_i, oc_i = jnp.meshgrid(
        jnp.arange(K), jnp.arange(OW), jnp.arange(IC), jnp.arange(OC),
        indexing="ij")
    rows = (ow_i * stride + kw_i) * IC + ic_i
    cols = ow_i * OC + oc_i
    bands = []
    for kh in range(K):
        vals = jnp.broadcast_to(wt[kh][:, None, :, :], (K, OW, IC, OC))
        bands.append(
            jnp.zeros((W * IC, OW * OC), jnp.float32).at[rows, cols].set(vals))
    # TODO(synk): for large C*OC*W the banded matrix outgrows VMEM; add a
    # spatially-tiled implicit-GEMM path for that regime.
    return jnp.stack(bands, axis=0).astype(jnp.bfloat16)           # (K, W*IC, OW*OC)


def _choose_batch_tile(B, bytes_per_elem, budget=4 * 1024 * 1024, max_bt=8):
    """Largest divisor of B (capped) keeping double-buffered blocks well under
    even v5e's 16 MiB default scoped VMEM."""
    bt = 1
    for d in range(1, B + 1):
        if d > max_bt:
            break
        if B % d == 0 and d * bytes_per_elem <= budget:
            bt = d
    return bt


def conv_bn_act_layer(x2d, hwc, w, gamma, beta, stride, apply_relu, out_dtype,
                      eps=1e-5):
    """One fused Conv2d + BatchNorm2d(train) + (optional) ReLU layer.

    x2d : (B, H, W*C) bf16 activations in wide-NHWC layout.
    w   : (OC, IC, K, K) PyTorch conv weight.
    Returns ((B, OH, OW*OC) array of out_dtype, (OH, OW, OC)).
    """
    B = x2d.shape[0]
    H, W, C = hwc
    OC, IC, K, _ = w.shape
    assert IC == C and x2d.shape == (B, H, W * C)
    OH = (H - K) // stride + 1
    OW = (W - K) // stride + 1
    WC, OWOC = W * C, OW * OC

    sel = _build_selection(H, OH, K, stride)                       # (K, OH, H)
    band = _build_band(w, stride, W, OW)                           # (K, WC, OWOC)
    g = jnp.tile(jnp.eye(OC, dtype=jnp.float32), (OW, 1))          # (OWOC, OC)
    gamma2 = gamma.reshape(1, OC).astype(jnp.float32)
    beta2 = beta.reshape(1, OC).astype(jnp.float32)

    out_itemsize = jnp.dtype(out_dtype).itemsize
    bt_size = _choose_batch_tile(B, H * WC * 2 + OH * OWOC * out_itemsize)
    nb = B // bt_size

    kernel = functools.partial(
        _conv_bn_act_kernel, bt_size=bt_size, ksize=K, out_w=OW,
        count=float(B * OH * OW), eps=eps, apply_relu=apply_relu)

    out = pl.pallas_call(
        kernel,
        out_shape=jax.ShapeDtypeStruct((B, OH, OWOC), out_dtype),
        grid_spec=pltpu.PrefetchScalarGridSpec(
            num_scalar_prefetch=0,
            grid=(2, nb),                       # (phase, batch tile), phase-major
            in_specs=[
                pl.BlockSpec((bt_size, H, WC), lambda p, b: (b, 0, 0)),
                pl.BlockSpec((K, OH, H), lambda p, b: (0, 0, 0)),
                pl.BlockSpec((K, WC, OWOC), lambda p, b: (0, 0, 0)),
                pl.BlockSpec((OWOC, OC), lambda p, b: (0, 0)),
                pl.BlockSpec((1, OC), lambda p, b: (0, 0)),
                pl.BlockSpec((1, OC), lambda p, b: (0, 0)),
            ],
            # p*b freezes the output block index at 0 during phase 0, so no
            # (uninitialized) writeback happens before phase 1 produces real
            # data, and every output block is flushed exactly once.
            out_specs=pl.BlockSpec((bt_size, OH, OWOC),
                                   lambda p, b: (p * b, 0, 0)),
            scratch_shapes=[pltpu.VMEM((1, OC), jnp.float32),      # S1
                            pltpu.VMEM((1, OC), jnp.float32)],     # S2
        ),
        compiler_params=pltpu.CompilerParams(
            # Both axes carry the scratch-held stats reduction -> sequential.
            dimension_semantics=("arbitrary", "arbitrary"),
            vmem_limit_bytes=32 * 1024 * 1024),
    )(x2d, sel, band, g, gamma2, beta2)

    return out, (OH, OW, OC)


# ---------------------------------------------------------------------------
# Full forward pass (equivalent to CNN.forward(img), permute_for_torch=False,
# module in training mode -> BN uses batch statistics).
# ---------------------------------------------------------------------------
def cnn_forward(img_nchw, params, strides, activate_last=True):
    B, C, H, W = img_nchw.shape
    # NCHW -> wide NHWC (B, H, W*C); matmul operands in bf16, accumulate in f32.
    x = jnp.transpose(img_nchw, (0, 2, 3, 1)).reshape(B, H, W * C)
    x = x.astype(jnp.bfloat16)
    hwc = (H, W, C)
    n_layers = len(params)
    for li, (p, s) in enumerate(zip(params, strides)):
        relu = activate_last or (li < n_layers - 1)
        last = li == n_layers - 1
        # NOTE: the conv bias is intentionally not applied: training-mode BN
        # right after cancels it exactly ((x+b) - mean(x+b) == x - mean(x)).
        x, hwc = conv_bn_act_layer(
            x, hwc, p["w"], p["gamma"], p["beta"], s, relu,
            out_dtype=jnp.float32 if last else jnp.bfloat16)
    H, W, C = hwc
    # Back to NCHW flatten order so reshape(B, -1) matches PyTorch exactly.
    # TODO(synk): fold this final (tiny) transpose into the last kernel's output
    # layout, and fuse consecutive layers into a single pallas_call (VMEM-held
    # intermediate) to cut the remaining dispatch overhead at these sizes.
    x = x.reshape(B, H, W, C).transpose(0, 3, 1, 2)
    return x.reshape(B, -1)


def init_cnn_params(key, input_channel, channels, kernels):
    """Deterministic parameter init mirroring the module's __init__ shapes."""
    chans = [input_channel] + list(channels)
    params = []
    for ic, oc, k in zip(chans[:-1], chans[1:], kernels):
        key, kw_, kb = jax.random.split(key, 3)
        fan_in = ic * k * k
        bound = float(fan_in) ** -0.5
        w = jax.random.normal(kw_, (oc, ic, k, k), jnp.float32) * bound
        b = jax.random.uniform(kb, (oc,), jnp.float32, -bound, bound)
        params.append({
            "w": w,
            "b": b,                      # kept for module parity; cancelled by BN
            "gamma": jnp.ones((oc,), jnp.float32),   # BatchNorm2d default weight
            "beta": jnp.zeros((oc,), jnp.float32),   # BatchNorm2d default bias
        })
    return params


def reference_forward(img_nchw, params, strides, activate_last=True, eps=1e-5):
    """Pure-JAX f32 reference of the PyTorch module (train-mode BN, with bias)."""
    x = img_nchw
    n_layers = len(params)
    for li, (p, s) in enumerate(zip(params, strides)):
        x = lax.conv_general_dilated(
            x, p["w"], window_strides=(s, s), padding="VALID",
            dimension_numbers=("NCHW", "OIHW", "NCHW"),
            precision=lax.Precision.HIGHEST)
        x = x + p["b"][None, :, None, None]
        mean = jnp.mean(x, axis=(0, 2, 3), keepdims=True)
        var = jnp.mean(jnp.square(x - mean), axis=(0, 2, 3), keepdims=True)
        x = ((x - mean) / jnp.sqrt(var + eps) * p["gamma"][None, :, None, None]
             + p["beta"][None, :, None, None])
        if activate_last or li < n_layers - 1:
            x = jnp.maximum(x, 0.0)
    return x.reshape(x.shape[0], -1)


if __name__ == "__main__":
    # Module config: CNN(input_channel=4, channels=[8, 16], kernels=[3, 3],
    #                    strides=[1, 2], activate_last=True), training mode.
    input_channel = 4
    channels = [8, 16]
    kernels = [3, 3]
    strides = (1, 2)

    key = jax.random.PRNGKey(0)
    key, kimg = jax.random.split(key)
    img = jax.random.normal(kimg, (2, input_channel, 16, 16), jnp.float32)  # NCHW

    params = init_cnn_params(key, input_channel, channels, kernels)

    fwd = jax.jit(lambda im, ps: cnn_forward(im, ps, strides, activate_last=True))
    out = jax.block_until_ready(fwd(img, params))

    # (2,4,16,16) -> conv(3,s1): (2,8,14,14) -> conv(3,s2): (2,16,6,6) -> (2,576)
    assert out.shape == (2, 16 * 6 * 6), out.shape

    ref = reference_forward(img, params, strides, activate_last=True)
    err = float(jnp.max(jnp.abs(out - ref)))
    assert err < 1e-1, f"max abs error vs f32 reference: {err}"

    print("KERNEL_OK")
</pallas_src>

<mosaic_0001>
module attributes {stable_mosaic.version = 11 : i64} {
  func.func @_conv_bn_act_kernel(%arg0: i32, %arg1: i32, %arg2: memref<2x16x64xbf16, #tpu.memory_space<vmem>>, %arg3: memref<3x14x16xbf16, #tpu.memory_space<vmem>>, %arg4: memref<3x64x112xbf16, #tpu.memory_space<vmem>>, %arg5: memref<112x8xf32, #tpu.memory_space<vmem>>, %arg6: memref<1x8xf32, #tpu.memory_space<vmem>>, %arg7: memref<1x8xf32, #tpu.memory_space<vmem>>, %arg8: memref<2x14x112xbf16, #tpu.memory_space<vmem>>, %arg9: memref<1x8xf32, #tpu.memory_space<vmem>>, %arg10: memref<1x8xf32, #tpu.memory_space<vmem>>) attributes {dimension_semantics = [#tpu.dimension_semantics<arbitrary>, #tpu.dimension_semantics<arbitrary>], iteration_bounds = array<i64: 2, 1>, scalar_prefetch = 0 : i64, scratch_operands = 2 : i64, tpu.core_type = #tpu.core_type<tc>, window_params = [{transform_indices = @transform_0, window_bounds = array<i64: 2, 16, 64>}, {pipeline_mode = #tpu.pipeline_mode<synchronous>, transform_indices = @transform_1, window_bounds = array<i64: 3, 14, 16>}, {pipeline_mode = #tpu.pipeline_mode<synchronous>, transform_indices = @transform_2, window_bounds = array<i64: 3, 64, 112>}, {pipeline_mode = #tpu.pipeline_mode<synchronous>, transform_indices = @transform_3, window_bounds = array<i64: 112, 8>}, {pipeline_mode = #tpu.pipeline_mode<synchronous>, transform_indices = @transform_4, window_bounds = array<i64: 1, 8>}, {pipeline_mode = #tpu.pipeline_mode<synchronous>, transform_indices = @transform_5, window_bounds = array<i64: 1, 8>}, {transform_indices = @transform_6, window_bounds = array<i64: 2, 14, 112>}]} {
    %c0_i32 = arith.constant 0 : i32
    %0 = arith.cmpi eq, %arg0, %c0_i32 : i32
    %c0_i32_0 = arith.constant 0 : i32
    %1 = arith.cmpi eq, %arg1, %c0_i32_0 : i32
    %2 = arith.andi %0, %1 : i1
    %3 = arith.extui %2 : i1 to i32
    %c0_i32_1 = arith.constant 0 : i32
    %4 = arith.cmpi ne, %3, %c0_i32_1 : i32
    scf.if %4 {
      %cst = arith.constant 0.000000e+00 : f32
      %11 = vector.broadcast %cst : f32 to vector<1x8xf32>
      %c0 = arith.constant 0 : index
      %c0_5 = arith.constant 0 : index
      %12 = vector.load %arg9[%c0, %c0_5] : memref<1x8xf32, #tpu.memory_space<vmem>>, vector<1x8xf32>
      tpu.vector_store %arg9[%c0, %c0_5], %11 {strides = array<i32>} : memref<1x8xf32, #tpu.memory_space<vmem>>, vector<1x8xf32>,
      %cst_6 = arith.constant 0.000000e+00 : f32
      %13 = vector.broadcast %cst_6 : f32 to vector<1x8xf32>
      %c0_7 = arith.constant 0 : index
      %c0_8 = arith.constant 0 : index
      %14 = vector.load %arg10[%c0_7, %c0_8] : memref<1x8xf32, #tpu.memory_space<vmem>>, vector<1x8xf32>
      tpu.vector_store %arg10[%c0_7, %c0_8], %13 {strides = array<i32>} : memref<1x8xf32, #tpu.memory_space<vmem>>, vector<1x8xf32>,
    } else {
    }
    %c0_i32_2 = arith.constant 0 : i32
    %5 = arith.cmpi eq, %arg0, %c0_i32_2 : i32
    %6 = arith.extui %5 : i1 to i32
    %c0_i32_3 = arith.constant 0 : i32
    %7 = arith.cmpi ne, %6, %c0_i32_3 : i32
    scf.if %7 {
      %c0 = arith.constant 0 : index
      %c0_5 = arith.constant 0 : index
      %c0_6 = arith.constant 0 : index
      %11 = vector.load %arg2[%c0, %c0_5, %c0_6] : memref<2x16x64xbf16, #tpu.memory_space<vmem>>, vector<1x16x64xbf16>
      %12 = vector.shape_cast %11 : vector<1x16x64xbf16> to vector<16x64xbf16>
      %c0_7 = arith.constant 0 : index
      %c0_8 = arith.constant 0 : index
      %c0_9 = arith.constant 0 : index
      %13 = vector.load %arg3[%c0_7, %c0_8, %c0_9] : memref<3x14x16xbf16, #tpu.memory_space<vmem>>, vector<1x14x16xbf16>
      %14 = vector.shape_cast %13 : vector<1x14x16xbf16> to vector<14x16xbf16>
      %cst = arith.constant dense<0.000000e+00> : vector<14x64xf32>
      %15 = tpu.matmul %14, %12, %cst {dimension_numbers = #tpu.dot_dimension_numbers<[1], [0], [0], [1], [0, 0, 1, 1], [], []>} : vector<14x16xbf16>, vector<16x64xbf16>, vector<14x64xf32> -> vector<14x64xf32>
      %16 = arith.truncf %15 : vector<14x64xf32> to vector<14x64xbf16>
      %c0_10 = arith.constant 0 : index
      %c0_11 = arith.constant 0 : index
      %c0_12 = arith.constant 0 : index
      %17 = vector.load %arg4[%c0_10, %c0_11, %c0_12] : memref<3x64x112xbf16, #tpu.memory_space<vmem>>, vector<1x64x112xbf16>
      %18 = vector.shape_cast %17 : vector<1x64x112xbf16> to vector<64x112xbf16>
      %cst_13 = arith.constant dense<0.000000e+00> : vector<14x112xf32>
      %19 = tpu.matmul %16, %18, %cst_13 {dimension_numbers = #tpu.dot_dimension_numbers<[1], [0], [0], [1], [0, 0, 1, 1], [], []>} : vector<14x64xbf16>, vector<64x112xbf16>, vector<14x112xf32> -> vector<14x112xf32>
      %c1 = arith.constant 1 : index
      %c0_14 = arith.constant 0 : index
      %c0_15 = arith.constant 0 : index
      %20 = vector.load %arg3[%c1, %c0_14, %c0_15] : memref<3x14x16xbf16, #tpu.memory_space<vmem>>, vector<1x14x16xbf16>
      %21 = vector.shape_cast %20 : vector<1x14x16xbf16> to vector<14x16xbf16>
      %cst_16 = arith.constant dense<0.000000e+00> : vector<14x64xf32>
      %22 = tpu.matmul %21, %12, %cst_16 {dimension_numbers = #tpu.dot_dimension_numbers<[1], [0], [0], [1], [0, 0, 1, 1], [], []>} : vector<14x16xbf16>, vector<16x64xbf16>, vector<14x64xf32> -> vector<14x64xf32>
      %23 = arith.truncf %22 : vector<14x64xf32> to vector<14x64xbf16>
      %c1_17 = arith.constant 1 : index
      %c0_18 = arith.constant 0 : index
      %c0_19 = arith.constant 0 : index
      %24 = vector.load %arg4[%c1_17, %c0_18, %c0_19] : memref<3x64x112xbf16, #tpu.memory_space<vmem>>, vector<1x64x112xbf16>
      %25 = vector.shape_cast %24 : vector<1x64x112xbf16> to vector<64x112xbf16>
      %cst_20 = arith.constant dense<0.000000e+00> : vector<14x112xf32>
      %26 = tpu.matmul %23, %25, %cst_20 {dimension_numbers = #tpu.dot_dimension_numbers<[1], [0], [0], [1], [0, 0, 1, 1], [], []>} : vector<14x64xbf16>, vector<64x112xbf16>, vector<14x112xf32> -> vector<14x112xf32>
      %27 = arith.addf %19, %26 : vector<14x112xf32>
      %c2 = arith.constant 2 : index
      %c0_21 = arith.constant 0 : index
      %c0_22 = arith.constant 0 : index
      %28 = vector.load %arg3[%c2, %c0_21, %c0_22] : memref<3x14x16xbf16, #tpu.memory_space<vmem>>, vector<1x14x16xbf16>
      %29 = vector.shape_cast %28 : vector<1x14x16xbf16> to vector<14x16xbf16>
      %cst_23 = arith.constant dense<0.000000e+00> : vector<14x64xf32>
      %30 = tpu.matmul %29, %12, %cst_23 {dimension_numbers = #tpu.dot_dimension_numbers<[1], [0], [0], [1], [0, 0, 1, 1], [], []>} : vector<14x16xbf16>, vector<16x64xbf16>, vector<14x64xf32> -> vector<14x64xf32>
      %31 = arith.truncf %30 : vector<14x64xf32> to vector<14x64xbf16>
      %c2_24 = arith.constant 2 : index
      %c0_25 = arith.constant 0 : index
      %c0_26 = arith.constant 0 : index
      %32 = vector.load %arg4[%c2_24, %c0_25, %c0_26] : memref<3x64x112xbf16, #tpu.memory_space<vmem>>, vector<1x64x112xbf16>
      %33 = vector.shape_cast %32 : vector<1x64x112xbf16> to vector<64x112xbf16>
      %cst_27 = arith.constant dense<0.000000e+00> : vector<14x112xf32>
      %34 = tpu.matmul %31, %33, %cst_27 {dimension_numbers = #tpu.dot_dimension_numbers<[1], [0], [0], [1], [0, 0, 1, 1], [], []>} : vector<14x64xbf16>, vector<64x112xbf16>, vector<14x112xf32> -> vector<14x112xf32>
      %35 = arith.addf %27, %34 : vector<14x112xf32>
      %c0_28 = arith.constant 0 : index
      %c0_29 = arith.constant 0 : index
      %36 = vector.load %arg5[%c0_28, %c0_29] : memref<112x8xf32, #tpu.memory_space<vmem>>, vector<112x8xf32>
      %cst_30 = arith.constant dense<0.000000e+00> : vector<14x8xf32>
      %37 = tpu.matmul %35, %36, %cst_30 {dimension_numbers = #tpu.dot_dimension_numbers<[1], [0], [0], [1], [0, 0, 1, 1], [], []>} : vector<14x112xf32>, vector<112x8xf32>, vector<14x8xf32> -> vector<14x8xf32>
      %38 = arith.mulf %35, %35 : vector<14x112xf32>
      %c0_31 = arith.constant 0 : index
      %c0_32 = arith.constant 0 : index
      %39 = vector.load %arg5[%c0_31, %c0_32] : memref<112x8xf32, #tpu.memory_space<vmem>>, vector<112x8xf32>
      %cst_33 = arith.constant dense<0.000000e+00> : vector<14x8xf32>
      %40 = tpu.matmul %38, %39, %cst_33 {dimension_numbers = #tpu.dot_dimension_numbers<[1], [0], [0], [1], [0, 0, 1, 1], [], []>} : vector<14x112xf32>, vector<112x8xf32>, vector<14x8xf32> -> vector<14x8xf32>
      %c0_34 = arith.constant 0 : index
      %c0_35 = arith.constant 0 : index
      %41 = vector.load %arg9[%c0_34, %c0_35] : memref<1x8xf32, #tpu.memory_space<vmem>>, vector<1x8xf32>
      %cst_36 = arith.constant dense<0.000000e+00> : vector<8xf32>
      %42 = vector.multi_reduction <add>, %37, %cst_36 [0] : vector<14x8xf32> to vector<8xf32>
      %43 = vector.shape_cast %42 : vector<8xf32> to vector<1x8xf32>
      %44 = arith.addf %41, %43 : vector<1x8xf32>
      %c0_37 = arith.constant 0 : index
      %c0_38 = arith.constant 0 : index
      %45 = vector.load %arg9[%c0_37, %c0_38] : memref<1x8xf32, #tpu.memory_space<vmem>>, vector<1x8xf32>
      tpu.vector_store %arg9[%c0_37, %c0_38], %44 {strides = array<i32>} : memref<1x8xf32, #tpu.memory_space<vmem>>, vector<1x8xf32>,
      %c0_39 = arith.constant 0 : index
      %c0_40 = arith.constant 0 : index
      %46 = vector.load %arg10[%c0_39, %c0_40] : memref<1x8xf32, #tpu.memory_space<vmem>>, vector<1x8xf32>
      %cst_41 = arith.constant dense<0.000000e+00> : vector<8xf32>
      %47 = vector.multi_reduction <add>, %40, %cst_41 [0] : vector<14x8xf32> to vector<8xf32>
      %48 = vector.shape_cast %47 : vector<8xf32> to vector<1x8xf32>
      %49 = arith.addf %46, %48 : vector<1x8xf32>
      %c0_42 = arith.constant 0 : index
      %c0_43 = arith.constant 0 : index
      %50 = vector.load %arg10[%c0_42, %c0_43] : memref<1x8xf32, #tpu.memory_space<vmem>>, vector<1x8xf32>
      tpu.vector_store %arg10[%c0_42, %c0_43], %49 {strides = array<i32>} : memref<1x8xf32, #tpu.memory_space<vmem>>, vector<1x8xf32>,
      %c1_44 = arith.constant 1 : index
      %c0_45 = arith.constant 0 : index
      %c0_46 = arith.constant 0 : index
      %51 = vector.load %arg2[%c1_44, %c0_45, %c0_46] : memref<2x16x64xbf16, #tpu.memory_space<vmem>>, vector<1x16x64xbf16>
      %52 = vector.shape_cast %51 : vector<1x16x64xbf16> to vector<16x64xbf16>
      %c0_47 = arith.constant 0 : index
      %c0_48 = arith.constant 0 : index
      %c0_49 = arith.constant 0 : index
      %53 = vector.load %arg3[%c0_47, %c0_48, %c0_49] : memref<3x14x16xbf16, #tpu.memory_space<vmem>>, vector<1x14x16xbf16>
      %54 = vector.shape_cast %53 : vector<1x14x16xbf16> to vector<14x16xbf16>
      %cst_50 = arith.constant dense<0.000000e+00> : vector<14x64xf32>
      %55 = tpu.matmul %54, %52, %cst_50 {dimension_numbers = #tpu.dot_dimension_numbers<[1], [0], [0], [1], [0, 0, 1, 1], [], []>} : vector<14x16xbf16>, vector<16x64xbf16>, vector<14x64xf32> -> vector<14x64xf32>
      %56 = arith.truncf %55 : vector<14x64xf32> to vector<14x64xbf16>
      %c0_51 = arith.constant 0 : index
      %c0_52 = arith.constant 0 : index
      %c0_53 = arith.constant 0 : index
      %57 = vector.load %arg4[%c0_51, %c0_52, %c0_53] : memref<3x64x112xbf16, #tpu.memory_space<vmem>>, vector<1x64x112xbf16>
      %58 = vector.shape_cast %57 : vector<1x64x112xbf16> to vector<64x112xbf16>
      %cst_54 = arith.constant dense<0.000000e+00> : vector<14x112xf32>
      %59 = tpu.matmul %56, %58, %cst_54 {dimension_numbers = #tpu.dot_dimension_numbers<[1], [0], [0], [1], [0, 0, 1, 1], [], []>} : vector<14x64xbf16>, vector<64x112xbf16>, vector<14x112xf32> -> vector<14x112xf32>
      %c1_55 = arith.constant 1 : index
      %c0_56 = arith.constant 0 : index
      %c0_57 = arith.constant 0 : index
      %60 = vector.load %arg3[%c1_55, %c0_56, %c0_57] : memref<3x14x16xbf16, #tpu.memory_space<vmem>>, vector<1x14x16xbf16>
      %61 = vector.shape_cast %60 : vector<1x14x16xbf16> to vector<14x16xbf16>
      %cst_58 = arith.constant dense<0.000000e+00> : vector<14x64xf32>
      %62 = tpu.matmul %61, %52, %cst_58 {dimension_numbers = #tpu.dot_dimension_numbers<[1], [0], [0], [1], [0, 0, 1, 1], [], []>} : vector<14x16xbf16>, vector<16x64xbf16>, vector<14x64xf32> -> vector<14x64xf32>
      %63 = arith.truncf %62 : vector<14x64xf32> to vector<14x64xbf16>
      %c1_59 = arith.constant 1 : index
      %c0_60 = arith.constant 0 : index
      %c0_61 = arith.constant 0 : index
      %64 = vector.load %arg4[%c1_59, %c0_60, %c0_61] : memref<3x64x112xbf16, #tpu.memory_space<vmem>>, vector<1x64x112xbf16>
      %65 = vector.shape_cast %64 : vector<1x64x112xbf16> to vector<64x112xbf16>
      %cst_62 = arith.constant dense<0.000000e+00> : vector<14x112xf32>
      %66 = tpu.matmul %63, %65, %cst_62 {dimension_numbers = #tpu.dot_dimension_numbers<[1], [0], [0], [1], [0, 0, 1, 1], [], []>} : vector<14x64xbf16>, vector<64x112xbf16>, vector<14x112xf32> -> vector<14x112xf32>
      %67 = arith.addf %59, %66 : vector<14x112xf32>
      %c2_63 = arith.constant 2 : index
      %c0_64 = arith.constant 0 : index
      %c0_65 = arith.constant 0 : index
      %68 = vector.load %arg3[%c2_63, %c0_64, %c0_65] : memref<3x14x16xbf16, #tpu.memory_space<vmem>>, vector<1x14x16xbf16>
      %69 = vector.shape_cast %68 : vector<1x14x16xbf16> to vector<14x16xbf16>
      %cst_66 = arith.constant dense<0.000000e+00> : vector<14x64xf32>
      %70 = tpu.matmul %69, %52, %cst_66 {dimension_numbers = #tpu.dot_dimension_numbers<[1], [0], [0], [1], [0, 0, 1, 1], [], []>} : vector<14x16xbf16>, vector<16x64xbf16>, vector<14x64xf32> -> vector<14x64xf32>
      %71 = arith.truncf %70 : vector<14x64xf32> to vector<14x64xbf16>
      %c2_67 = arith.constant 2 : index
      %c0_68 = arith.constant 0 : index
      %c0_69 = arith.constant 0 : index
      %72 = vector.load %arg4[%c2_67, %c0_68, %c0_69] : memref<3x64x112xbf16, #tpu.memory_space<vmem>>, vector<1x64x112xbf16>
      %73 = vector.shape_cast %72 : vector<1x64x112xbf16> to vector<64x112xbf16>
      %cst_70 = arith.constant dense<0.000000e+00> : vector<14x112xf32>
      %74 = tpu.matmul %71, %73, %cst_70 {dimension_numbers = #tpu.dot_dimension_numbers<[1], [0], [0], [1], [0, 0, 1, 1], [], []>} : vector<14x64xbf16>, vector<64x112xbf16>, vector<14x112xf32> -> vector<14x112xf32>
      %75 = arith.addf %67, %74 : vector<14x112xf32>
      %c0_71 = arith.constant 0 : index
      %c0_72 = arith.constant 0 : index
      %76 = vector.load %arg5[%c0_71, %c0_72] : memref<112x8xf32, #tpu.memory_space<vmem>>, vector<112x8xf32>
      %cst_73 = arith.constant dense<0.000000e+00> : vector<14x8xf32>
      %77 = tpu.matmul %75, %76, %cst_73 {dimension_numbers = #tpu.dot_dimension_numbers<[1], [0], [0], [1], [0, 0, 1, 1], [], []>} : vector<14x112xf32>, vector<112x8xf32>, vector<14x8xf32> -> vector<14x8xf32>
      %78 = arith.mulf %75, %75 : vector<14x112xf32>
      %c0_74 = arith.constant 0 : index
      %c0_75 = arith.constant 0 : index
      %79 = vector.load %arg5[%c0_74, %c0_75] : memref<112x8xf32, #tpu.memory_space<vmem>>, vector<112x8xf32>
      %cst_76 = arith.constant dense<0.000000e+00> : vector<14x8xf32>
      %80 = tpu.matmul %78, %79, %cst_76 {dimension_numbers = #tpu.dot_dimension_numbers<[1], [0], [0], [1], [0, 0, 1, 1], [], []>} : vector<14x112xf32>, vector<112x8xf32>, vector<14x8xf32> -> vector<14x8xf32>
      %c0_77 = arith.constant 0 : index
      %c0_78 = arith.constant 0 : index
      %81 = vector.load %arg9[%c0_77, %c0_78] : memref<1x8xf32, #tpu.memory_space<vmem>>, vector<1x8xf32>
      %cst_79 = arith.constant dense<0.000000e+00> : vector<8xf32>
      %82 = vector.multi_reduction <add>, %77, %cst_79 [0] : vector<14x8xf32> to vector<8xf32>
      %83 = vector.shape_cast %82 : vector<8xf32> to vector<1x8xf32>
      %84 = arith.addf %81, %83 : vector<1x8xf32>
      %c0_80 = arith.constant 0 : index
      %c0_81 = arith.constant 0 : index
      %85 = vector.load %arg9[%c0_80, %c0_81] : memref<1x8xf32, #tpu.memory_space<vmem>>, vector<1x8xf32>
      tpu.vector_store %arg9[%c0_80, %c0_81], %84 {strides = array<i32>} : memref<1x8xf32, #tpu.memory_space<vmem>>, vector<1x8xf32>,
      %c0_82 = arith.constant 0 : index
      %c0_83 = arith.constant 0 : index
      %86 = vector.load %arg10[%c0_82, %c0_83] : memref<1x8xf32, #tpu.memory_space<vmem>>, vector<1x8xf32>
      %cst_84 = arith.constant dense<0.000000e+00> : vector<8xf32>
      %87 = vector.multi_reduction <add>, %80, %cst_84 [0] : vector<14x8xf32> to vector<8xf32>
      %88 = vector.shape_cast %87 : vector<8xf32> to vector<1x8xf32>
      %89 = arith.addf %86, %88 : vector<1x8xf32>
      %c0_85 = arith.constant 0 : index
      %c0_86 = arith.constant 0 : index
      %90 = vector.load %arg10[%c0_85, %c0_86] : memref<1x8xf32, #tpu.memory_space<vmem>>, vector<1x8xf32>
      tpu.vector_store %arg10[%c0_85, %c0_86], %89 {strides = array<i32>} : memref<1x8xf32, #tpu.memory_space<vmem>>, vector<1x8xf32>,
    } else {
    }
    %c1_i32 = arith.constant 1 : i32
    %8 = arith.cmpi eq, %arg0, %c1_i32 : i32
    %9 = arith.extui %8 : i1 to i32
    %c0_i32_4 = arith.constant 0 : i32
    %10 = arith.cmpi ne, %9, %c0_i32_4 : i32
    scf.if %10 {
      %c0 = arith.constant 0 : index
      %c0_5 = arith.constant 0 : index
      %11 = vector.load %arg9[%c0, %c0_5] : memref<1x8xf32, #tpu.memory_space<vmem>>, vector<1x8xf32>
      %cst = arith.constant 0.00255102036 : f32
      %12 = vector.broadcast %cst : f32 to vector<1x8xf32>
      %13 = arith.mulf %11, %12 : vector<1x8xf32>
      %c0_6 = arith.constant 0 : index
      %c0_7 = arith.constant 0 : index
      %14 = vector.load %arg10[%c0_6, %c0_7] : memref<1x8xf32, #tpu.memory_space<vmem>>, vector<1x8xf32>
      %cst_8 = arith.constant 0.00255102036 : f32
      %15 = vector.broadcast %cst_8 : f32 to vector<1x8xf32>
      %16 = arith.mulf %14, %15 : vector<1x8xf32>
      %17 = arith.mulf %13, %13 : vector<1x8xf32>
      %18 = arith.subf %16, %17 : vector<1x8xf32>
      %cst_9 = arith.constant 9.99999974E-6 : f32
      %19 = vector.broadcast %cst_9 : f32 to vector<1x8xf32>
      %20 = arith.addf %18, %19 : vector<1x8xf32>
      %21 = math.rsqrt %20 : vector<1x8xf32>
      %c0_10 = arith.constant 0 : index
      %c0_11 = arith.constant 0 : index
      %22 = vector.load %arg6[%c0_10, %c0_11] : memref<1x8xf32, #tpu.memory_space<vmem>>, vector<1x8xf32>
      %23 = arith.mulf %22, %21 : vector<1x8xf32>
      %c0_12 = arith.constant 0 : index
      %c0_13 = arith.constant 0 : index
      %24 = vector.load %arg7[%c0_12, %c0_13] : memref<1x8xf32, #tpu.memory_space<vmem>>, vector<1x8xf32>
      %25 = arith.mulf %13, %23 : vector<1x8xf32>
      %26 = arith.subf %24, %25 : vector<1x8xf32>
      %27 = tpu.concatenate %23, %23, %23, %23, %23, %23, %23, %23, %23, %23, %23, %23, %23, %23 in 1 : vector<1x8xf32>, vector<1x8xf32>, vector<1x8xf32>, vector<1x8xf32>, vector<1x8xf32>, vector<1x8xf32>, vector<1x8xf32>, vector<1x8xf32>, vector<1x8xf32>, vector<1x8xf32>, vector<1x8xf32>, vector<1x8xf32>, vector<1x8xf32>, vector<1x8xf32> -> vector<1x112xf32>
      %28 = tpu.concatenate %26, %26, %26, %26, %26, %26, %26, %26, %26, %26, %26, %26, %26, %26 in 1 : vector<1x8xf32>, vector<1x8xf32>, vector<1x8xf32>, vector<1x8xf32>, vector<1x8xf32>, vector<1x8xf32>, vector<1x8xf32>, vector<1x8xf32>, vector<1x8xf32>, vector<1x8xf32>, vector<1x8xf32>, vector<1x8xf32>, vector<1x8xf32>, vector<1x8xf32> -> vector<1x112xf32>
      %c0_14 = arith.constant 0 : index
      %c0_15 = arith.constant 0 : index
      %c0_16 = arith.constant 0 : index
      %29 = vector.load %arg2[%c0_14, %c0_15, %c0_16] : memref<2x16x64xbf16, #tpu.memory_space<vmem>>, vector<1x16x64xbf16>
      %30 = vector.shape_cast %29 : vector<1x16x64xbf16> to vector<16x64xbf16>
      %c0_17 = arith.constant 0 : index
      %c0_18 = arith.constant 0 : index
      %c0_19 = arith.constant 0 : index
      %31 = vector.load %arg3[%c0_17, %c0_18, %c0_19] : memref<3x14x16xbf16, #tpu.memory_space<vmem>>, vector<1x14x16xbf16>
      %32 = vector.shape_cast %31 : vector<1x14x16xbf16> to vector<14x16xbf16>
      %cst_20 = arith.constant dense<0.000000e+00> : vector<14x64xf32>
      %33 = tpu.matmul %32, %30, %cst_20 {dimension_numbers = #tpu.dot_dimension_numbers<[1], [0], [0], [1], [0, 0, 1, 1], [], []>} : vector<14x16xbf16>, vector<16x64xbf16>, vector<14x64xf32> -> vector<14x64xf32>
      %34 = arith.truncf %33 : vector<14x64xf32> to vector<14x64xbf16>
      %c0_21 = arith.constant 0 : index
      %c0_22 = arith.constant 0 : index
      %c0_23 = arith.constant 0 : index
      %35 = vector.load %arg4[%c0_21, %c0_22, %c0_23] : memref<3x64x112xbf16, #tpu.memory_space<vmem>>, vector<1x64x112xbf16>
      %36 = vector.shape_cast %35 : vector<1x64x112xbf16> to vector<64x112xbf16>
      %cst_24 = arith.constant dense<0.000000e+00> : vector<14x112xf32>
      %37 = tpu.matmul %34, %36, %cst_24 {dimension_numbers = #tpu.dot_dimension_numbers<[1], [0], [0], [1], [0, 0, 1, 1], [], []>} : vector<14x64xbf16>, vector<64x112xbf16>, vector<14x112xf32> -> vector<14x112xf32>
      %c1 = arith.constant 1 : index
      %c0_25 = arith.constant 0 : index
      %c0_26 = arith.constant 0 : index
      %38 = vector.load %arg3[%c1, %c0_25, %c0_26] : memref<3x14x16xbf16, #tpu.memory_space<vmem>>, vector<1x14x16xbf16>
      %39 = vector.shape_cast %38 : vector<1x14x16xbf16> to vector<14x16xbf16>
      %cst_27 = arith.constant dense<0.000000e+00> : vector<14x64xf32>
      %40 = tpu.matmul %39, %30, %cst_27 {dimension_numbers = #tpu.dot_dimension_numbers<[1], [0], [0], [1], [0, 0, 1, 1], [], []>} : vector<14x16xbf16>, vector<16x64xbf16>, vector<14x64xf32> -> vector<14x64xf32>
      %41 = arith.truncf %40 : vector<14x64xf32> to vector<14x64xbf16>
      %c1_28 = arith.constant 1 : index
      %c0_29 = arith.constant 0 : index
      %c0_30 = arith.constant 0 : index
      %42 = vector.load %arg4[%c1_28, %c0_29, %c0_30] : memref<3x64x112xbf16, #tpu.memory_space<vmem>>, vector<1x64x112xbf16>
      %43 = vector.shape_cast %42 : vector<1x64x112xbf16> to vector<64x112xbf16>
      %cst_31 = arith.constant dense<0.000000e+00> : vector<14x112xf32>
      %44 = tpu.matmul %41, %43, %cst_31 {dimension_numbers = #tpu.dot_dimension_numbers<[1], [0], [0], [1], [0, 0, 1, 1], [], []>} : vector<14x64xbf16>, vector<64x112xbf16>, vector<14x112xf32> -> vector<14x112xf32>
      %45 = arith.addf %37, %44 : vector<14x112xf32>
      %c2 = arith.constant 2 : index
      %c0_32 = arith.constant 0 : index
      %c0_33 = arith.constant 0 : index
      %46 = vector.load %arg3[%c2, %c0_32, %c0_33] : memref<3x14x16xbf16, #tpu.memory_space<vmem>>, vector<1x14x16xbf16>
      %47 = vector.shape_cast %46 : vector<1x14x16xbf16> to vector<14x16xbf16>
      %cst_34 = arith.constant dense<0.000000e+00> : vector<14x64xf32>
      %48 = tpu.matmul %47, %30, %cst_34 {dimension_numbers = #tpu.dot_dimension_numbers<[1], [0], [0], [1], [0, 0, 1, 1], [], []>} : vector<14x16xbf16>, vector<16x64xbf16>, vector<14x64xf32> -> vector<14x64xf32>
      %49 = arith.truncf %48 : vector<14x64xf32> to vector<14x64xbf16>
      %c2_35 = arith.constant 2 : index
      %c0_36 = arith.constant 0 : index
      %c0_37 = arith.constant 0 : index
      %50 = vector.load %arg4[%c2_35, %c0_36, %c0_37] : memref<3x64x112xbf16, #tpu.memory_space<vmem>>, vector<1x64x112xbf16>
      %51 = vector.shape_cast %50 : vector<1x64x112xbf16> to vector<64x112xbf16>
      %cst_38 = arith.constant dense<0.000000e+00> : vector<14x112xf32>
      %52 = tpu.matmul %49, %51, %cst_38 {dimension_numbers = #tpu.dot_dimension_numbers<[1], [0], [0], [1], [0, 0, 1, 1], [], []>} : vector<14x64xbf16>, vector<64x112xbf16>, vector<14x112xf32> -> vector<14x112xf32>
      %53 = arith.addf %45, %52 : vector<14x112xf32>
      %54 = vector.broadcast %27 : vector<1x112xf32> to vector<14x112xf32>
      %55 = arith.mulf %53, %54 : vector<14x112xf32>
      %56 = vector.broadcast %28 : vector<1x112xf32> to vector<14x112xf32>
      %57 = arith.addf %55, %56 : vector<14x112xf32>
      %cst_39 = arith.constant 0.000000e+00 : f32
      %58 = vector.broadcast %cst_39 : f32 to vector<14x112xf32>
      %59 = arith.maximumf %57, %58 : vector<14x112xf32>
      %60 = arith.truncf %59 : vector<14x112xf32> to vector<14x112xbf16>
      %c0_40 = arith.constant 0 : index
      %c0_41 = arith.constant 0 : index
      %c0_42 = arith.constant 0 : index
      %61 = vector.load %arg8[%c0_40, %c0_41, %c0_42] : memref<2x14x112xbf16, #tpu.memory_space<vmem>>, vector<1x14x112xbf16>
      %62 = vector.shape_cast %61 : vector<1x14x112xbf16> to vector<14x112xbf16>
      %63 = vector.shape_cast %60 : vector<14x112xbf16> to vector<1x14x112xbf16>
      tpu.vector_store %arg8[%c0_40, %c0_41, %c0_42], %63 {strides = array<i32>} : memref<2x14x112xbf16, #tpu.memory_space<vmem>>, vector<1x14x112xbf16>,
      %c1_43 = arith.constant 1 : index
      %c0_44 = arith.constant 0 : index
      %c0_45 = arith.constant 0 : index
      %64 = vector.load %arg2[%c1_43, %c0_44, %c0_45] : memref<2x16x64xbf16, #tpu.memory_space<vmem>>, vector<1x16x64xbf16>
      %65 = vector.shape_cast %64 : vector<1x16x64xbf16> to vector<16x64xbf16>
      %c0_46 = arith.constant 0 : index
      %c0_47 = arith.constant 0 : index
      %c0_48 = arith.constant 0 : index
      %66 = vector.load %arg3[%c0_46, %c0_47, %c0_48] : memref<3x14x16xbf16, #tpu.memory_space<vmem>>, vector<1x14x16xbf16>
      %67 = vector.shape_cast %66 : vector<1x14x16xbf16> to vector<14x16xbf16>
      %cst_49 = arith.constant dense<0.000000e+00> : vector<14x64xf32>
      %68 = tpu.matmul %67, %65, %cst_49 {dimension_numbers = #tpu.dot_dimension_numbers<[1], [0], [0], [1], [0, 0, 1, 1], [], []>} : vector<14x16xbf16>, vector<16x64xbf16>, vector<14x64xf32> -> vector<14x64xf32>
      %69 = arith.truncf %68 : vector<14x64xf32> to vector<14x64xbf16>
      %c0_50 = arith.constant 0 : index
      %c0_51 = arith.constant 0 : index
      %c0_52 = arith.constant 0 : index
      %70 = vector.load %arg4[%c0_50, %c0_51, %c0_52] : memref<3x64x112xbf16, #tpu.memory_space<vmem>>, vector<1x64x112xbf16>
      %71 = vector.shape_cast %70 : vector<1x64x112xbf16> to vector<64x112xbf16>
      %cst_53 = arith.constant dense<0.000000e+00> : vector<14x112xf32>
      %72 = tpu.matmul %69, %71, %cst_53 {dimension_numbers = #tpu.dot_dimension_numbers<[1], [0], [0], [1], [0, 0, 1, 1], [], []>} : vector<14x64xbf16>, vector<64x112xbf16>, vector<14x112xf32> -> vector<14x112xf32>
      %c1_54 = arith.constant 1 : index
      %c0_55 = arith.constant 0 : index
      %c0_56 = arith.constant 0 : index
      %73 = vector.load %arg3[%c1_54, %c0_55, %c0_56] : memref<3x14x16xbf16, #tpu.memory_space<vmem>>, vector<1x14x16xbf16>
      %74 = vector.shape_cast %73 : vector<1x14x16xbf16> to vector<14x16xbf16>
      %cst_57 = arith.constant dense<0.000000e+00> : vector<14x64xf32>
      %75 = tpu.matmul %74, %65, %cst_57 {dimension_numbers = #tpu.dot_dimension_numbers<[1], [0], [0], [1], [0, 0, 1, 1], [], []>} : vector<14x16xbf16>, vector<16x64xbf16>, vector<14x64xf32> -> vector<14x64xf32>
      %76 = arith.truncf %75 : vector<14x64xf32> to vector<14x64xbf16>
      %c1_58 = arith.constant 1 : index
      %c0_59 = arith.constant 0 : index
      %c0_60 = arith.constant 0 : index
      %77 = vector.load %arg4[%c1_58, %c0_59, %c0_60] : memref<3x64x112xbf16, #tpu.memory_space<vmem>>, vector<1x64x112xbf16>
      %78 = vector.shape_cast %77 : vector<1x64x112xbf16> to vector<64x112xbf16>
      %cst_61 = arith.constant dense<0.000000e+00> : vector<14x112xf32>
      %79 = tpu.matmul %76, %78, %cst_61 {dimension_numbers = #tpu.dot_dimension_numbers<[1], [0], [0], [1], [0, 0, 1, 1], [], []>} : vector<14x64xbf16>, vector<64x112xbf16>, vector<14x112xf32> -> vector<14x112xf32>
      %80 = arith.addf %72, %79 : vector<14x112xf32>
      %c2_62 = arith.constant 2 : index
      %c0_63 = arith.constant 0 : index
      %c0_64 = arith.constant 0 : index
      %81 = vector.load %arg3[%c2_62, %c0_63, %c0_64] : memref<3x14x16xbf16, #tpu.memory_space<vmem>>, vector<1x14x16xbf16>
      %82 = vector.shape_cast %81 : vector<1x14x16xbf16> to vector<14x16xbf16>
      %cst_65 = arith.constant dense<0.000000e+00> : vector<14x64xf32>
      %83 = tpu.matmul %82, %65, %cst_65 {dimension_numbers = #tpu.dot_dimension_numbers<[1], [0], [0], [1], [0, 0, 1, 1], [], []>} : vector<14x16xbf16>, vector<16x64xbf16>, vector<14x64xf32> -> vector<14x64xf32>
      %84 = arith.truncf %83 : vector<14x64xf32> to vector<14x64xbf16>
      %c2_66 = arith.constant 2 : index
      %c0_67 = arith.constant 0 : index
      %c0_68 = arith.constant 0 : index
      %85 = vector.load %arg4[%c2_66, %c0_67, %c0_68] : memref<3x64x112xbf16, #tpu.memory_space<vmem>>, vector<1x64x112xbf16>
      %86 = vector.shape_cast %85 : vector<1x64x112xbf16> to vector<64x112xbf16>
      %cst_69 = arith.constant dense<0.000000e+00> : vector<14x112xf32>
      %87 = tpu.matmul %84, %86, %cst_69 {dimension_numbers = #tpu.dot_dimension_numbers<[1], [0], [0], [1], [0, 0, 1, 1], [], []>} : vector<14x64xbf16>, vector<64x112xbf16>, vector<14x112xf32> -> vector<14x112xf32>
      %88 = arith.addf %80, %87 : vector<14x112xf32>
      %89 = vector.broadcast %27 : vector<1x112xf32> to vector<14x112xf32>
      %90 = arith.mulf %88, %89 : vector<14x112xf32>
      %91 = vector.broadcast %28 : vector<1x112xf32> to vector<14x112xf32>
      %92 = arith.addf %90, %91 : vector<14x112xf32>
      %cst_70 = arith.constant 0.000000e+00 : f32
      %93 = vector.broadcast %cst_70 : f32 to vector<14x112xf32>
      %94 = arith.maximumf %92, %93 : vector<14x112xf32>
      %95 = arith.truncf %94 : vector<14x112xf32> to vector<14x112xbf16>
      %c1_71 = arith.constant 1 : index
      %c0_72 = arith.constant 0 : index
      %c0_73 = arith.constant 0 : index
      %96 = vector.load %arg8[%c1_71, %c0_72, %c0_73] : memref<2x14x112xbf16, #tpu.memory_space<vmem>>, vector<1x14x112xbf16>
      %97 = vector.shape_cast %96 : vector<1x14x112xbf16> to vector<14x112xbf16>
      %98 = vector.shape_cast %95 : vector<14x112xbf16> to vector<1x14x112xbf16>
      tpu.vector_store %arg8[%c1_71, %c0_72, %c0_73], %98 {strides = array<i32>} : memref<2x14x112xbf16, #tpu.memory_space<vmem>>, vector<1x14x112xbf16>,
    } else {
    }
    return
  }
  func.func @transform_0(%arg0: i32, %arg1: i32) -> (i32, i32, i32) {
    %c0_i32 = arith.constant 0 : i32
    %c0_i32_0 = arith.constant 0 : i32
    %c0_i32_1 = arith.constant 0 : i32
    return %arg1, %c0_i32, %c0_i32_0 : i32, i32, i32
  }
  func.func @transform_1(%arg0: i32, %arg1: i32) -> (i32, i32, i32) {
    %c0_i32 = arith.constant 0 : i32
    %c0_i32_0 = arith.constant 0 : i32
    %c0_i32_1 = arith.constant 0 : i32
    %c0_i32_2 = arith.constant 0 : i32
    return %c0_i32, %c0_i32_0, %c0_i32_1 : i32, i32, i32
  }
  func.func @transform_2(%arg0: i32, %arg1: i32) -> (i32, i32, i32) {
    %c0_i32 = arith.constant 0 : i32
    %c0_i32_0 = arith.constant 0 : i32
    %c0_i32_1 = arith.constant 0 : i32
    %c0_i32_2 = arith.constant 0 : i32
    return %c0_i32, %c0_i32_0, %c0_i32_1 : i32, i32, i32
  }
  func.func @transform_3(%arg0: i32, %arg1: i32) -> (i32, i32) {
    %c0_i32 = arith.constant 0 : i32
    %c0_i32_0 = arith.constant 0 : i32
    %c0_i32_1 = arith.constant 0 : i32
    return %c0_i32, %c0_i32_0 : i32, i32
  }
  func.func @transform_4(%arg0: i32, %arg1: i32) -> (i32, i32) {
    %c0_i32 = arith.constant 0 : i32
    %c0_i32_0 = arith.constant 0 : i32
    %c0_i32_1 = arith.constant 0 : i32
    return %c0_i32, %c0_i32_0 : i32, i32
  }
  func.func @transform_5(%arg0: i32, %arg1: i32) -> (i32, i32) {
    %c0_i32 = arith.constant 0 : i32
    %c0_i32_0 = arith.constant 0 : i32
    %c0_i32_1 = arith.constant 0 : i32
    return %c0_i32, %c0_i32_0 : i32, i32
  }
  func.func @transform_6(%arg0: i32, %arg1: i32) -> (i32, i32, i32) {
    %0 = arith.muli %arg0, %arg1 : i32
    %c0_i32 = arith.constant 0 : i32
    %c0_i32_0 = arith.constant 0 : i32
    %c0_i32_1 = arith.constant 0 : i32
    return %0, %c0_i32, %c0_i32_0 : i32, i32, i32
  }
}

module attributes {stable_mosaic.version = 11 : i64} {
  func.func @_conv_bn_act_kernel(%arg0: i32, %arg1: i32, %arg2: memref<2x14x112xbf16, #tpu.memory_space<vmem>>, %arg3: memref<3x6x14xbf16, #tpu.memory_space<vmem>>, %arg4: memref<3x112x96xbf16, #tpu.memory_space<vmem>>, %arg5: memref<96x16xf32, #tpu.memory_space<vmem>>, %arg6: memref<1x16xf32, #tpu.memory_space<vmem>>, %arg7: memref<1x16xf32, #tpu.memory_space<vmem>>, %arg8: memref<2x6x96xf32, #tpu.memory_space<vmem>>, %arg9: memref<1x16xf32, #tpu.memory_space<vmem>>, %arg10: memref<1x16xf32, #tpu.memory_space<vmem>>) attributes {dimension_semantics = [#tpu.dimension_semantics<arbitrary>, #tpu.dimension_semantics<arbitrary>], iteration_bounds = array<i64: 2, 1>, scalar_prefetch = 0 : i64, scratch_operands = 2 : i64, tpu.core_type = #tpu.core_type<tc>, window_params = [{transform_indices = @transform_0, window_bounds = array<i64: 2, 14, 112>}, {pipeline_mode = #tpu.pipeline_mode<synchronous>, transform_indices = @transform_1, window_bounds = array<i64: 3, 6, 14>}, {pipeline_mode = #tpu.pipeline_mode<synchronous>, transform_indices = @transform_2, window_bounds = array<i64: 3, 112, 96>}, {pipeline_mode = #tpu.pipeline_mode<synchronous>, transform_indices = @transform_3, window_bounds = array<i64: 96, 16>}, {pipeline_mode = #tpu.pipeline_mode<synchronous>, transform_indices = @transform_4, window_bounds = array<i64: 1, 16>}, {pipeline_mode = #tpu.pipeline_mode<synchronous>, transform_indices = @transform_5, window_bounds = array<i64: 1, 16>}, {transform_indices = @transform_6, window_bounds = array<i64: 2, 6, 96>}]} {
    %c0_i32 = arith.constant 0 : i32
    %0 = arith.cmpi eq, %arg0, %c0_i32 : i32
    %c0_i32_0 = arith.constant 0 : i32
    %1 = arith.cmpi eq, %arg1, %c0_i32_0 : i32
    %2 = arith.andi %0, %1 : i1
    %3 = arith.extui %2 : i1 to i32
    %c0_i32_1 = arith.constant 0 : i32
    %4 = arith.cmpi ne, %3, %c0_i32_1 : i32
    scf.if %4 {
      %cst = arith.constant 0.000000e+00 : f32
      %11 = vector.broadcast %cst : f32 to vector<1x16xf32>
      %c0 = arith.constant 0 : index
      %c0_5 = arith.constant 0 : index
      %12 = vector.load %arg9[%c0, %c0_5] : memref<1x16xf32, #tpu.memory_space<vmem>>, vector<1x16xf32>
      tpu.vector_store %arg9[%c0, %c0_5], %11 {strides = array<i32>} : memref<1x16xf32, #tpu.memory_space<vmem>>, vector<1x16xf32>,
      %cst_6 = arith.constant 0.000000e+00 : f32
      %13 = vector.broadcast %cst_6 : f32 to vector<1x16xf32>
      %c0_7 = arith.constant 0 : index
      %c0_8 = arith.constant 0 : index
      %14 = vector.load %arg10[%c0_7, %c0_8] : memref<1x16xf32, #tpu.memory_space<vmem>>, vector<1x16xf32>
      tpu.vector_store %arg10[%c0_7, %c0_8], %13 {strides = array<i32>} : memref<1x16xf32, #tpu.memory_space<vmem>>, vector<1x16xf32>,
    } else {
    }
    %c0_i32_2 = arith.constant 0 : i32
    %5 = arith.cmpi eq, %arg0, %c0_i32_2 : i32
    %6 = arith.extui %5 : i1 to i32
    %c0_i32_3 = arith.constant 0 : i32
    %7 = arith.cmpi ne, %6, %c0_i32_3 : i32
    scf.if %7 {
      %c0 = arith.constant 0 : index
      %c0_5 = arith.constant 0 : index
      %c0_6 = arith.constant 0 : index
      %11 = vector.load %arg2[%c0, %c0_5, %c0_6] : memref<2x14x112xbf16, #tpu.memory_space<vmem>>, vector<1x14x112xbf16>
      %12 = vector.shape_cast %11 : vector<1x14x112xbf16> to vector<14x112xbf16>
      %c0_7 = arith.constant 0 : index
      %c0_8 = arith.constant 0 : index
      %c0_9 = arith.constant 0 : index
      %13 = vector.load %arg3[%c0_7, %c0_8, %c0_9] : memref<3x6x14xbf16, #tpu.memory_space<vmem>>, vector<1x6x14xbf16>
      %14 = vector.shape_cast %13 : vector<1x6x14xbf16> to vector<6x14xbf16>
      %cst = arith.constant dense<0.000000e+00> : vector<6x112xf32>
      %15 = tpu.matmul %14, %12, %cst {dimension_numbers = #tpu.dot_dimension_numbers<[1], [0], [0], [1], [0, 0, 1, 1], [], []>} : vector<6x14xbf16>, vector<14x112xbf16>, vector<6x112xf32> -> vector<6x112xf32>
      %16 = arith.truncf %15 : vector<6x112xf32> to vector<6x112xbf16>
      %c0_10 = arith.constant 0 : index
      %c0_11 = arith.constant 0 : index
      %c0_12 = arith.constant 0 : index
      %17 = vector.load %arg4[%c0_10, %c0_11, %c0_12] : memref<3x112x96xbf16, #tpu.memory_space<vmem>>, vector<1x112x96xbf16>
      %18 = vector.shape_cast %17 : vector<1x112x96xbf16> to vector<112x96xbf16>
      %cst_13 = arith.constant dense<0.000000e+00> : vector<6x96xf32>
      %19 = tpu.matmul %16, %18, %cst_13 {dimension_numbers = #tpu.dot_dimension_numbers<[1], [0], [0], [1], [0, 0, 1, 1], [], []>} : vector<6x112xbf16>, vector<112x96xbf16>, vector<6x96xf32> -> vector<6x96xf32>
      %c1 = arith.constant 1 : index
      %c0_14 = arith.constant 0 : index
      %c0_15 = arith.constant 0 : index
      %20 = vector.load %arg3[%c1, %c0_14, %c0_15] : memref<3x6x14xbf16, #tpu.memory_space<vmem>>, vector<1x6x14xbf16>
      %21 = vector.shape_cast %20 : vector<1x6x14xbf16> to vector<6x14xbf16>
      %cst_16 = arith.constant dense<0.000000e+00> : vector<6x112xf32>
      %22 = tpu.matmul %21, %12, %cst_16 {dimension_numbers = #tpu.dot_dimension_numbers<[1], [0], [0], [1], [0, 0, 1, 1], [], []>} : vector<6x14xbf16>, vector<14x112xbf16>, vector<6x112xf32> -> vector<6x112xf32>
      %23 = arith.truncf %22 : vector<6x112xf32> to vector<6x112xbf16>
      %c1_17 = arith.constant 1 : index
      %c0_18 = arith.constant 0 : index
      %c0_19 = arith.constant 0 : index
      %24 = vector.load %arg4[%c1_17, %c0_18, %c0_19] : memref<3x112x96xbf16, #tpu.memory_space<vmem>>, vector<1x112x96xbf16>
      %25 = vector.shape_cast %24 : vector<1x112x96xbf16> to vector<112x96xbf16>
      %cst_20 = arith.constant dense<0.000000e+00> : vector<6x96xf32>
      %26 = tpu.matmul %23, %25, %cst_20 {dimension_numbers = #tpu.dot_dimension_numbers<[1], [0], [0], [1], [0, 0, 1, 1], [], []>} : vector<6x112xbf16>, vector<112x96xbf16>, vector<6x96xf32> -> vector<6x96xf32>
      %27 = arith.addf %19, %26 : vector<6x96xf32>
      %c2 = arith.constant 2 : index
      %c0_21 = arith.constant 0 : index
      %c0_22 = arith.constant 0 : index
      %28 = vector.load %arg3[%c2, %c0_21, %c0_22] : memref<3x6x14xbf16, #tpu.memory_space<vmem>>, vector<1x6x14xbf16>
      %29 = vector.shape_cast %28 : vector<1x6x14xbf16> to vector<6x14xbf16>
      %cst_23 = arith.constant dense<0.000000e+00> : vector<6x112xf32>
      %30 = tpu.matmul %29, %12, %cst_23 {dimension_numbers = #tpu.dot_dimension_numbers<[1], [0], [0], [1], [0, 0, 1, 1], [], []>} : vector<6x14xbf16>, vector<14x112xbf16>, vector<6x112xf32> -> vector<6x112xf32>
      %31 = arith.truncf %30 : vector<6x112xf32> to vector<6x112xbf16>
      %c2_24 = arith.constant 2 : index
      %c0_25 = arith.constant 0 : index
      %c0_26 = arith.constant 0 : index
      %32 = vector.load %arg4[%c2_24, %c0_25, %c0_26] : memref<3x112x96xbf16, #tpu.memory_space<vmem>>, vector<1x112x96xbf16>
      %33 = vector.shape_cast %32 : vector<1x112x96xbf16> to vector<112x96xbf16>
      %cst_27 = arith.constant dense<0.000000e+00> : vector<6x96xf32>
      %34 = tpu.matmul %31, %33, %cst_27 {dimension_numbers = #tpu.dot_dimension_numbers<[1], [0], [0], [1], [0, 0, 1, 1], [], []>} : vector<6x112xbf16>, vector<112x96xbf16>, vector<6x96xf32> -> vector<6x96xf32>
      %35 = arith.addf %27, %34 : vector<6x96xf32>
      %c0_28 = arith.constant 0 : index
      %c0_29 = arith.constant 0 : index
      %36 = vector.load %arg5[%c0_28, %c0_29] : memref<96x16xf32, #tpu.memory_space<vmem>>, vector<96x16xf32>
      %cst_30 = arith.constant dense<0.000000e+00> : vector<6x16xf32>
      %37 = tpu.matmul %35, %36, %cst_30 {dimension_numbers = #tpu.dot_dimension_numbers<[1], [0], [0], [1], [0, 0, 1, 1], [], []>} : vector<6x96xf32>, vector<96x16xf32>, vector<6x16xf32> -> vector<6x16xf32>
      %38 = arith.mulf %35, %35 : vector<6x96xf32>
      %c0_31 = arith.constant 0 : index
      %c0_32 = arith.constant 0 : index
      %39 = vector.load %arg5[%c0_31, %c0_32] : memref<96x16xf32, #tpu.memory_space<vmem>>, vector<96x16xf32>
      %cst_33 = arith.constant dense<0.000000e+00> : vector<6x16xf32>
      %40 = tpu.matmul %38, %39, %cst_33 {dimension_numbers = #tpu.dot_dimension_numbers<[1], [0], [0], [1], [0, 0, 1, 1], [], []>} : vector<6x96xf32>, vector<96x16xf32>, vector<6x16xf32> -> vector<6x16xf32>
      %c0_34 = arith.constant 0 : index
      %c0_35 = arith.constant 0 : index
      %41 = vector.load %arg9[%c0_34, %c0_35] : memref<1x16xf32, #tpu.memory_space<vmem>>, vector<1x16xf32>
      %cst_36 = arith.constant dense<0.000000e+00> : vector<16xf32>
      %42 = vector.multi_reduction <add>, %37, %cst_36 [0] : vector<6x16xf32> to vector<16xf32>
      %43 = vector.shape_cast %42 : vector<16xf32> to vector<1x16xf32>
      %44 = arith.addf %41, %43 : vector<1x16xf32>
      %c0_37 = arith.constant 0 : index
      %c0_38 = arith.constant 0 : index
      %45 = vector.load %arg9[%c0_37, %c0_38] : memref<1x16xf32, #tpu.memory_space<vmem>>, vector<1x16xf32>
      tpu.vector_store %arg9[%c0_37, %c0_38], %44 {strides = array<i32>} : memref<1x16xf32, #tpu.memory_space<vmem>>, vector<1x16xf32>,
      %c0_39 = arith.constant 0 : index
      %c0_40 = arith.constant 0 : index
      %46 = vector.load %arg10[%c0_39, %c0_40] : memref<1x16xf32, #tpu.memory_space<vmem>>, vector<1x16xf32>
      %cst_41 = arith.constant dense<0.000000e+00> : vector<16xf32>
      %47 = vector.multi_reduction <add>, %40, %cst_41 [0] : vector<6x16xf32> to vector<16xf32>
      %48 = vector.shape_cast %47 : vector<16xf32> to vector<1x16xf32>
      %49 = arith.addf %46, %48 : vector<1x16xf32>
      %c0_42 = arith.constant 0 : index
      %c0_43 = arith.constant 0 : index
      %50 = vector.load %arg10[%c0_42, %c0_43] : memref<1x16xf32, #tpu.memory_space<vmem>>, vector<1x16xf32>
      tpu.vector_store %arg10[%c0_42, %c0_43], %49 {strides = array<i32>} : memref<1x16xf32, #tpu.memory_space<vmem>>, vector<1x16xf32>,
      %c1_44 = arith.constant 1 : index
      %c0_45 = arith.constant 0 : index
      %c0_46 = arith.constant 0 : index
      %51 = vector.load %arg2[%c1_44, %c0_45, %c0_46] : memref<2x14x112xbf16, #tpu.memory_space<vmem>>, vector<1x14x112xbf16>
      %52 = vector.shape_cast %51 : vector<1x14x112xbf16> to vector<14x112xbf16>
      %c0_47 = arith.constant 0 : index
      %c0_48 = arith.constant 0 : index
      %c0_49 = arith.constant 0 : index
      %53 = vector.load %arg3[%c0_47, %c0_48, %c0_49] : memref<3x6x14xbf16, #tpu.memory_space<vmem>>, vector<1x6x14xbf16>
      %54 = vector.shape_cast %53 : vector<1x6x14xbf16> to vector<6x14xbf16>
      %cst_50 = arith.constant dense<0.000000e+00> : vector<6x112xf32>
      %55 = tpu.matmul %54, %52, %cst_50 {dimension_numbers = #tpu.dot_dimension_numbers<[1], [0], [0], [1], [0, 0, 1, 1], [], []>} : vector<6x14xbf16>, vector<14x112xbf16>, vector<6x112xf32> -> vector<6x112xf32>
      %56 = arith.truncf %55 : vector<6x112xf32> to vector<6x112xbf16>
      %c0_51 = arith.constant 0 : index
      %c0_52 = arith.constant 0 : index
      %c0_53 = arith.constant 0 : index
      %57 = vector.load %arg4[%c0_51, %c0_52, %c0_53] : memref<3x112x96xbf16, #tpu.memory_space<vmem>>, vector<1x112x96xbf16>
      %58 = vector.shape_cast %57 : vector<1x112x96xbf16> to vector<112x96xbf16>
      %cst_54 = arith.constant dense<0.000000e+00> : vector<6x96xf32>
      %59 = tpu.matmul %56, %58, %cst_54 {dimension_numbers = #tpu.dot_dimension_numbers<[1], [0], [0], [1], [0, 0, 1, 1], [], []>} : vector<6x112xbf16>, vector<112x96xbf16>, vector<6x96xf32> -> vector<6x96xf32>
      %c1_55 = arith.constant 1 : index
      %c0_56 = arith.constant 0 : index
      %c0_57 = arith.constant 0 : index
      %60 = vector.load %arg3[%c1_55, %c0_56, %c0_57] : memref<3x6x14xbf16, #tpu.memory_space<vmem>>, vector<1x6x14xbf16>
      %61 = vector.shape_cast %60 : vector<1x6x14xbf16> to vector<6x14xbf16>
      %cst_58 = arith.constant dense<0.000000e+00> : vector<6x112xf32>
      %62 = tpu.matmul %61, %52, %cst_58 {dimension_numbers = #tpu.dot_dimension_numbers<[1], [0], [0], [1], [0, 0, 1, 1], [], []>} : vector<6x14xbf16>, vector<14x112xbf16>, vector<6x112xf32> -> vector<6x112xf32>
      %63 = arith.truncf %62 : vector<6x112xf32> to vector<6x112xbf16>
      %c1_59 = arith.constant 1 : index
      %c0_60 = arith.constant 0 : index
      %c0_61 = arith.constant 0 : index
      %64 = vector.load %arg4[%c1_59, %c0_60, %c0_61] : memref<3x112x96xbf16, #tpu.memory_space<vmem>>, vector<1x112x96xbf16>
      %65 = vector.shape_cast %64 : vector<1x112x96xbf16> to vector<112x96xbf16>
      %cst_62 = arith.constant dense<0.000000e+00> : vector<6x96xf32>
      %66 = tpu.matmul %63, %65, %cst_62 {dimension_numbers = #tpu.dot_dimension_numbers<[1], [0], [0], [1], [0, 0, 1, 1], [], []>} : vector<6x112xbf16>, vector<112x96xbf16>, vector<6x96xf32> -> vector<6x96xf32>
      %67 = arith.addf %59, %66 : vector<6x96xf32>
      %c2_63 = arith.constant 2 : index
      %c0_64 = arith.constant 0 : index
      %c0_65 = arith.constant 0 : index
      %68 = vector.load %arg3[%c2_63, %c0_64, %c0_65] : memref<3x6x14xbf16, #tpu.memory_space<vmem>>, vector<1x6x14xbf16>
      %69 = vector.shape_cast %68 : vector<1x6x14xbf16> to vector<6x14xbf16>
      %cst_66 = arith.constant dense<0.000000e+00> : vector<6x112xf32>
      %70 = tpu.matmul %69, %52, %cst_66 {dimension_numbers = #tpu.dot_dimension_numbers<[1], [0], [0], [1], [0, 0, 1, 1], [], []>} : vector<6x14xbf16>, vector<14x112xbf16>, vector<6x112xf32> -> vector<6x112xf32>
      %71 = arith.truncf %70 : vector<6x112xf32> to vector<6x112xbf16>
      %c2_67 = arith.constant 2 : index
      %c0_68 = arith.constant 0 : index
      %c0_69 = arith.constant 0 : index
      %72 = vector.load %arg4[%c2_67, %c0_68, %c0_69] : memref<3x112x96xbf16, #tpu.memory_space<vmem>>, vector<1x112x96xbf16>
      %73 = vector.shape_cast %72 : vector<1x112x96xbf16> to vector<112x96xbf16>
      %cst_70 = arith.constant dense<0.000000e+00> : vector<6x96xf32>
      %74 = tpu.matmul %71, %73, %cst_70 {dimension_numbers = #tpu.dot_dimension_numbers<[1], [0], [0], [1], [0, 0, 1, 1], [], []>} : vector<6x112xbf16>, vector<112x96xbf16>, vector<6x96xf32> -> vector<6x96xf32>
      %75 = arith.addf %67, %74 : vector<6x96xf32>
      %c0_71 = arith.constant 0 : index
      %c0_72 = arith.constant 0 : index
      %76 = vector.load %arg5[%c0_71, %c0_72] : memref<96x16xf32, #tpu.memory_space<vmem>>, vector<96x16xf32>
      %cst_73 = arith.constant dense<0.000000e+00> : vector<6x16xf32>
      %77 = tpu.matmul %75, %76, %cst_73 {dimension_numbers = #tpu.dot_dimension_numbers<[1], [0], [0], [1], [0, 0, 1, 1], [], []>} : vector<6x96xf32>, vector<96x16xf32>, vector<6x16xf32> -> vector<6x16xf32>
      %78 = arith.mulf %75, %75 : vector<6x96xf32>
      %c0_74 = arith.constant 0 : index
      %c0_75 = arith.constant 0 : index
      %79 = vector.load %arg5[%c0_74, %c0_75] : memref<96x16xf32, #tpu.memory_space<vmem>>, vector<96x16xf32>
      %cst_76 = arith.constant dense<0.000000e+00> : vector<6x16xf32>
      %80 = tpu.matmul %78, %79, %cst_76 {dimension_numbers = #tpu.dot_dimension_numbers<[1], [0], [0], [1], [0, 0, 1, 1], [], []>} : vector<6x96xf32>, vector<96x16xf32>, vector<6x16xf32> -> vector<6x16xf32>
      %c0_77 = arith.constant 0 : index
      %c0_78 = arith.constant 0 : index
      %81 = vector.load %arg9[%c0_77, %c0_78] : memref<1x16xf32, #tpu.memory_space<vmem>>, vector<1x16xf32>
      %cst_79 = arith.constant dense<0.000000e+00> : vector<16xf32>
      %82 = vector.multi_reduction <add>, %77, %cst_79 [0] : vector<6x16xf32> to vector<16xf32>
      %83 = vector.shape_cast %82 : vector<16xf32> to vector<1x16xf32>
      %84 = arith.addf %81, %83 : vector<1x16xf32>
      %c0_80 = arith.constant 0 : index
      %c0_81 = arith.constant 0 : index
      %85 = vector.load %arg9[%c0_80, %c0_81] : memref<1x16xf32, #tpu.memory_space<vmem>>, vector<1x16xf32>
      tpu.vector_store %arg9[%c0_80, %c0_81], %84 {strides = array<i32>} : memref<1x16xf32, #tpu.memory_space<vmem>>, vector<1x16xf32>,
      %c0_82 = arith.constant 0 : index
      %c0_83 = arith.constant 0 : index
      %86 = vector.load %arg10[%c0_82, %c0_83] : memref<1x16xf32, #tpu.memory_space<vmem>>, vector<1x16xf32>
      %cst_84 = arith.constant dense<0.000000e+00> : vector<16xf32>
      %87 = vector.multi_reduction <add>, %80, %cst_84 [0] : vector<6x16xf32> to vector<16xf32>
      %88 = vector.shape_cast %87 : vector<16xf32> to vector<1x16xf32>
      %89 = arith.addf %86, %88 : vector<1x16xf32>
      %c0_85 = arith.constant 0 : index
      %c0_86 = arith.constant 0 : index
      %90 = vector.load %arg10[%c0_85, %c0_86] : memref<1x16xf32, #tpu.memory_space<vmem>>, vector<1x16xf32>
      tpu.vector_store %arg10[%c0_85, %c0_86], %89 {strides = array<i32>} : memref<1x16xf32, #tpu.memory_space<vmem>>, vector<1x16xf32>,
    } else {
    }
    %c1_i32 = arith.constant 1 : i32
    %8 = arith.cmpi eq, %arg0, %c1_i32 : i32
    %9 = arith.extui %8 : i1 to i32
    %c0_i32_4 = arith.constant 0 : i32
    %10 = arith.cmpi ne, %9, %c0_i32_4 : i32
    scf.if %10 {
      %c0 = arith.constant 0 : index
      %c0_5 = arith.constant 0 : index
      %11 = vector.load %arg9[%c0, %c0_5] : memref<1x16xf32, #tpu.memory_space<vmem>>, vector<1x16xf32>
      %cst = arith.constant 0.013888889 : f32
      %12 = vector.broadcast %cst : f32 to vector<1x16xf32>
      %13 = arith.mulf %11, %12 : vector<1x16xf32>
      %c0_6 = arith.constant 0 : index
      %c0_7 = arith.constant 0 : index
      %14 = vector.load %arg10[%c0_6, %c0_7] : memref<1x16xf32, #tpu.memory_space<vmem>>, vector<1x16xf32>
      %cst_8 = arith.constant 0.013888889 : f32
      %15 = vector.broadcast %cst_8 : f32 to vector<1x16xf32>
      %16 = arith.mulf %14, %15 : vector<1x16xf32>
      %17 = arith.mulf %13, %13 : vector<1x16xf32>
      %18 = arith.subf %16, %17 : vector<1x16xf32>
      %cst_9 = arith.constant 9.99999974E-6 : f32
      %19 = vector.broadcast %cst_9 : f32 to vector<1x16xf32>
      %20 = arith.addf %18, %19 : vector<1x16xf32>
      %21 = math.rsqrt %20 : vector<1x16xf32>
      %c0_10 = arith.constant 0 : index
      %c0_11 = arith.constant 0 : index
      %22 = vector.load %arg6[%c0_10, %c0_11] : memref<1x16xf32, #tpu.memory_space<vmem>>, vector<1x16xf32>
      %23 = arith.mulf %22, %21 : vector<1x16xf32>
      %c0_12 = arith.constant 0 : index
      %c0_13 = arith.constant 0 : index
      %24 = vector.load %arg7[%c0_12, %c0_13] : memref<1x16xf32, #tpu.memory_space<vmem>>, vector<1x16xf32>
      %25 = arith.mulf %13, %23 : vector<1x16xf32>
      %26 = arith.subf %24, %25 : vector<1x16xf32>
      %27 = tpu.concatenate %23, %23, %23, %23, %23, %23 in 1 : vector<1x16xf32>, vector<1x16xf32>, vector<1x16xf32>, vector<1x16xf32>, vector<1x16xf32>, vector<1x16xf32> -> vector<1x96xf32>
      %28 = tpu.concatenate %26, %26, %26, %26, %26, %26 in 1 : vector<1x16xf32>, vector<1x16xf32>, vector<1x16xf32>, vector<1x16xf32>, vector<1x16xf32>, vector<1x16xf32> -> vector<1x96xf32>
      %c0_14 = arith.constant 0 : index
      %c0_15 = arith.constant 0 : index
      %c0_16 = arith.constant 0 : index
      %29 = vector.load %arg2[%c0_14, %c0_15, %c0_16] : memref<2x14x112xbf16, #tpu.memory_space<vmem>>, vector<1x14x112xbf16>
      %30 = vector.shape_cast %29 : vector<1x14x112xbf16> to vector<14x112xbf16>
      %c0_17 = arith.constant 0 : index
      %c0_18 = arith.constant 0 : index
      %c0_19 = arith.constant 0 : index
      %31 = vector.load %arg3[%c0_17, %c0_18, %c0_19] : memref<3x6x14xbf16, #tpu.memory_space<vmem>>, vector<1x6x14xbf16>
      %32 = vector.shape_cast %31 : vector<1x6x14xbf16> to vector<6x14xbf16>
      %cst_20 = arith.constant dense<0.000000e+00> : vector<6x112xf32>
      %33 = tpu.matmul %32, %30, %cst_20 {dimension_numbers = #tpu.dot_dimension_numbers<[1], [0], [0], [1], [0, 0, 1, 1], [], []>} : vector<6x14xbf16>, vector<14x112xbf16>, vector<6x112xf32> -> vector<6x112xf32>
      %34 = arith.truncf %33 : vector<6x112xf32> to vector<6x112xbf16>
      %c0_21 = arith.constant 0 : index
      %c0_22 = arith.constant 0 : index
      %c0_23 = arith.constant 0 : index
      %35 = vector.load %arg4[%c0_21, %c0_22, %c0_23] : memref<3x112x96xbf16, #tpu.memory_space<vmem>>, vector<1x112x96xbf16>
      %36 = vector.shape_cast %35 : vector<1x112x96xbf16> to vector<112x96xbf16>
      %cst_24 = arith.constant dense<0.000000e+00> : vector<6x96xf32>
      %37 = tpu.matmul %34, %36, %cst_24 {dimension_numbers = #tpu.dot_dimension_numbers<[1], [0], [0], [1], [0, 0, 1, 1], [], []>} : vector<6x112xbf16>, vector<112x96xbf16>, vector<6x96xf32> -> vector<6x96xf32>
      %c1 = arith.constant 1 : index
      %c0_25 = arith.constant 0 : index
      %c0_26 = arith.constant 0 : index
      %38 = vector.load %arg3[%c1, %c0_25, %c0_26] : memref<3x6x14xbf16, #tpu.memory_space<vmem>>, vector<1x6x14xbf16>
      %39 = vector.shape_cast %38 : vector<1x6x14xbf16> to vector<6x14xbf16>
      %cst_27 = arith.constant dense<0.000000e+00> : vector<6x112xf32>
      %40 = tpu.matmul %39, %30, %cst_27 {dimension_numbers = #tpu.dot_dimension_numbers<[1], [0], [0], [1], [0, 0, 1, 1], [], []>} : vector<6x14xbf16>, vector<14x112xbf16>, vector<6x112xf32> -> vector<6x112xf32>
      %41 = arith.truncf %40 : vector<6x112xf32> to vector<6x112xbf16>
      %c1_28 = arith.constant 1 : index
      %c0_29 = arith.constant 0 : index
      %c0_30 = arith.constant 0 : index
      %42 = vector.load %arg4[%c1_28, %c0_29, %c0_30] : memref<3x112x96xbf16, #tpu.memory_space<vmem>>, vector<1x112x96xbf16>
      %43 = vector.shape_cast %42 : vector<1x112x96xbf16> to vector<112x96xbf16>
      %cst_31 = arith.constant dense<0.000000e+00> : vector<6x96xf32>
      %44 = tpu.matmul %41, %43, %cst_31 {dimension_numbers = #tpu.dot_dimension_numbers<[1], [0], [0], [1], [0, 0, 1, 1], [], []>} : vector<6x112xbf16>, vector<112x96xbf16>, vector<6x96xf32> -> vector<6x96xf32>
      %45 = arith.addf %37, %44 : vector<6x96xf32>
      %c2 = arith.constant 2 : index
      %c0_32 = arith.constant 0 : index
      %c0_33 = arith.constant 0 : index
      %46 = vector.load %arg3[%c2, %c0_32, %c0_33] : memref<3x6x14xbf16, #tpu.memory_space<vmem>>, vector<1x6x14xbf16>
      %47 = vector.shape_cast %46 : vector<1x6x14xbf16> to vector<6x14xbf16>
      %cst_34 = arith.constant dense<0.000000e+00> : vector<6x112xf32>
      %48 = tpu.matmul %47, %30, %cst_34 {dimension_numbers = #tpu.dot_dimension_numbers<[1], [0], [0], [1], [0, 0, 1, 1], [], []>} : vector<6x14xbf16>, vector<14x112xbf16>, vector<6x112xf32> -> vector<6x112xf32>
      %49 = arith.truncf %48 : vector<6x112xf32> to vector<6x112xbf16>
      %c2_35 = arith.constant 2 : index
      %c0_36 = arith.constant 0 : index
      %c0_37 = arith.constant 0 : index
      %50 = vector.load %arg4[%c2_35, %c0_36, %c0_37] : memref<3x112x96xbf16, #tpu.memory_space<vmem>>, vector<1x112x96xbf16>
      %51 = vector.shape_cast %50 : vector<1x112x96xbf16> to vector<112x96xbf16>
      %cst_38 = arith.constant dense<0.000000e+00> : vector<6x96xf32>
      %52 = tpu.matmul %49, %51, %cst_38 {dimension_numbers = #tpu.dot_dimension_numbers<[1], [0], [0], [1], [0, 0, 1, 1], [], []>} : vector<6x112xbf16>, vector<112x96xbf16>, vector<6x96xf32> -> vector<6x96xf32>
      %53 = arith.addf %45, %52 : vector<6x96xf32>
      %54 = vector.broadcast %27 : vector<1x96xf32> to vector<6x96xf32>
      %55 = arith.mulf %53, %54 : vector<6x96xf32>
      %56 = vector.broadcast %28 : vector<1x96xf32> to vector<6x96xf32>
      %57 = arith.addf %55, %56 : vector<6x96xf32>
      %cst_39 = arith.constant 0.000000e+00 : f32
      %58 = vector.broadcast %cst_39 : f32 to vector<6x96xf32>
      %59 = arith.maximumf %57, %58 : vector<6x96xf32>
      %c0_40 = arith.constant 0 : index
      %c0_41 = arith.constant 0 : index
      %c0_42 = arith.constant 0 : index
      %60 = vector.load %arg8[%c0_40, %c0_41, %c0_42] : memref<2x6x96xf32, #tpu.memory_space<vmem>>, vector<1x6x96xf32>
      %61 = vector.shape_cast %60 : vector<1x6x96xf32> to vector<6x96xf32>
      %62 = vector.shape_cast %59 : vector<6x96xf32> to vector<1x6x96xf32>
      tpu.vector_store %arg8[%c0_40, %c0_41, %c0_42], %62 {strides = array<i32>} : memref<2x6x96xf32, #tpu.memory_space<vmem>>, vector<1x6x96xf32>,
      %c1_43 = arith.constant 1 : index
      %c0_44 = arith.constant 0 : index
      %c0_45 = arith.constant 0 : index
      %63 = vector.load %arg2[%c1_43, %c0_44, %c0_45] : memref<2x14x112xbf16, #tpu.memory_space<vmem>>, vector<1x14x112xbf16>
      %64 = vector.shape_cast %63 : vector<1x14x112xbf16> to vector<14x112xbf16>
      %c0_46 = arith.constant 0 : index
      %c0_47 = arith.constant 0 : index
      %c0_48 = arith.constant 0 : index
      %65 = vector.load %arg3[%c0_46, %c0_47, %c0_48] : memref<3x6x14xbf16, #tpu.memory_space<vmem>>, vector<1x6x14xbf16>
      %66 = vector.shape_cast %65 : vector<1x6x14xbf16> to vector<6x14xbf16>
      %cst_49 = arith.constant dense<0.000000e+00> : vector<6x112xf32>
      %67 = tpu.matmul %66, %64, %cst_49 {dimension_numbers = #tpu.dot_dimension_numbers<[1], [0], [0], [1], [0, 0, 1, 1], [], []>} : vector<6x14xbf16>, vector<14x112xbf16>, vector<6x112xf32> -> vector<6x112xf32>
      %68 = arith.truncf %67 : vector<6x112xf32> to vector<6x112xbf16>
      %c0_50 = arith.constant 0 : index
      %c0_51 = arith.constant 0 : index
      %c0_52 = arith.constant 0 : index
      %69 = vector.load %arg4[%c0_50, %c0_51, %c0_52] : memref<3x112x96xbf16, #tpu.memory_space<vmem>>, vector<1x112x96xbf16>
      %70 = vector.shape_cast %69 : vector<1x112x96xbf16> to vector<112x96xbf16>
      %cst_53 = arith.constant dense<0.000000e+00> : vector<6x96xf32>
      %71 = tpu.matmul %68, %70, %cst_53 {dimension_numbers = #tpu.dot_dimension_numbers<[1], [0], [0], [1], [0, 0, 1, 1], [], []>} : vector<6x112xbf16>, vector<112x96xbf16>, vector<6x96xf32> -> vector<6x96xf32>
      %c1_54 = arith.constant 1 : index
      %c0_55 = arith.constant 0 : index
      %c0_56 = arith.constant 0 : index
      %72 = vector.load %arg3[%c1_54, %c0_55, %c0_56] : memref<3x6x14xbf16, #tpu.memory_space<vmem>>, vector<1x6x14xbf16>
      %73 = vector.shape_cast %72 : vector<1x6x14xbf16> to vector<6x14xbf16>
      %cst_57 = arith.constant dense<0.000000e+00> : vector<6x112xf32>
      %74 = tpu.matmul %73, %64, %cst_57 {dimension_numbers = #tpu.dot_dimension_numbers<[1], [0], [0], [1], [0, 0, 1, 1], [], []>} : vector<6x14xbf16>, vector<14x112xbf16>, vector<6x112xf32> -> vector<6x112xf32>
      %75 = arith.truncf %74 : vector<6x112xf32> to vector<6x112xbf16>
      %c1_58 = arith.constant 1 : index
      %c0_59 = arith.constant 0 : index
      %c0_60 = arith.constant 0 : index
      %76 = vector.load %arg4[%c1_58, %c0_59, %c0_60] : memref<3x112x96xbf16, #tpu.memory_space<vmem>>, vector<1x112x96xbf16>
      %77 = vector.shape_cast %76 : vector<1x112x96xbf16> to vector<112x96xbf16>
      %cst_61 = arith.constant dense<0.000000e+00> : vector<6x96xf32>
      %78 = tpu.matmul %75, %77, %cst_61 {dimension_numbers = #tpu.dot_dimension_numbers<[1], [0], [0], [1], [0, 0, 1, 1], [], []>} : vector<6x112xbf16>, vector<112x96xbf16>, vector<6x96xf32> -> vector<6x96xf32>
      %79 = arith.addf %71, %78 : vector<6x96xf32>
      %c2_62 = arith.constant 2 : index
      %c0_63 = arith.constant 0 : index
      %c0_64 = arith.constant 0 : index
      %80 = vector.load %arg3[%c2_62, %c0_63, %c0_64] : memref<3x6x14xbf16, #tpu.memory_space<vmem>>, vector<1x6x14xbf16>
      %81 = vector.shape_cast %80 : vector<1x6x14xbf16> to vector<6x14xbf16>
      %cst_65 = arith.constant dense<0.000000e+00> : vector<6x112xf32>
      %82 = tpu.matmul %81, %64, %cst_65 {dimension_numbers = #tpu.dot_dimension_numbers<[1], [0], [0], [1], [0, 0, 1, 1], [], []>} : vector<6x14xbf16>, vector<14x112xbf16>, vector<6x112xf32> -> vector<6x112xf32>
      %83 = arith.truncf %82 : vector<6x112xf32> to vector<6x112xbf16>
      %c2_66 = arith.constant 2 : index
      %c0_67 = arith.constant 0 : index
      %c0_68 = arith.constant 0 : index
      %84 = vector.load %arg4[%c2_66, %c0_67, %c0_68] : memref<3x112x96xbf16, #tpu.memory_space<vmem>>, vector<1x112x96xbf16>
      %85 = vector.shape_cast %84 : vector<1x112x96xbf16> to vector<112x96xbf16>
      %cst_69 = arith.constant dense<0.000000e+00> : vector<6x96xf32>
      %86 = tpu.matmul %83, %85, %cst_69 {dimension_numbers = #tpu.dot_dimension_numbers<[1], [0], [0], [1], [0, 0, 1, 1], [], []>} : vector<6x112xbf16>, vector<112x96xbf16>, vector<6x96xf32> -> vector<6x96xf32>
      %87 = arith.addf %79, %86 : vector<6x96xf32>
      %88 = vector.broadcast %27 : vector<1x96xf32> to vector<6x96xf32>
      %89 = arith.mulf %87, %88 : vector<6x96xf32>
      %90 = vector.broadcast %28 : vector<1x96xf32> to vector<6x96xf32>
      %91 = arith.addf %89, %90 : vector<6x96xf32>
      %cst_70 = arith.constant 0.000000e+00 : f32
      %92 = vector.broadcast %cst_70 : f32 to vector<6x96xf32>
      %93 = arith.maximumf %91, %92 : vector<6x96xf32>
      %c1_71 = arith.constant 1 : index
      %c0_72 = arith.constant 0 : index
      %c0_73 = arith.constant 0 : index
      %94 = vector.load %arg8[%c1_71, %c0_72, %c0_73] : memref<2x6x96xf32, #tpu.memory_space<vmem>>, vector<1x6x96xf32>
      %95 = vector.shape_cast %94 : vector<1x6x96xf32> to vector<6x96xf32>
      %96 = vector.shape_cast %93 : vector<6x96xf32> to vector<1x6x96xf32>
      tpu.vector_store %arg8[%c1_71, %c0_72, %c0_73], %96 {strides = array<i32>} : memref<2x6x96xf32, #tpu.memory_space<vmem>>, vector<1x6x96xf32>,
    } else {
    }
    return
  }
  func.func @transform_0(%arg0: i32, %arg1: i32) -> (i32, i32, i32) {
    %c0_i32 = arith.constant 0 : i32
    %c0_i32_0 = arith.constant 0 : i32
    %c0_i32_1 = arith.constant 0 : i32
    return %arg1, %c0_i32, %c0_i32_0 : i32, i32, i32
  }
  func.func @transform_1(%arg0: i32, %arg1: i32) -> (i32, i32, i32) {
    %c0_i32 = arith.constant 0 : i32
    %c0_i32_0 = arith.constant 0 : i32
    %c0_i32_1 = arith.constant 0 : i32
    %c0_i32_2 = arith.constant 0 : i32
    return %c0_i32, %c0_i32_0, %c0_i32_1 : i32, i32, i32
  }
  func.func @transform_2(%arg0: i32, %arg1: i32) -> (i32, i32, i32) {
    %c0_i32 = arith.constant 0 : i32
    %c0_i32_0 = arith.constant 0 : i32
    %c0_i32_1 = arith.constant 0 : i32
    %c0_i32_2 = arith.constant 0 : i32
    return %c0_i32, %c0_i32_0, %c0_i32_1 : i32, i32, i32
  }
  func.func @transform_3(%arg0: i32, %arg1: i32) -> (i32, i32) {
    %c0_i32 = arith.constant 0 : i32
    %c0_i32_0 = arith.constant 0 : i32
    %c0_i32_1 = arith.constant 0 : i32
    return %c0_i32, %c0_i32_0 : i32, i32
  }
  func.func @transform_4(%arg0: i32, %arg1: i32) -> (i32, i32) {
    %c0_i32 = arith.constant 0 : i32
    %c0_i32_0 = arith.constant 0 : i32
    %c0_i32_1 = arith.constant 0 : i32
    return %c0_i32, %c0_i32_0 : i32, i32
  }
  func.func @transform_5(%arg0: i32, %arg1: i32) -> (i32, i32) {
    %c0_i32 = arith.constant 0 : i32
    %c0_i32_0 = arith.constant 0 : i32
    %c0_i32_1 = arith.constant 0 : i32
    return %c0_i32, %c0_i32_0 : i32, i32
  }
  func.func @transform_6(%arg0: i32, %arg1: i32) -> (i32, i32, i32) {
    %0 = arith.muli %arg0, %arg1 : i32
    %c0_i32 = arith.constant 0 : i32
    %c0_i32_0 = arith.constant 0 : i32
    %c0_i32_1 = arith.constant 0 : i32
    return %0, %c0_i32, %c0_i32_0 : i32, i32, i32
  }
}

</mosaic_0001>

<bundles_post_ra>
// kernel: _lambda_.2
= control target key start
LH: loop header
LB: loop body
LE: loop exit
PB: predicated region body
PF: predicated region fallthrough
CT: control target
= control target key end

     0   :  { %s3566_s21 = smov 0   ;;  %s3568_s22 = smov 0   ;;  %s4114_s0 = inlined_call_operand.vmem [shape: bf16[2,16,64], index: 0, kind: input, shape index: {}]   ;;  %s4115_s1 = inlined_call_operand.vmem [shape: bf16[3,14,16], index: 1, kind: input, shape index: {}]   ;;  %s4116_s2 = inlined_call_operand.vmem [shape: bf16[3,64,112], index: 2, kind: input, shape index: {}]   ;;  %s4117_s3 = inlined_call_operand.vmem [shape: f32[112,8], index: 3, kind: input, shape index: {}]   ;;  %s4118_s4 = inlined_call_operand.vmem [shape: f32[1,8], index: 4, kind: input, shape index: {}]   ;;  %s4119_s5 = inlined_call_operand.vmem [shape: f32[1,8], index: 5, kind: input, shape index: {}]   ;;  %s4120_s6 = inlined_call_operand.vmem [shape: bf16[2,14,112], index: 6, kind: output, shape index: {}]  }
   0x1   :  { %s3570_s23 = smov 0  }
   0x2 LB: > { %s28_s24 = sadd.s32 1, %s3507_s22  ;;  %p2550_p0 = scmp.ge.s32.totalorder %s3511_s23, 1  ;;  %s3511_s23 = sphi %s3570_s23, %s16_s23   ;;  %s3507_s22 = sphi %s3568_s22, %s4122_s22   ;;  %s3503_s21 = sphi %s3566_s21, %s4121_s21  }
   0x3   : > { %p30_p1 = scmp.ge.s32.totalorder %s28_s24, 2  ;;  %p228_p2 = scmp.lt.s32.totalorder %s3511_s23, 3 }
   0x5   : > { %s4124_s24 = smov (%p30_p1, %s28_s24), 0  ;;  %p229_p3 = pnand %p2550_p0, %p228_p2 }
   0x6   : > { %p278_p4 = scmp.eq.s32.totalorder (!%p229_p3), %s3503_s21, 0 }
   0x7   : > { %232 = sbr.rel (%p229_p3) target bundleno = 1919 (0x77f), region = 44 }
   0xe   : > { %283 = sbr.rel (!%p278_p4) target bundleno = 21 (0x15), region = 48  ;;  %vm284_vm0 = vcmask (%p278_p4), 57344   ;;  %v3513_v0 = vmov (%p278_p4), 0.0  }
   0xf   : > { %285 = vst.msk [vmem:[#allocation2] sm:$0x1] (%p278_p4), %vm284_vm0, %v3513_v0  ;;  %286 = vst.msk [vmem:[#allocation3] sm:$0x1] (%p278_p4), %vm284_vm0, %v3513_v0 }
  0x15 PF: > { %p2552_p5 = scmp.ne.s32.totalorder %s3503_s21, 0 }
  0x16   : > { %v3423_v1 = vld [vmem:[%s4114_s0] sm:$0xff] (!%p2552_p5)   ;;  %v3514_v2 = vmov (!%p2552_p5), 0.0   ;;  %vm305_vm1 = vcmask (!%p2552_p5), 130048   ;;  %vm3515_vm2 = vmmov (!%p2552_p5), 0   ;;  %v3424_v3 = vld [vmem:[%s4115_s1 + $0x8] sm:$0x7f] (!%p2552_p5)  }
  0x17   : > { %289 = sbr.rel (%p2552_p5) target bundleno = 1210 (0x4ba), region = 52  ;;  %2903 = vmatprep.subr.bf16.mxu1 (!%p2552_p5), %v3514_v2  ;;  %2897 = vmatprep.subr.bf16.mxu0 (!%p2552_p5), %v3514_v2  ;;  %v3425_v4 = vld [vmem:[%s4115_s1] sm:$0x7f] (!%p2552_p5)   ;;  %v3426_v6 = vld [vmem:[%s4115_s1 + $0x10] sm:$0x7f] (!%p2552_p5)   ;;  %v3428_v7 = vld [vmem:[%s4116_s2 + $0x28] sm:$0xff] (!%p2552_p5)  }
  0x18   : > { %2904 = vmatpush3.bf16.msra.mxu1 (!%p2552_p5), %v3423_v1  ;;  %2905 = vmatprep.mubr.msk.bf16.mxu1 (!%p2552_p5), %vm3515_vm2, %v3514_v2  ;;  %v3427_v5 = vld [vmem:[%s4116_s2 + $0x20] sm:$0xff] (!%p2552_p5)   ;;  %v3429_v8 = vld [vmem:[%s4116_s2 + $0x30] sm:$0xff] (!%p2552_p5)   ;;  %v3430_v9 = vld [vmem:[%s4116_s2 + $0x38] sm:$0xff] (!%p2552_p5)   ;;  %vm445_vm3 = vcmask (!%p2552_p5), 523264   ;;  %vm704_vm4 = vcmask (!%p2552_p5), 916480   ;;  %vm872_vm5 = vcmask (!%p2552_p5), 62464  }
  0x19   : > { %2898 = vmatpush3.bf16.msra.mxu0 (!%p2552_p5), %v3423_v1  ;;  %2899 = vmatprep.mubr.msk.bf16.mxu0 (!%p2552_p5), %vm3515_vm2, %v3514_v2  ;;  %v690_v10 = vld [vmem:[%s4117_s3] sm:$0xff] (!%p2552_p5)  ;;  %v691_v11 = vld [vmem:[%s4117_s3 + $0x8] sm:$0xff] (!%p2552_p5)  ;;  %v692_v13 = vld [vmem:[%s4117_s3 + $0x10] sm:$0xff] (!%p2552_p5)  ;;  %vm870_vm6 = vcmask (!%p2552_p5), 64512   ;;  %vm882_vm7 = vcmask (!%p2552_p5), 57344  }
  0x1a   : > { %2933 = vmatprep.subr.bf16.mxu1 (!%p2552_p5), %v3514_v2  ;;  %2909 = vmatprep.subr.bf16.mxu0 (!%p2552_p5), %v3514_v2  ;;  %v3637_v12 = vpack.c.bf16 (!%p2552_p5), %v691_v11, %v690_v10  ;;  %v693_v14 = vld [vmem:[%s4117_s3 + $0x18] sm:$0xff] (!%p2552_p5)  ;;  %v694_v16 = vld [vmem:[%s4117_s3 + $0x20] sm:$0xff] (!%p2552_p5)  ;;  %v695_v17 = vld [vmem:[%s4117_s3 + $0x28] sm:$0xff] (!%p2552_p5) }
  0x1b   : > { %2906 = vmatmul.mubr.msk.bf16.vlgmr.msra.gmra.mrb[0].mxu1 (!%p2552_p5), %vm305_vm1, %v3424_v3  ;;  %v3645_v15 = vpack.c.bf16 (!%p2552_p5), %v693_v14, %v692_v13  ;;  %v696_v18 = vld [vmem:[%s4117_s3 + $0x30] sm:$0xff] (!%p2552_p5)  ;;  %v3660_v19 = vpack.c.bf16 (!%p2552_p5), %v695_v17, %v694_v16  ;;  %v697_v20 = vld [vmem:[%s4117_s3 + $0x38] sm:$0xff] (!%p2552_p5)  ;;  %v698_v22 = vld [vmem:[%s4117_s3 + $0x40] sm:$0xff] (!%p2552_p5) }
  0x1c   : > { %2900 = vmatmul.mubr.msk.bf16.vlgmr.msra.gmra.mrb[0].mxu0 (!%p2552_p5), %vm305_vm1, %v3425_v4  ;;  %2934 = vmatpush3.bf16.msra.mxu1 (!%p2552_p5), %v3423_v1  ;;  %v3665_v21 = vpack.c.bf16 (!%p2552_p5), %v697_v20, %v696_v18  ;;  %v699_v23 = vld [vmem:[%s4117_s3 + $0x48] sm:$0xff] (!%p2552_p5)  ;;  %v700_v25 = vld [vmem:[%s4117_s3 + $0x50] sm:$0xff] (!%p2552_p5)  ;;  %v701_v26 = vld [vmem:[%s4117_s3 + $0x58] sm:$0xff] (!%p2552_p5) }
  0x1d   : > { %2935 = vmatprep.mubr.msk.bf16.mxu1 (!%p2552_p5), %vm3515_vm2, %v3514_v2  ;;  %2910 = vmatpush3.bf16.msra.mxu0 (!%p2552_p5), %v3427_v5  ;;  %v3676_v24 = vpack.c.bf16 (!%p2552_p5), %v699_v23, %v698_v22  ;;  %v3686_v27 = vpack.c.bf16 (!%p2552_p5), %v701_v26, %v700_v25  ;;  %v702_v28 = vld [vmem:[%s4117_s3 + $0x60] sm:$0xff] (!%p2552_p5)  ;;  %v703_v29 = vld [vmem:[%s4117_s3 + $0x68] sm:$0xff] (!%p2552_p5)  ;;  %v3433_v45 = vld [vmem:[%s4116_s2 + $0x10] sm:$0xff] (!%p2552_p5)  }
  0x1e   : > { %2911 = vmatprep.subr.bf16.mxu0 %v3514_v2  ;;  %2917 = vmatprep.mubr.msk.bf16.mxu0 %vm3515_vm2, %v3514_v2  ;;  %v3696_v30 = vpack.c.bf16 %v703_v29, %v702_v28  ;;  %v3431_v35 = vld [vmem:[%s4116_s2] sm:$0xff]   ;;  %v3432_v42 = vld [vmem:[%s4116_s2 + $0x8] sm:$0xff]   ;;  %v3434_v49 = vld [vmem:[%s4116_s2 + $0x18] sm:$0xff]  }
  0x1f   : > { %3238 = vmatprep.subr.bf16.mxu1 %v3637_v12  ;;  %v3435_v50 = vld [vmem:[%s4116_s2 + $0x40] sm:$0xff]   ;;  %v3436_v51 = vld [vmem:[%s4116_s2 + $0x48] sm:$0xff]   ;;  %v3437_v52 = vld [vmem:[%s4116_s2 + $0x50] sm:$0xff]  }
  0x20   : > { %v3438_v53 = vld [vmem:[%s4116_s2 + $0x58] sm:$0xff]   ;;  %v3742_v54 = vld [vmem:[%s4114_s0 + $0x8] sm:$0xff]   ;;  %v3440_v55 = vld [vmem:[%s4115_s1] sm:$0x7f]  }
  0x21   : > { %2912 = vmatpush3.bf16.msra.mxu0 %v3428_v7  ;;  %v3441_v56 = vld [vmem:[%s4115_s1 + $0x8] sm:$0x7f]   ;;  %v3443_v57 = vld [vmem:[%s4116_s2 + $0x20] sm:$0xff]   ;;  %v3445_v59 = vld [vmem:[%s4116_s2 + $0x30] sm:$0xff]  }
  0x22   : > { %2913 = vmatprep.subr.bf16.mxu0 %v3514_v2  ;;  %v3444_v58 = vld [vmem:[%s4116_s2 + $0x28] sm:$0xff]   ;;  %v3446_v60 = vld [vmem:[%s4116_s2 + $0x38] sm:$0xff]   ;;  %v3447_v11 = vld [vmem:[%s4116_s2] sm:$0xff]  }
  0x23   : > { %2936 = vmatmul.mubr.msk.bf16.vlgmr.msra.gmra.mrb[4].mxu1 %vm305_vm1, %v3426_v6  ;;  %v3448_v16 = vld [vmem:[%s4116_s2 + $0x8] sm:$0xff]   ;;  %v3449_v17 = vld [vmem:[%s4116_s2 + $0x10] sm:$0xff]   ;;  %v3450_v20 = vld [vmem:[%s4116_s2 + $0x18] sm:$0xff]  }
  0x24   : > { %3240 = vmatpush3.bf16.msra.mxu1 %v3637_v12  ;;  %v3442_v22 = vld [vmem:[%s4115_s1 + $0x10] sm:$0x7f]   ;;  %v3451_v23 = vld [vmem:[%s4116_s2 + $0x40] sm:$0xff]   ;;  %v3452_v25 = vld [vmem:[%s4116_s2 + $0x48] sm:$0xff]  }
  0x25   : > { %2914 = vmatpush3.bf16.msra.mxu0 %v3429_v8  ;;  %3242 = vmatprep.subr.bf16.mxu1 %v3645_v15  ;;  %v3453_v26 = vld [vmem:[%s4116_s2 + $0x50] sm:$0xff]   ;;  %v3454_v28 = vld [vmem:[%s4116_s2 + $0x58] sm:$0xff]  }
  0x26   : > { %2915 = vmatprep.subr.bf16.mxu0 %v3514_v2 }
  0x28   : > { %3244 = vmatpush3.bf16.msra.mxu1 %v3645_v15 }
  0x29   : > { %2916 = vmatpush3.bf16.msra.mxu0 %v3430_v9  ;;  %3246 = vmatprep.subr.bf16.mxu1 %v3660_v19 }
  0x2a   : > { %2921 = vmatprep.subr.bf16.mxu0 %v3514_v2 }
  0x2c   : > { %3248 = vmatpush3.bf16.msra.mxu1 %v3660_v19 }
  0x2d   : > { %3250 = vmatprep.subr.bf16.mxu1 %v3665_v21 }
  0x30   : > { %3252 = vmatpush3.bf16.msra.mxu1 %v3665_v21 }
  0x31   : > { %3254 = vmatprep.subr.bf16.mxu1 %v3676_v24 }
  0x34   : > { %3256 = vmatpush3.bf16.msra.mxu1 %v3676_v24 }
  0x35   : > { %3258 = vmatprep.subr.bf16.mxu1 %v3686_v27 }
  0x38   : > { %3260 = vmatpush3.bf16.msra.mxu1 %v3686_v27 }
  0x39   : > { %3262 = vmatprep.subr.bf16.mxu1 %v3696_v30 }
  0x3c   : > { %3264 = vmatpush3.bf16.msra.mxu1 %v3696_v30 }
  0x3d   : > { %3266 = vmatprep.subr.bf16.mxu1 %v3637_v12 }
  0xee   : > { %v404_v31 = vpop.f32.mrb[0].mxu1 }
  0xef   : > { %v2907_v32 = vpop.f32.mrb[1].mxu1  ;;  %v343_v33 = vpop.f32.mrb[0].mxu0 }
  0xf0   : > { %v407_v34 = vpop.f32.mrb[2].mxu1  ;;  %v2901_v36 = vpop.f32.mrb[1].mxu0 }
  0xf1   : > { %v411_v37 = vpack.c.bf16 %v407_v34, %v404_v31  ;;  %v2908_v38 = vpop.f32.mrb[3].mxu1  ;;  %v346_v39 = vpop.f32.mrb[2].mxu0 }
  0xf2   : > { %v350_v40 = vpack.c.bf16 %v346_v39, %v343_v33  ;;  %v2902_v41 = vpop.f32.mrb[3].mxu0 }
  0xf3   : > { %2918 = vmatmul.mubr.msk.bf16.vlgmr.msra.gmra.mrb[4].mxu0 %vm445_vm3, %v411_v37 }
  0xf4   : > { %2922 = vmatpush3.bf16.msra.mxu0 %v3431_v35  ;;  %2929 = vmatprep.mubr.msk.bf16.mxu0 %vm3515_vm2, %v3514_v2 }
  0xf5   : > { %2923 = vmatprep.subr.bf16.mxu0 %v3514_v2 }
  0xf6   : > { %v603_v43 = vpop.f32.mrb[4].mxu1 }
  0xf7   : > { %v2937_v44 = vpop.f32.mrb[5].mxu1 }
  0xf8   : > { %2924 = vmatpush3.bf16.msra.mxu0 %v3432_v42  ;;  %v606_v46 = vpop.f32.mrb[6].mxu1 }
  0xf9   : > { %2925 = vmatprep.subr.bf16.mxu0 %v3514_v2  ;;  %v610_v47 = vpack.c.bf16 %v606_v46, %v603_v43  ;;  %v2938_v48 = vpop.f32.mrb[7].mxu1 }
  0xfc   : > { %2926 = vmatpush3.bf16.msra.mxu0 %v3433_v45 }
  0xfd   : > { %2927 = vmatprep.subr.bf16.mxu0 %v3514_v2 }
 0x100   : > { %2928 = vmatpush3.bf16.msra.mxu0 %v3434_v49 }
 0x101   : > { %2939 = vmatprep.subr.bf16.mxu0 %v3514_v2 }
 0x103   : > { %2930 = vmatmul.mubr.msk.bf16.vlgmr.msra.gmra.mrb[4].mxu0 %vm445_vm3, %v350_v40 }
 0x104   : > { %2940 = vmatpush3.bf16.msra.mxu0 %v3435_v50  ;;  %2947 = vmatprep.mubr.msk.bf16.mxu0 %vm3515_vm2, %v3514_v2 }
 0x105   : > { %2941 = vmatprep.subr.bf16.mxu0 %v3514_v2 }
 0x108   : > { %2942 = vmatpush3.bf16.msra.mxu0 %v3436_v51 }
 0x109   : > { %2943 = vmatprep.subr.bf16.mxu0 %v3514_v2 }
 0x10c   : > { %2944 = vmatpush3.bf16.msra.mxu0 %v3437_v52 }
 0x10d   : > { %2945 = vmatprep.subr.bf16.mxu0 %v3514_v2 }
 0x110   : > { %2946 = vmatpush3.bf16.msra.mxu0 %v3438_v53 }
 0x111   : > { %3013 = vmatprep.subr.bf16.mxu0 %v3514_v2 }
 0x113   : > { %2948 = vmatmul.mubr.msk.bf16.vlgmr.msra.gmra.mrb[4].mxu0 %vm445_vm3, %v610_v47 }
 0x114   : > { %3014 = vmatpush3.bf16.msra.mxu0 %v3742_v54  ;;  %3015 = vmatprep.mubr.msk.bf16.mxu0 %vm3515_vm2, %v3514_v2 }
 0x115   : > { %3019 = vmatprep.subr.bf16.mxu0 %v3514_v2 }
 0x11b   : > { %3016 = vmatmul.mubr.msk.bf16.vlgmr.msra.gmra.mrb[8].mxu0 %vm305_vm1, %v3440_v55 }
 0x11c   : > { %3020 = vmatpush3.bf16.msra.mxu0 %v3742_v54  ;;  %3021 = vmatprep.mubr.msk.bf16.mxu0 %vm3515_vm2, %v3514_v2 }
 0x11d   : > { %3025 = vmatprep.subr.bf16.mxu0 %v3514_v2 }
 0x123   : > { %3022 = vmatmul.mubr.msk.bf16.vlgmr.msra.gmra.mrb[12].mxu0 %vm305_vm1, %v3441_v56 }
 0x124   : > { %3033 = vmatprep.mubr.msk.bf16.mxu0 %vm3515_vm2, %v3514_v2  ;;  %3026 = vmatpush3.bf16.msra.mxu0 %v3443_v57  ;;  %v884_v57 = vld [vmem:[#allocation3] sm:$0x1] }
 0x125   : > { %3027 = vmatprep.subr.bf16.mxu0 %v3514_v2 }
 0x128   : > { %3028 = vmatpush3.bf16.msra.mxu0 %v3444_v58 }
 0x129   : > { %3029 = vmatprep.subr.bf16.mxu0 %v3514_v2 }
 0x12c   : > { %3030 = vmatpush3.bf16.msra.mxu0 %v3445_v59 }
 0x12d   : > { %3031 = vmatprep.subr.bf16.mxu0 %v3514_v2 }
 0x130   : > { %3032 = vmatpush3.bf16.msra.mxu0 %v3446_v60 }
 0x131   : > { %3037 = vmatprep.subr.bf16.mxu0 %v3514_v2 }
 0x1e6   : > { %v681_v61 = vpop.f32.mrb[4].mxu0 }
 0x1e7   : > { %v786_v62 = vmul.f32 %v681_v61, %v681_v61  ;;  %v2949_v63 = vpop.f32.mrb[5].mxu0  ;;  %2979 = vmatprep.mubr.msk.f32.mxu1 %vm704_vm4, %v681_v61 }
 0x1e8   : > { %v684_v0 = vpop.f32.mrb[6].mxu0 }
 0x1e9   : > { %v2950_v1 = vpop.f32.mrb[7].mxu0  ;;  %2980 = vmatmul.mubr.msk.f32.vlgmr.msra.gmra.mrb[8].mxu1 %vm704_vm4, %v684_v0  ;;  %v787_v18 = vmul.f32 %v684_v0, %v684_v0 }
 0x1ea   : > { %3268 = vmatpush3.bf16.msra.mxu1 %v3637_v12  ;;  %3010 = vmatprep.mubr.msk.f32.mxu1 %vm704_vm4, %v786_v62 }
 0x1eb   : > { %3270 = vmatprep.subr.bf16.mxu1 %v3645_v15 }
 0x1ee   : > { %3272 = vmatpush3.bf16.msra.mxu1 %v3645_v15  ;;  %v949_v3 = vpop.f32.mrb[8].mxu0 }
 0x1ef   : > { %3274 = vmatprep.subr.bf16.mxu1 %v3660_v19  ;;  %v3017_v4 = vpop.f32.mrb[9].mxu0 }
 0x1f0   : > { %v952_v5 = vpop.f32.mrb[10].mxu0 }
 0x1f1   : > { %v956_v6 = vpack.c.bf16 %v952_v5, %v949_v3  ;;  %v3018_v7 = vpop.f32.mrb[11].mxu0 }
 0x1f2   : > { %3276 = vmatpush3.bf16.msra.mxu1 %v3660_v19 }
 0x1f3   : > { %3278 = vmatprep.subr.bf16.mxu1 %v3665_v21 }
 0x1f6   : > { %3280 = vmatpush3.bf16.msra.mxu1 %v3665_v21  ;;  %v1009_v8 = vpop.f32.mrb[12].mxu0 }
 0x1f7   : > { %3282 = vmatprep.subr.bf16.mxu1 %v3676_v24  ;;  %v3023_v9 = vpop.f32.mrb[13].mxu0 }
 0x1f8   : > { %v1012_v10 = vpop.f32.mrb[14].mxu0 }
 0x1f9   : > { %v1016_v13 = vpack.c.bf16 %v1012_v10, %v1009_v8  ;;  %v3024_v14 = vpop.f32.mrb[15].mxu0 }
 0x1fa   : > { %3284 = vmatpush3.bf16.msra.mxu1 %v3676_v24 }
 0x1fb   : > { %3286 = vmatprep.subr.bf16.mxu1 %v3686_v27  ;;  %3034 = vmatmul.mubr.msk.bf16.vlgmr.msra.gmra.mrb[16].mxu0 %vm445_vm3, %v1016_v13 }
 0x1fc   : > { %3038 = vmatpush3.bf16.msra.mxu0 %v3447_v11  ;;  %3045 = vmatprep.mubr.msk.bf16.mxu0 %vm3515_vm2, %v3514_v2 }
 0x1fd   : > { %3039 = vmatprep.subr.bf16.mxu0 %v3514_v2 }
 0x1fe   : > { %3288 = vmatpush3.bf16.msra.mxu1 %v3686_v27 }
 0x1ff   : > { %3290 = vmatprep.subr.bf16.mxu1 %v3696_v30 }
 0x200   : > { %3040 = vmatpush3.bf16.msra.mxu0 %v3448_v16 }
 0x201   : > { %3041 = vmatprep.subr.bf16.mxu0 %v3514_v2 }
 0x202   : > { %3292 = vmatpush3.bf16.msra.mxu1 %v3696_v30 }
 0x203   : > { %3049 = vmatprep.subr.bf16.mxu1 %v3514_v2 }
 0x204   : > { %3042 = vmatpush3.bf16.msra.mxu0 %v3449_v17 }
 0x205   : > { %3011 = vmatmul.mubr.msk.f32.vlgmr.msra.gmra.mrb[10].mxu1 %vm704_vm4, %v787_v18  ;;  %3043 = vmatprep.subr.bf16.mxu0 %v3514_v2 }
 0x206   : > { %3050 = vmatpush3.bf16.msra.mxu1 %v3742_v54  ;;  %3051 = vmatprep.mubr.msk.bf16.mxu1 %vm3515_vm2, %v3514_v2 }
 0x207   : > { %3294 = vmatprep.subr.bf16.mxu1 %v3637_v12 }
 0x208   : > { %3044 = vmatpush3.bf16.msra.mxu0 %v3450_v20 }
 0x209   : > { %3052 = vmatmul.mubr.msk.bf16.vlgmr.msra.gmra.mrb[12].mxu1 %vm305_vm1, %v3442_v22  ;;  %3055 = vmatprep.subr.bf16.mxu0 %v3514_v2 }
 0x20a   : > { %3296 = vmatpush3.bf16.msra.mxu1 %v3637_v12 }
 0x20b   : > { %3046 = vmatmul.mubr.msk.bf16.vlgmr.msra.gmra.mrb[16].mxu0 %vm445_vm3, %v956_v6  ;;  %3298 = vmatprep.subr.bf16.mxu1 %v3645_v15 }
 0x20c   : > { %3063 = vmatprep.mubr.msk.bf16.mxu0 %vm3515_vm2, %v3514_v2  ;;  %3056 = vmatpush3.bf16.msra.mxu0 %v3451_v23 }
 0x20d   : > { %3057 = vmatprep.subr.bf16.mxu0 %v3514_v2 }
 0x20e   : > { %3300 = vmatpush3.bf16.msra.mxu1 %v3645_v15 }
 0x20f   : > { %3302 = vmatprep.subr.bf16.mxu1 %v3660_v19 }
 0x210   : > { %3058 = vmatpush3.bf16.msra.mxu0 %v3452_v25 }
 0x211   : > { %3059 = vmatprep.subr.bf16.mxu0 %v3514_v2 }
 0x212   : > { %3304 = vmatpush3.bf16.msra.mxu1 %v3660_v19 }
 0x213   : > { %3306 = vmatprep.subr.bf16.mxu1 %v3665_v21 }
 0x214   : > { %3060 = vmatpush3.bf16.msra.mxu0 %v3453_v26 }
 0x215   : > { %3061 = vmatprep.subr.bf16.mxu0 %v3514_v2  ;;  %v869_v2 = vld [vmem:[#allocation2] sm:$0x1] }
 0x216   : > { %3308 = vmatpush3.bf16.msra.mxu1 %v3665_v21 }
 0x217   : > { %3310 = vmatprep.subr.bf16.mxu1 %v3676_v24 }
 0x218   : > { %3062 = vmatpush3.bf16.msra.mxu0 %v3454_v28 }
 0x21a   : > { %3312 = vmatpush3.bf16.msra.mxu1 %v3676_v24 }
 0x21b   : > { %3314 = vmatprep.subr.bf16.mxu1 %v3686_v27 }
 0x21e   : > { %3316 = vmatpush3.bf16.msra.mxu1 %v3686_v27 }
 0x21f   : > { %3318 = vmatprep.subr.bf16.mxu1 %v3696_v30 }
 0x222   : > { %3320 = vmatpush3.bf16.msra.mxu1 %v3696_v30 }
 0x223   : > { %3322 = vmatprep.subr.bf16.mxu1 %v3637_v12 }
 0x2bc   : > { %v2981_v29 = vpop.f32.mrb[8].mxu1 }
 0x2bd   : > { %v873_v31 = vsel %vm872_vm5, %v2981_v29, 0.0  ;;  %v777_v32 = vpop.f32.mrb[9].mxu1 }
 0x2be   : > { %v871_v33 = vsel %vm870_vm6, %v777_v32, 0.0 }
 0x2bf   : > { %v874_v34 = vadd.f32 %v873_v31, %v871_v33 }
 0x2c1   : > { %v875_v35 = vrot.slane %v874_v34, 4 }
 0x2c3   : > { %v876_v36 = vadd.f32 %v875_v35, %v874_v34 }
 0x2c5   : > { %v877_v37 = vrot.slane %v876_v36, 2 }
 0x2c7   : > { %v878_v38 = vadd.f32 %v877_v37, %v876_v36 }
 0x2c9   : > { %v879_v39 = vrot.slane %v878_v38, 1 }
 0x2cb   : > { %v880_v40 = vadd.f32 %v879_v39, %v878_v38 }
 0x2cd   : > { %v881_v41 = vadd.f32 %v880_v40, %v869_v2 }
 0x2cf   : > { %883 = vst.msk [vmem:[#allocation2] sm:$0x1] %vm882_vm7, %v881_v41 }
 0x2d6   : > { %v1469_v8 = vld [vmem:[#allocation2] sm:$0x1] }
 0x2d8   : > { %v3012_v42 = vpop.f32.mrb[10].mxu1 }
 0x2d9   : > { %v886_v43 = vsel %vm872_vm5, %v3012_v42, 0.0  ;;  %v860_v44 = vpop.f32.mrb[11].mxu1 }
 0x2da   : > { %v885_v45 = vsel %vm870_vm6, %v860_v44, 0.0 }
 0x2db   : > { %v887_v46 = vadd.f32 %v886_v43, %v885_v45 }
 0x2dc   : > { %v1205_v47 = vpop.f32.mrb[12].mxu1 }
 0x2dd   : > { %v888_v48 = vrot.slane %v887_v46, 4  ;;  %v3053_v49 = vpop.f32.mrb[13].mxu1 }
 0x2de   : > { %v1208_v50 = vpop.f32.mrb[14].mxu1 }
 0x2df   : > { %v889_v51 = vadd.f32 %v888_v48, %v887_v46  ;;  %v1212_v52 = vpack.c.bf16 %v1208_v50, %v1205_v47  ;;  %v3054_v53 = vpop.f32.mrb[15].mxu1 }
 0x2e1   : > { %v890_v54 = vrot.slane %v889_v51, 2  ;;  %3064 = vmatmul.mubr.msk.bf16.vlgmr.msra.gmra.mrb[16].mxu0 %vm445_vm3, %v1212_v52 }
 0x2e3   : > { %v891_v55 = vadd.f32 %v890_v54, %v889_v51 }
 0x2e5   : > { %v892_v56 = vrot.slane %v891_v55, 1 }
 0x2e7   : > { %v893_v58 = vadd.f32 %v892_v56, %v891_v55 }
 0x2e9   : > { %v894_v59 = vadd.f32 %v893_v58, %v884_v57 }
 0x2eb   : > { %895 = vst.msk [vmem:[#allocation3] sm:$0x1] %vm882_vm7, %v894_v59 }
 0x2f2   : > { %v1481_v25 = vld [vmem:[#allocation3] sm:$0x1] }
 0x3b4   : > { %v1282_v60 = vpop.f32.mrb[16].mxu0 }
 0x3b5   : > { %v1386_v61 = vmul.f32 %v1282_v60, %v1282_v60  ;;  %v3065_v62 = vpop.f32.mrb[17].mxu0  ;;  %3095 = vmatprep.mubr.msk.f32.mxu1 %vm704_vm4, %v1282_v60 }
 0x3b6   : > { %v1285_v63 = vpop.f32.mrb[18].mxu0 }
 0x3b7   : > { %v3066_v0 = vpop.f32.mrb[19].mxu0  ;;  %3096 = vmatmul.mubr.msk.f32.vlgmr.msra.gmra.mrb[16].mxu1 %vm704_vm4, %v1285_v63 }
 0x3b8   : > { %3324 = vmatpush3.bf16.msra.mxu1 %v3637_v12  ;;  %3126 = vmatprep.mubr.msk.f32.mxu1 %vm704_vm4, %v1386_v61  ;;  %v1387_v12 = vmul.f32 %v1285_v63, %v1285_v63 }
 0x3b9   : > { %3326 = vmatprep.subr.bf16.mxu1 %v3645_v15 }
 0x3bc   : > { %3328 = vmatpush3.bf16.msra.mxu1 %v3645_v15 }
 0x3bd   : > { %3330 = vmatprep.subr.bf16.mxu1 %v3660_v19 }
 0x3c0   : > { %3332 = vmatpush3.bf16.msra.mxu1 %v3660_v19 }
 0x3c1   : > { %3334 = vmatprep.subr.bf16.mxu1 %v3665_v21 }
 0x3c4   : > { %3336 = vmatpush3.bf16.msra.mxu1 %v3665_v21 }
 0x3c5   : > { %3338 = vmatprep.subr.bf16.mxu1 %v3676_v24 }
 0x3c8   : > { %3340 = vmatpush3.bf16.msra.mxu1 %v3676_v24 }
 0x3c9   : > { %3342 = vmatprep.subr.bf16.mxu1 %v3686_v27 }
 0x3cc   : > { %3344 = vmatpush3.bf16.msra.mxu1 %v3686_v27 }
 0x3cd   : > { %3346 = vmatprep.subr.bf16.mxu1 %v3696_v30 }
 0x3d0   : > { %3348 = vmatpush3.bf16.msra.mxu1 %v3696_v30 }
 0x3d3   : > { %3127 = vmatmul.mubr.msk.f32.vlgmr.msra.gmra.mrb[18].mxu1 %vm704_vm4, %v1387_v12 }
 0x48a   : > { %v3097_v15 = vpop.f32.mrb[16].mxu1 }
 0x48b   : > { %v1471_v19 = vsel %vm872_vm5, %v3097_v15, 0.0  ;;  %v1377_v1 = vpop.f32.mrb[17].mxu1 }
 0x48c   : > { %v1470_v21 = vsel %vm870_vm6, %v1377_v1, 0.0 }
 0x48d   : > { %v1472_v3 = vadd.f32 %v1471_v19, %v1470_v21 }
 0x48f   : > { %v1473_v4 = vrot.slane %v1472_v3, 4 }
 0x491   : > { %v1474_v24 = vadd.f32 %v1473_v4, %v1472_v3 }
 0x493   : > { %v1475_v5 = vrot.slane %v1474_v24, 2 }
 0x495   : > { %v1476_v6 = vadd.f32 %v1475_v5, %v1474_v24 }
 0x497   : > { %v1477_v7 = vrot.slane %v1476_v6, 1 }
 0x499   : > { %v1478_v27 = vadd.f32 %v1477_v7, %v1476_v6 }
 0x49b   : > { %v1479_v9 = vadd.f32 %v1478_v27, %v1469_v8 }
 0x49d   : > { %1480 = vst.msk [vmem:[#allocation2] sm:$0x1] %vm882_vm7, %v1479_v9 }
 0x4a6   : > { %v3128_v30 = vpop.f32.mrb[18].mxu1 }
 0x4a7   : > { %v1483_v10 = vsel %vm872_vm5, %v3128_v30, 0.0  ;;  %v1460_v11 = vpop.f32.mrb[19].mxu1 }
 0x4a8   : > { %v1482_v13 = vsel %vm870_vm6, %v1460_v11, 0.0 }
 0x4a9   : > { %v1484_v14 = vadd.f32 %v1483_v10, %v1482_v13 }
 0x4ab   : > { %v1485_v16 = vrot.slane %v1484_v14, 4 }
 0x4ad   : > { %v1486_v17 = vadd.f32 %v1485_v16, %v1484_v14 }
 0x4af   : > { %v1487_v18 = vrot.slane %v1486_v17, 2 }
 0x4b1   : > { %v1488_v20 = vadd.f32 %v1487_v18, %v1486_v17 }
 0x4b3   : > { %v1489_v22 = vrot.slane %v1488_v20, 1 }
 0x4b5   : > { %v1490_v23 = vadd.f32 %v1489_v22, %v1488_v20 }
 0x4b7   : > { %v1491_v26 = vadd.f32 %v1490_v23, %v1481_v25 }
 0x4b9   : > { %1492 = vst.msk [vmem:[#allocation3] sm:$0x1] %vm882_vm7, %v1491_v26 }
 0x4ba PF: > { %p2647_p6 = scmp.ne.s32.totalorder %s3503_s21, 1 }
 0x4bb   : > { %v3455_v28 = vld [vmem:[%s4114_s0] sm:$0xff] (!%p2647_p6)   ;;  %v3516_v29 = vmov (!%p2647_p6), 0.0   ;;  %vm1556_vm8 = vcmask (!%p2647_p6), 130048   ;;  %vm3517_vm9 = vmmov (!%p2647_p6), 0   ;;  %v3458_v32 = vld [vmem:[%s4115_s1 + $0x10] sm:$0x7f] (!%p2647_p6)   ;;  %v1511_v50 = vlaneseq (!%p2647_p6) }
 0x4bc   : > { %1496 = sbr.rel (%p2647_p6) target bundleno = 1919 (0x77f), region = 56  ;;  %3129 = vmatprep.subr.bf16.mxu0 (!%p2647_p6), %v3516_v29  ;;  %3165 = vmatprep.subr.bf16.mxu1 (!%p2647_p6), %v3516_v29  ;;  %v3456_v31 = vld [vmem:[%s4115_s1] sm:$0x7f] (!%p2647_p6)   ;;  %v3909_v33 = vld [vmem:[%s4114_s0 + $0x8] sm:$0xff] (!%p2647_p6)   ;;  %v3464_v39 = vld [vmem:[%s4116_s2 + $0x30] sm:$0xff] (!%p2647_p6)   ;;  %s3518_s29 = smov (!%p2647_p6), 8  }
 0x4bd   : > { %3130 = vmatpush3.bf16.msra.mxu0 (!%p2647_p6), %v3455_v28  ;;  %3131 = vmatprep.mubr.msk.bf16.mxu0 (!%p2647_p6), %vm3517_vm9, %v3516_v29  ;;  %v3457_v34 = vld [vmem:[%s4115_s1 + $0x8] sm:$0x7f] (!%p2647_p6)   ;;  %v3461_v35 = vld [vmem:[%s4116_s2 + $0x20] sm:$0xff] (!%p2647_p6)   ;;  %v3465_v2 = vld [vmem:[%s4116_s2 + $0x38] sm:$0xff] (!%p2647_p6)   ;;  %v1512_v52 = vshrl.u32 (!%p2647_p6), %v1511_v50, 7  ;;  %s3519_s30 = smov (!%p2647_p6), 24  }
 0x4be   : > { %3135 = vmatprep.subr.bf16.mxu0 (!%p2647_p6), %v3516_v29  ;;  %3166 = vmatpush3.bf16.msra.mxu1 (!%p2647_p6), %v3455_v28  ;;  %v3460_v36 = vld [vmem:[%s4115_s1] sm:$0x7f] (!%p2647_p6)   ;;  %v3462_v37 = vld [vmem:[%s4115_s1 + $0x8] sm:$0x7f] (!%p2647_p6)   ;;  %v3477_v49 = vld [vmem:[%s4116_s2 + $0x30] sm:$0xff] (!%p2647_p6)   ;;  %s3520_s7 = smov (!%p2647_p6), 16  }
 0x4bf   : > { %3167 = vmatprep.mubr.msk.bf16.mxu1 (!%p2647_p6), %vm3517_vm9, %v3516_v29  ;;  %3183 = vmatprep.subr.bf16.mxu1 (!%p2647_p6), %v3516_v29  ;;  %v3463_v38 = vld [vmem:[%s4116_s2 + $0x28] sm:$0xff] (!%p2647_p6)   ;;  %v1497_v40 = vld [vmem:[#allocation2] sm:$0x1] (!%p2647_p6)  ;;  %v3478_v51 = vld [vmem:[%s4116_s2 + $0x38] sm:$0xff] (!%p2647_p6)   ;;  %v3974_v54 = vsub.s32 (!%p2647_p6), 0, %v1512_v52  ;;  %s3521_s8 = smov (!%p2647_p6), 32  }
 0x4c0   : > { %3132 = vmatmul.mubr.msk.bf16.vlgmr.msra.gmra.mrb[0].mxu0 (!%p2647_p6), %vm1556_vm8, %v3456_v31  ;;  %v1499_v41 = vld [vmem:[#allocation3] sm:$0x1] (!%p2647_p6)  ;;  %v1498_v42 = vmul.f32 (!%p2647_p6), 0.0025510204, %v1497_v40  ;;  %v3476_v46 = vld [vmem:[%s4116_s2 + $0x28] sm:$0xff] (!%p2647_p6)   ;;  %s3522_s9 = smov (!%p2647_p6), 40  }
 0x4c1   : > { %3136 = vmatpush3.bf16.msra.mxu0 (!%p2647_p6), %v3455_v28  ;;  %3137 = vmatprep.mubr.msk.bf16.mxu0 (!%p2647_p6), %vm3517_vm9, %v3516_v29  ;;  %v1500_v43 = vmul.f32 (!%p2647_p6), 0.0025510204, %v1499_v41  ;;  %v3475_v44 = vld [vmem:[%s4116_s2 + $0x20] sm:$0xff] (!%p2647_p6)   ;;  %s3523_s10 = smov (!%p2647_p6), 48   ;;  %s3524_s11 = smov (!%p2647_p6), 56   ;;  %vm1568_vm10 = vcmask (!%p2647_p6), 523264  }
 0x4c2   : > { %3168 = vmatmul.mubr.msk.bf16.vlgmr.msra.gmra.mrb[0].mxu1 (!%p2647_p6), %vm1556_vm8, %v3458_v32  ;;  %3141 = vmatprep.subr.bf16.mxu0 (!%p2647_p6), %v3516_v29  ;;  %v1501_v45 = vmul.f32 (!%p2647_p6), %v1498_v42, %v1498_v42  ;;  %v1505_v53 = vld [vmem:[%s4118_s4] sm:$0x1] (!%p2647_p6)  ;;  %s3525_s12 = smov (!%p2647_p6), 64   ;;  %s3526_s13 = smov (!%p2647_p6), 72   ;;  %v3467_v14 = vld [vmem:[%s4116_s2 + $0x8] sm:$0xff] (!%p2647_p6)   ;;  %v3468_v16 = vld [vmem:[%s4116_s2 + $0x10] sm:$0xff] (!%p2647_p6)  }
 0x4c3   : > { %3184 = vmatpush3.bf16.msra.mxu1 %v3909_v33  ;;  %3185 = vmatprep.mubr.msk.bf16.mxu1 %vm3517_vm9, %v3516_v29  ;;  %v1507_v57 = vld [vmem:[%s4119_s5] sm:$0x1]  ;;  %s3527_s14 = smov 80   ;;  %s3528_s15 = smov 88   ;;  %v3469_v26 = vld [vmem:[%s4116_s2 + $0x18] sm:$0xff]   ;;  %v3480_v28 = vld [vmem:[%s4116_s2 + $0x8] sm:$0xff]  }
 0x4c4   : > { %3189 = vmatprep.subr.bf16.mxu1 %v3516_v29  ;;  %v1502_v47 = vsub.f32 %v1500_v43, %v1501_v45  ;;  %s3529_s16 = smov 96   ;;  %s3530_s21 = smov 104   ;;  %v3466_v7 = vld [vmem:[%s4116_s2] sm:$0xff]   ;;  %v3481_v32 = vld [vmem:[%s4116_s2 + $0x10] sm:$0xff]   ;;  %v3486_v40 = vld [vmem:[%s4116_s2 + $0x58] sm:$0xff]   ;;  %vm1554_vm11 = vcmask 64512  }
 0x4c5   : > { %v3479_v22 = vld [vmem:[%s4116_s2] sm:$0xff]   ;;  %vm1558_vm12 = vcmask 195584   ;;  %vm1560_vm13 = vcmask 261120   ;;  %vm1562_vm14 = vcmask 326656   ;;  %vm1564_vm15 = vcmask 392192  }
 0x4c6   : > { %v1503_v48 = vadd.f32 1e-05, %v1502_v47  ;;  %v3470_v31 = vld [vmem:[%s4116_s2 + $0x40] sm:$0xff]   ;;  %vm1566_vm0 = vcmask 457728   ;;  %vm1570_vm1 = vcmask 588800   ;;  %vm1572_vm2 = vcmask 654336  }
 0x4c7   : > { %vm1574_vm3 = vcmask 719872   ;;  %vm1576_vm4 = vcmask 785408   ;;  %vm1578_vm5 = vcmask 850944   ;;  %vm2057_vm6 = vcmask 912384  }
 0x4c8   : > { %3138 = vmatmul.mubr.msk.bf16.vlgmr.msra.gmra.mrb[4].mxu0 %vm1556_vm8, %v3457_v34  ;;  %3487 = vrsqrt.f32 %v1503_v48  ;;  %v3471_v34 = vld [vmem:[%s4116_s2 + $0x48] sm:$0xff]   ;;  %vm2059_vm7 = vcmask 911360  }
 0x4c9   : > { %3142 = vmatpush3.bf16.msra.mxu0 %v3461_v35  ;;  %3149 = vmatprep.mubr.msk.bf16.mxu0 %vm3517_vm9, %v3516_v29  ;;  %v3482_v35 = vld [vmem:[%s4116_s2 + $0x18] sm:$0xff]  }
 0x4ca   : > { %3186 = vmatmul.mubr.msk.bf16.vlgmr.msra.gmra.mrb[4].mxu1 %vm1556_vm8, %v3460_v36  ;;  %3143 = vmatprep.subr.bf16.mxu0 %v3516_v29  ;;  %v3472_v36 = vld [vmem:[%s4116_s2 + $0x50] sm:$0xff]  }
 0x4cb   : > { %3190 = vmatpush3.bf16.msra.mxu1 %v3909_v33  ;;  %3191 = vmatprep.mubr.msk.bf16.mxu1 %vm3517_vm9, %v3516_v29 }
 0x4cc   : > { %3195 = vmatprep.subr.bf16.mxu1 %v3516_v29 }
 0x4cd   : > { %3144 = vmatpush3.bf16.msra.mxu0 %v3463_v38  ;;  %v3473_v38 = vld [vmem:[%s4116_s2 + $0x58] sm:$0xff]  }
 0x4ce   : > { %3145 = vmatprep.subr.bf16.mxu0 %v3516_v29 }
 0x4d1   : > { %3146 = vmatpush3.bf16.msra.mxu0 %v3464_v39  ;;  %v3474_v39 = vld [vmem:[%s4115_s1 + $0x10] sm:$0x7f]  }
 0x4d2   : > { %3192 = vmatmul.mubr.msk.bf16.vlgmr.msra.gmra.mrb[8].mxu1 %vm1556_vm8, %v3462_v37  ;;  %3147 = vmatprep.subr.bf16.mxu0 %v3516_v29  ;;  %v3488_v55 = vpop.eup %3487  ;;  %v3483_v37 = vld [vmem:[%s4116_s2 + $0x40] sm:$0xff]  }
 0x4d3   : > { %3203 = vmatprep.mubr.msk.bf16.mxu1 %vm3517_vm9, %v3516_v29  ;;  %3196 = vmatpush3.bf16.msra.mxu1 %v3475_v44  ;;  %v3976_v56 = vmul.f32 %v3488_v55, %v1505_v53 }
 0x4d4   : > { %3197 = vmatprep.subr.bf16.mxu1 %v3516_v29 }
 0x4d5   : > { %3148 = vmatpush3.bf16.msra.mxu0 %v3465_v2  ;;  %v1514_v58 = vrot.slane %v3976_v56, %v3974_v54  ;;  %v1508_v59 = vmul.f32 %v3976_v56, %v1498_v42  ;;  %v3484_v2 = vld [vmem:[%s4116_s2 + $0x48] sm:$0xff]  }
 0x4d6   : > { %3153 = vmatprep.subr.bf16.mxu0 %v3516_v29 }
 0x4d7   : > { %3198 = vmatpush3.bf16.msra.mxu1 %v3476_v46  ;;  %1515 = vrot.lane.b32.xlu0 %v1514_v58, %s3518_s29  ;;  %v3984_v60 = vsub.f32 %v1507_v57, %v1508_v59 }
 0x4d8   : > { %3199 = vmatprep.subr.bf16.mxu1 %v3516_v29  ;;  %1521 = vrot.lane.b32.xlu1 %v1514_v58, %s3519_s30 }
 0x4d9   : > { %v1584_v61 = vrot.slane %v3984_v60, %v3974_v54 }
 0x4db   : > { %3200 = vmatpush3.bf16.msra.mxu1 %v3477_v49  ;;  %1518 = vrot.lane.b32.xlu0 %v1514_v58, %s3520_s7 }
 0x4dc   : > { %3201 = vmatprep.subr.bf16.mxu1 %v3516_v29  ;;  %1585 = vrot.lane.b32.xlu1 %v1584_v61, %s3518_s29 }
 0x4df   : > { %3202 = vmatpush3.bf16.msra.mxu1 %v3478_v51  ;;  %1524 = vrot.lane.b32.xlu0 %v1514_v58, %s3521_s8 }
 0x4e0   : > { %3207 = vmatprep.subr.bf16.mxu1 %v3516_v29  ;;  %1588 = vrot.lane.b32.xlu1 %v1584_v61, %s3520_s7 }
 0x4e3   : > { %1527 = vrot.lane.b32.xlu0 %v1514_v58, %s3522_s9 }
 0x4e4   : > { %1591 = vrot.lane.b32.xlu1 %v1584_v61, %s3519_s30 }
 0x4e7   : > { %1530 = vrot.lane.b32.xlu0 %v1514_v58, %s3523_s10 }
 0x4e8   : > { %1594 = vrot.lane.b32.xlu1 %v1584_v61, %s3521_s8 }
 0x4eb   : > { %1533 = vrot.lane.b32.xlu0 %v1514_v58, %s3524_s11 }
 0x4ec   : > { %1597 = vrot.lane.b32.xlu1 %v1584_v61, %s3522_s9 }
 0x4ef   : > { %1536 = vrot.lane.b32.xlu0 %v1514_v58, %s3525_s12 }
 0x4f0   : > { %1600 = vrot.lane.b32.xlu1 %v1584_v61, %s3523_s10 }
 0x4f3   : > { %1539 = vrot.lane.b32.xlu0 %v1514_v58, %s3526_s13 }
 0x4f4   : > { %1603 = vrot.lane.b32.xlu1 %v1584_v61, %s3524_s11 }
 0x4f7   : > { %1542 = vrot.lane.b32.xlu0 %v1514_v58, %s3527_s14 }
 0x4f8   : > { %1606 = vrot.lane.b32.xlu1 %v1584_v61, %s3525_s12 }
 0x4fb   : > { %1545 = vrot.lane.b32.xlu0 %v1514_v58, %s3528_s15 }
 0x4fc   : > { %1609 = vrot.lane.b32.xlu1 %v1584_v61, %s3526_s13 }
 0x4ff   : > { %1548 = vrot.lane.b32.xlu0 %v1514_v58, %s3529_s16 }
 0x500   : > { %1612 = vrot.lane.b32.xlu1 %v1584_v61, %s3527_s14 }
 0x503   : > { %1551 = vrot.lane.b32.xlu0 %v1514_v58, %s3530_s21 }
 0x504   : > { %1615 = vrot.lane.b32.xlu1 %v1584_v61, %s3528_s15 }
 0x507   : > { %1618 = vrot.lane.b32.xlu0 %v1584_v61, %s3529_s16 }
 0x508   : > { %1621 = vrot.lane.b32.xlu1 %v1584_v61, %s3530_s21 }
 0x549   : > { %v1516_v41 = vpop.permute.xlu0 %1515 }
 0x54a   : > { %v1522_v42 = vpop.permute.xlu1 %1521  ;;  %v1555_v55 = vsel %vm1554_vm11, %v3976_v56, %v1516_v41 }
 0x54d   : > { %v1519_v43 = vpop.permute.xlu0 %1518 }
 0x54e   : > { %v1586_v44 = vpop.permute.xlu1 %1585  ;;  %v1557_v59 = vsel %vm1556_vm8, %v1555_v55, %v1519_v43 }
 0x54f   : > { %v1624_v57 = vsel %vm1554_vm11, %v3984_v60, %v1586_v44 }
 0x551   : > { %v1525_v45 = vpop.permute.xlu0 %1524 }
 0x552   : > { %v1589_v46 = vpop.permute.xlu1 %1588 }
 0x553   : > { %v1625_v61 = vsel %vm1556_vm8, %v1624_v57, %v1589_v46 }
 0x555   : > { %v1528_v47 = vpop.permute.xlu0 %1527 }
 0x556   : > { %v1592_v48 = vpop.permute.xlu1 %1591 }
 0x559   : > { %v1531_v49 = vpop.permute.xlu0 %1530 }
 0x55a   : > { %v1595_v50 = vpop.permute.xlu1 %1594 }
 0x55d   : > { %v1534_v51 = vpop.permute.xlu0 %1533 }
 0x55e   : > { %v1598_v52 = vpop.permute.xlu1 %1597 }
 0x561   : > { %v1537_v53 = vpop.permute.xlu0 %1536 }
 0x565   : > { %v1540_v58 = vpop.permute.xlu0 %1539 }
 0x593   : > { %v1689_v62 = vpop.f32.mrb[0].mxu0 }
 0x594   : > { %v3133_v63 = vpop.f32.mrb[1].mxu0 }
 0x595   : > { %v1692_v0 = vpop.f32.mrb[2].mxu0  ;;  %v3988_v12 = vpop.f32.mrb[0].mxu1  ;;  %v1559_v63 = vsel %vm1558_vm12, %v1557_v59, %v1522_v42 }
 0x596   : > { %v1696_v15 = vpack.c.bf16 %v1692_v0, %v1689_v62  ;;  %v3134_v19 = vpop.f32.mrb[3].mxu0  ;;  %v3169_v1 = vpop.f32.mrb[1].mxu1  ;;  %v1626_v0 = vsel %vm1558_vm12, %v1625_v61, %v1592_v48 }
 0x597   : > { %v3990_v21 = vpop.f32.mrb[2].mxu1  ;;  %v1627_v19 = vsel %vm1560_vm13, %v1626_v0, %v1595_v50 }
 0x598   : > { %v1955_v3 = vpack.c.bf16 %v3990_v21, %v3988_v12  ;;  %v3170_v4 = vpop.f32.mrb[3].mxu1  ;;  %v1543_v12 = vpop.permute.xlu0 %1542  ;;  %v1628_v56 = vsel %vm1562_vm14, %v1627_v19, %v1598_v52 }
 0x59b   : > { %v1750_v24 = vpop.f32.mrb[4].mxu0 }
 0x59c   : > { %v3139_v5 = vpop.f32.mrb[5].mxu0 }
 0x59d   : > { %v1753_v6 = vpop.f32.mrb[6].mxu0  ;;  %v2114_v27 = vpop.f32.mrb[4].mxu1 }
 0x59e   : > { %v1757_v8 = vpack.c.bf16 %v1753_v6, %v1750_v24  ;;  %v3140_v9 = vpop.f32.mrb[7].mxu0  ;;  %v3187_v30 = vpop.f32.mrb[5].mxu1 }
 0x59f   : > { %v2117_v10 = vpop.f32.mrb[6].mxu1 }
 0x5a0   : > { %3150 = vmatmul.mubr.msk.bf16.vlgmr.msra.gmra.mrb[8].mxu0 %vm1568_vm10, %v1757_v8  ;;  %v2121_v11 = vpack.c.bf16 %v2117_v10, %v2114_v27  ;;  %v3188_v13 = vpop.f32.mrb[7].mxu1 }
 0x5a1   : > { %3154 = vmatpush3.bf16.msra.mxu0 %v3466_v7  ;;  %3161 = vmatprep.mubr.msk.bf16.mxu0 %vm3517_vm9, %v3516_v29 }
 0x5a2   : > { %3155 = vmatprep.subr.bf16.mxu0 %v3516_v29 }
 0x5a5   : > { %3156 = vmatpush3.bf16.msra.mxu0 %v3467_v14  ;;  %v2174_v17 = vpop.f32.mrb[8].mxu1 }
 0x5a6   : > { %3157 = vmatprep.subr.bf16.mxu0 %v3516_v29  ;;  %v3193_v18 = vpop.f32.mrb[9].mxu1 }
 0x5a7   : > { %v2177_v20 = vpop.f32.mrb[10].mxu1 }
 0x5a8   : > { %v2181_v23 = vpack.c.bf16 %v2177_v20, %v2174_v17  ;;  %v3194_v25 = vpop.f32.mrb[11].mxu1 }
 0x5a9   : > { %3158 = vmatpush3.bf16.msra.mxu0 %v3468_v16 }
 0x5aa   : > { %3159 = vmatprep.subr.bf16.mxu0 %v3516_v29  ;;  %3204 = vmatmul.mubr.msk.bf16.vlgmr.msra.gmra.mrb[12].mxu1 %vm1568_vm10, %v2181_v23 }
 0x5ab   : > { %3208 = vmatpush3.bf16.msra.mxu1 %v3479_v22  ;;  %3215 = vmatprep.mubr.msk.bf16.mxu1 %vm3517_vm9, %v3516_v29 }
 0x5ac   : > { %3209 = vmatprep.subr.bf16.mxu1 %v3516_v29 }
 0x5ad   : > { %3160 = vmatpush3.bf16.msra.mxu0 %v3469_v26 }
 0x5ae   : > { %3171 = vmatprep.subr.bf16.mxu0 %v3516_v29 }
 0x5af   : > { %3210 = vmatpush3.bf16.msra.mxu1 %v3480_v28 }
 0x5b0   : > { %3162 = vmatmul.mubr.msk.bf16.vlgmr.msra.gmra.mrb[8].mxu0 %vm1568_vm10, %v1696_v15  ;;  %3211 = vmatprep.subr.bf16.mxu1 %v3516_v29  ;;  %v1561_v15 = vsel %vm1560_vm13, %v1559_v63, %v1525_v45 }
 0x5b1   : > { %3172 = vmatpush3.bf16.msra.mxu0 %v3470_v31  ;;  %3179 = vmatprep.mubr.msk.bf16.mxu0 %vm3517_vm9, %v3516_v29  ;;  %v1563_v21 = vsel %vm1562_vm14, %v1561_v15, %v1528_v47 }
 0x5b2   : > { %3173 = vmatprep.subr.bf16.mxu0 %v3516_v29  ;;  %v1565_v60 = vsel %vm1564_vm15, %v1563_v21, %v1531_v49 }
 0x5b3   : > { %3212 = vmatpush3.bf16.msra.mxu1 %v3481_v32  ;;  %v1567_v5 = vsel %vm1566_vm0, %v1565_v60, %v1534_v51 }
 0x5b4   : > { %3213 = vmatprep.subr.bf16.mxu1 %v3516_v29  ;;  %v1569_v27 = vsel %vm1568_vm10, %v1567_v5, %v1537_v53 }
 0x5b5   : > { %3174 = vmatpush3.bf16.msra.mxu0 %v3471_v34  ;;  %v1571_v30 = vsel %vm1570_vm1, %v1569_v27, %v1540_v58 }
 0x5b6   : > { %3175 = vmatprep.subr.bf16.mxu0 %v3516_v29  ;;  %v1573_v13 = vsel %vm1572_vm2, %v1571_v30, %v1543_v12 }
 0x5b7   : > { %3214 = vmatpush3.bf16.msra.mxu1 %v3482_v35 }
 0x5b8   : > { %3225 = vmatprep.subr.bf16.mxu1 %v3516_v29 }
 0x5b9   : > { %3176 = vmatpush3.bf16.msra.mxu0 %v3472_v36 }
 0x5ba   : > { %3177 = vmatprep.subr.bf16.mxu0 %v3516_v29  ;;  %3216 = vmatmul.mubr.msk.bf16.vlgmr.msra.gmra.mrb[12].mxu1 %vm1568_vm10, %v2121_v11 }
 0x5bb   : > { %3226 = vmatpush3.bf16.msra.mxu1 %v3483_v37  ;;  %3233 = vmatprep.mubr.msk.bf16.mxu1 %vm3517_vm9, %v3516_v29 }
 0x5bc   : > { %3227 = vmatprep.subr.bf16.mxu1 %v3516_v29 }
 0x5bd   : > { %3178 = vmatpush3.bf16.msra.mxu0 %v3473_v38 }
 0x5be   : > { %3219 = vmatprep.subr.bf16.mxu0 %v3516_v29 }
 0x5bf   : > { %3228 = vmatpush3.bf16.msra.mxu1 %v3484_v2 }
 0x5c0   : > { %3180 = vmatmul.mubr.msk.bf16.vlgmr.msra.gmra.mrb[8].mxu0 %vm1568_vm10, %v1955_v3  ;;  %3229 = vmatprep.subr.bf16.mxu1 %v3516_v29  ;;  %v1546_v3 = vpop.permute.xlu0 %1545 }
 0x5c1   : > { %3220 = vmatpush3.bf16.msra.mxu0 %v3909_v33  ;;  %3221 = vmatprep.mubr.msk.bf16.mxu0 %vm3517_vm9, %v3516_v29  ;;  %v3485_v33 = vld [vmem:[%s4116_s2 + $0x50] sm:$0xff]   ;;  %v1575_v17 = vsel %vm1574_vm3, %v1573_v13, %v1546_v3 }
 0x5c3   : > { %3230 = vmatpush3.bf16.msra.mxu1 %v3485_v33 }
 0x5c4   : > { %3231 = vmatprep.subr.bf16.mxu1 %v3516_v29  ;;  %v1601_v29 = vpop.permute.xlu1 %1600  ;;  %v1549_v7 = vpop.permute.xlu0 %1548 }
 0x5c5   : > { %v1629_v4 = vsel %vm1564_vm15, %v1628_v56, %v1601_v29  ;;  %v1577_v22 = vsel %vm1576_vm4, %v1575_v17, %v1549_v7 }
 0x5c7   : > { %3232 = vmatpush3.bf16.msra.mxu1 %v3486_v40 }
 0x5c8   : > { %3222 = vmatmul.mubr.msk.bf16.vlgmr.msra.gmra.mrb[12].mxu0 %vm1556_vm8, %v3474_v39  ;;  %v1604_v62 = vpop.permute.xlu1 %1603  ;;  %v1552_v11 = vpop.permute.xlu0 %1551 }
 0x5c9   : > { %v1630_v6 = vsel %vm1566_vm0, %v1629_v4, %v1604_v62  ;;  %v1579_v26 = vsel %vm1578_vm5, %v1577_v22, %v1552_v11 }
 0x5ca   : > { %v2038_v31 = vrot.slane %v1579_v26, %v3974_v54 }
 0x5cc   : > { %v1607_v1 = vpop.permute.xlu1 %1606  ;;  %v1619_v20 = vpop.permute.xlu0 %1618 }
 0x5cd   : > { %v1631_v8 = vsel %vm1568_vm10, %v1630_v6, %v1607_v1 }
 0x5d0   : > { %v1610_v24 = vpop.permute.xlu1 %1609 }
 0x5d1   : > { %v1632_v10 = vsel %vm1570_vm1, %v1631_v8, %v1610_v24 }
 0x5d4   : > { %v1613_v9 = vpop.permute.xlu1 %1612 }
 0x5d5   : > { %v1633_v14 = vsel %vm1572_vm2, %v1632_v10, %v1613_v9 }
 0x5d8   : > { %v1616_v16 = vpop.permute.xlu1 %1615 }
 0x5d9   : > { %v1634_v18 = vsel %vm1574_vm3, %v1633_v14, %v1616_v16 }
 0x5da   : > { %v1635_v23 = vsel %vm1576_vm4, %v1634_v18, %v1619_v20 }
 0x5dc   : > { %v1622_v25 = vpop.permute.xlu1 %1621 }
 0x5dd   : > { %v1636_v28 = vsel %vm1578_vm5, %v1635_v23, %v1622_v25 }
 0x5de   : > { %v2044_v32 = vrot.slane %v1636_v28, %v3974_v54 }
 0x693   : > { %v2026_v34 = vpop.f32.mrb[8].mxu0 }
 0x694   : > { %v2039_v35 = vmul.f32 %v2038_v31, %v2026_v34  ;;  %v3181_v36 = vpop.f32.mrb[9].mxu0 }
 0x695   : > { %v2029_v37 = vpop.f32.mrb[10].mxu0 }
 0x696   : > { %v2045_v38 = vadd.f32 %v2044_v32, %v2039_v35  ;;  %v2040_v39 = vmul.f32 %v2038_v31, %v2029_v37  ;;  %v3182_v2 = vpop.f32.mrb[11].mxu0 }
 0x698   : > { %v2047_v33 = vmax.f32 %v2045_v38, 0.0  ;;  %v2046_v40 = vadd.f32 %v2044_v32, %v2040_v39 }
 0x69a   : > { %v2745_v41 = vpack.c.bf16 %v2047_v33, %v2047_v33  ;;  %v2048_v42 = vmax.f32 %v2046_v40, 0.0 }
 0x69b   : > { %v2370_v43 = vpop.f32.mrb[12].mxu0 }
 0x69c   : > { %2058 = vst.msk [vmem:[%s4120_s6] sm:$0xf] %vm2057_vm6, %v2745_v41  ;;  %v2746_v54 = vpack.c.bf16 %v2048_v42, %v2048_v42  ;;  %v3223_v44 = vpop.f32.mrb[13].mxu0 }
 0x69d   : > { %v2373_v45 = vpop.f32.mrb[14].mxu0 }
 0x69e   : > { %2060 = vst.msk [vmem:[%s4120_s6 + $0x4] sm:$0x7] %vm2059_vm7, %v2746_v54  ;;  %v2377_v46 = vpack.c.bf16 %v2373_v45, %v2370_v43  ;;  %v3224_v47 = vpop.f32.mrb[15].mxu0 }
 0x6a0   : > { %3234 = vmatmul.mubr.msk.bf16.vlgmr.msra.gmra.mrb[12].mxu1 %vm1568_vm10, %v2377_v46 }
 0x773   : > { %v2447_v48 = vpop.f32.mrb[12].mxu1 }
 0x774   : > { %v2456_v49 = vmul.f32 %v2447_v48, %v2038_v31  ;;  %v3235_v50 = vpop.f32.mrb[13].mxu1 }
 0x775   : > { %v2450_v51 = vpop.f32.mrb[14].mxu1 }
 0x776   : > { %v2458_v52 = vadd.f32 %v2456_v49, %v2044_v32  ;;  %v2457_v53 = vmul.f32 %v2450_v51, %v2038_v31  ;;  %v3236_v29 = vpop.f32.mrb[15].mxu1 }
 0x778   : > { %v2460_v55 = vmax.f32 %v2458_v52, 0.0  ;;  %v2459_v57 = vadd.f32 %v2457_v53, %v2044_v32 }
 0x77a   : > { %v2747_v58 = vpack.c.bf16 %v2460_v55, %v2460_v55  ;;  %v2461_v59 = vmax.f32 %v2459_v57, 0.0 }
 0x77c   : > { %2738 = vst.msk [vmem:[%s4120_s6 + $0x8] sm:$0xf] %vm2057_vm6, %v2747_v58  ;;  %v2748_v61 = vpack.c.bf16 %v2461_v59, %v2461_v59 }
 0x77e   : > { %2739 = vst.msk [vmem:[%s4120_s6 + $0xc] sm:$0x7] %vm2059_vm7, %v2748_v61 }
 0x77f PF: > { %s16_s23 = sadd.s32 1, %s3511_s23   ;;  %s4121_s21 = smov %s3507_s22 }
 0x780   : > { %p13_p7 = scmp.ge.s32.totalorder %s16_s23, 4   ;;  %s4122_s22 = smov %s4124_s24 }
 0x782   :  { %15 = sbr.rel (!%p13_p7) target bundleno = 2 (0x2), region = 97 }

// kernel: _lambda_.3
= control target key start
LH: loop header
LB: loop body
LE: loop exit
PB: predicated region body
PF: predicated region fallthrough
CT: control target
= control target key end

     0   :  { %s3719_s21 = smov 0   ;;  %s3721_s22 = smov 0   ;;  %s4371_s0 = inlined_call_operand.vmem [shape: bf16[2,14,112], index: 0, kind: input, shape index: {}]   ;;  %s4372_s1 = inlined_call_operand.vmem [shape: bf16[3,6,14], index: 1, kind: input, shape index: {}]   ;;  %s4373_s2 = inlined_call_operand.vmem [shape: bf16[3,112,96], index: 2, kind: input, shape index: {}]   ;;  %s4374_s3 = inlined_call_operand.vmem [shape: f32[96,16], index: 3, kind: input, shape index: {}]   ;;  %s4375_s4 = inlined_call_operand.vmem [shape: f32[1,16], index: 4, kind: input, shape index: {}]   ;;  %s4376_s5 = inlined_call_operand.vmem [shape: f32[1,16], index: 5, kind: input, shape index: {}]   ;;  %s4377_s6 = inlined_call_operand.vmem [shape: f32[2,6,96], index: 6, kind: output, shape index: {}]  }
   0x1   :  { %s3723_s23 = smov 0  }
   0x2 LB: > { %s28_s24 = sadd.s32 1, %s3667_s22  ;;  %p2602_p0 = scmp.ge.s32.totalorder %s3671_s23, 1  ;;  %s3671_s23 = sphi %s3723_s23, %s16_s23   ;;  %s3667_s22 = sphi %s3721_s22, %s4379_s22   ;;  %s3663_s21 = sphi %s3719_s21, %s4378_s21  }
   0x3   : > { %p30_p1 = scmp.ge.s32.totalorder %s28_s24, 2  ;;  %p228_p2 = scmp.lt.s32.totalorder %s3671_s23, 3 }
   0x5   : > { %s4381_s24 = smov (%p30_p1, %s28_s24), 0  ;;  %p229_p3 = pnand %p2602_p0, %p228_p2 }
   0x6   : > { %p276_p4 = scmp.eq.s32.totalorder (!%p229_p3), %s3663_s21, 0 }
   0x7   : > { %232 = sbr.rel (%p229_p3) target bundleno = 1986 (0x7c2), region = 44 }
   0xe   : > { %281 = sbr.rel (!%p276_p4) target bundleno = 21 (0x15), region = 48  ;;  %vm282_vm0 = vcmask (%p276_p4), 122880   ;;  %v3673_v0 = vmov (%p276_p4), 0.0  }
   0xf   : > { %283 = vst.msk [vmem:[#allocation2] sm:$0x1] (%p276_p4), %vm282_vm0, %v3673_v0  ;;  %284 = vst.msk [vmem:[#allocation3] sm:$0x1] (%p276_p4), %vm282_vm0, %v3673_v0 }
  0x15 PF: > { %p2604_p5 = scmp.ne.s32.totalorder %s3663_s21, 0 }
  0x16   : > { %vm300_vm1 = vcmask (!%p2604_p5), 1046528   ;;  %v3674_v1 = vmov (!%p2604_p5), 0.0   ;;  %v3559_v2 = vld [vmem:[%s4371_s0] sm:$0x7f] (!%p2604_p5)   ;;  %vm3675_vm2 = vmmov (!%p2604_p5), 0   ;;  %vm296_vm3 = vcmask (!%p2604_p5), 113664  }
  0x17   : > { %287 = sbr.rel (%p2604_p5) target bundleno = 1288 (0x508), region = 52  ;;  %3024 = vmatprep.subr.bf16.mxu0 (!%p2604_p5), %v3674_v1  ;;  %3072 = vmatprep.subr.bf16.mxu1 (!%p2604_p5), %v3674_v1  ;;  %v290_v3 = vld [vmem:[%s4372_s1] sm:$0x7] (!%p2604_p5)  ;;  %v302_v4 = vsel (!%p2604_p5), %vm300_vm1, %v3559_v2, 0  ;;  %v2639_v5 = vld [vmem:[%s4372_s1 + $0x8] sm:$0x7] (!%p2604_p5) }
  0x18   : > { %3026 = vmatprep.mubr.msk.bf16.mxu0 (!%p2604_p5), %vm3675_vm2, %v3674_v1  ;;  %3074 = vmatprep.mubr.msk.bf16.mxu1 (!%p2604_p5), %vm3675_vm2, %v3674_v1  ;;  %v2607_v6 = vld [vmem:[%s4372_s1 + $0x4] sm:$0x7] (!%p2604_p5)  ;;  %v3560_v7 = vld [vmem:[%s4373_s2 + $0x38] sm:$0xff] (!%p2604_p5)   ;;  %v3562_v9 = vld [vmem:[%s4373_s2 + $0x48] sm:$0xff] (!%p2604_p5)   ;;  %v3676_v17 = vmov (!%p2604_p5), 0.0|0.0   ;;  %vm462_vm4 = vcmask (!%p2604_p5), 916480  }
  0x19   : > { %3025 = vmatpush3.bf16.msra.mxu0 (!%p2604_p5), %v302_v4  ;;  %3073 = vmatpush3.bf16.msra.mxu1 (!%p2604_p5), %v302_v4  ;;  %v3561_v8 = vld [vmem:[%s4373_s2 + $0x40] sm:$0xff] (!%p2604_p5)   ;;  %v3563_v10 = vld [vmem:[%s4373_s2 + $0x50] sm:$0xff] (!%p2604_p5)   ;;  %v3564_v11 = vld [vmem:[%s4373_s2 + $0x58] sm:$0xff] (!%p2604_p5)   ;;  %vm750_vm5 = vcmask (!%p2604_p5), 785408   ;;  %vm899_vm6 = vcmask (!%p2604_p5), 128000   ;;  %vm908_vm7 = vcmask (!%p2604_p5), 122880  }
  0x1a   : > { %3030 = vmatprep.subr.bf16.mxu0 (!%p2604_p5), %v3674_v1  ;;  %v3565_v12 = vld [vmem:[%s4373_s2 + $0x60] sm:$0xff] (!%p2604_p5)   ;;  %v3566_v13 = vld [vmem:[%s4373_s2 + $0x68] sm:$0xff] (!%p2604_p5)   ;;  %v740_v16 = vld [vmem:[%s4374_s3 + $0x10] sm:$0xff] (!%p2604_p5)  ;;  %3420 = vmatprep.subr.bf16.mxu1 (!%p2604_p5), %v3676_v17 }
  0x1b   : > { %v738_v14 = vld [vmem:[%s4374_s3] sm:$0xff] (!%p2604_p5)  ;;  %v739_v15 = vld [vmem:[%s4374_s3 + $0x8] sm:$0xff] (!%p2604_p5)  ;;  %v741_v19 = vld [vmem:[%s4374_s3 + $0x18] sm:$0xff] (!%p2604_p5) }
  0x1c   : > { %3027 = vmatmul.mubr.msk.bf16.vlgmr.msra.gmra.mrb[0].mxu0 (!%p2604_p5), %vm296_vm3, %v290_v3  ;;  %3075 = vmatmul.mubr.msk.bf16.vlgmr.msra.gmra.mrb[0].mxu1 (!%p2604_p5), %vm296_vm3, %v2639_v5  ;;  %v3809_v18 = vpack.c.bf16 (!%p2604_p5), %v739_v15, %v738_v14  ;;  %v3815_v20 = vpack.c.bf16 (!%p2604_p5), %v741_v19, %v740_v16  ;;  %v742_v21 = vld [vmem:[%s4374_s3 + $0x20] sm:$0xff] (!%p2604_p5)  ;;  %v743_v22 = vld [vmem:[%s4374_s3 + $0x28] sm:$0xff] (!%p2604_p5)  ;;  %v744_v24 = vld [vmem:[%s4374_s3 + $0x30] sm:$0xff] (!%p2604_p5) }
  0x1d   : > { %3031 = vmatpush3.bf16.msra.mxu0 (!%p2604_p5), %v302_v4  ;;  %3032 = vmatprep.mubr.msk.bf16.mxu0 (!%p2604_p5), %vm3675_vm2, %v3674_v1  ;;  %v3825_v23 = vpack.c.bf16 (!%p2604_p5), %v743_v22, %v742_v21  ;;  %v745_v25 = vld [vmem:[%s4374_s3 + $0x38] sm:$0xff] (!%p2604_p5)  ;;  %v746_v27 = vld [vmem:[%s4374_s3 + $0x40] sm:$0xff] (!%p2604_p5)  ;;  %v747_v28 = vld [vmem:[%s4374_s3 + $0x48] sm:$0xff] (!%p2604_p5) }
  0x1e   : > { %3036 = vmatprep.subr.bf16.mxu0 %v3674_v1  ;;  %3120 = vmatprep.mubr.msk.f32.mxu1 %vm3675_vm2, %v3674_v1  ;;  %v3835_v26 = vpack.c.bf16 %v745_v25, %v744_v24  ;;  %v3845_v29 = vpack.c.bf16 %v747_v28, %v746_v27  ;;  %v748_v30 = vld [vmem:[%s4374_s3 + $0x50] sm:$0xff]  ;;  %v749_v31 = vld [vmem:[%s4374_s3 + $0x58] sm:$0xff]  ;;  %v3567_v42 = vld [vmem:[%s4373_s2] sm:$0xff]  }
  0x1f   : > { %3422 = vmatpush3.bf16.msra.mxu1 %v3809_v18  ;;  %v3855_v32 = vpack.c.bf16 %v749_v31, %v748_v30  ;;  %v3568_v47 = vld [vmem:[%s4373_s2 + $0x8] sm:$0xff]   ;;  %v3569_v48 = vld [vmem:[%s4373_s2 + $0x10] sm:$0xff]   ;;  %v3570_v49 = vld [vmem:[%s4373_s2 + $0x18] sm:$0xff]  }
  0x20   : > { %3423 = vmatprep.subr.bf16.mxu1 %v3676_v17  ;;  %v3571_v50 = vld [vmem:[%s4373_s2 + $0x20] sm:$0xff]   ;;  %v3572_v51 = vld [vmem:[%s4373_s2 + $0x28] sm:$0xff]   ;;  %v3573_v52 = vld [vmem:[%s4373_s2 + $0x30] sm:$0xff]  }
  0x21   : > { %v3574_v53 = vld [vmem:[%s4373_s2 + $0x70] sm:$0xff]   ;;  %v3575_v55 = vld [vmem:[%s4373_s2 + $0x78] sm:$0xff]   ;;  %v3576_v56 = vld [vmem:[%s4373_s2 + $0x80] sm:$0xff]  }
  0x22   : > { %v3577_v57 = vld [vmem:[%s4373_s2 + $0x88] sm:$0xff]   ;;  %v3578_v58 = vld [vmem:[%s4373_s2 + $0x90] sm:$0xff]   ;;  %v3579_v59 = vld [vmem:[%s4373_s2 + $0x98] sm:$0xff]  }
  0x23   : > { %3425 = vmatpush3.bf16.msra.mxu1 %v3815_v20  ;;  %v3580_v60 = vld [vmem:[%s4373_s2 + $0xa0] sm:$0xff]   ;;  %v3581_v62 = vld [vmem:[%s4371_s0 + $0x8] sm:$0x7f]  }
  0x24   : > { %3033 = vmatmul.mubr.msk.bf16.vlgmr.msra.gmra.mrb[4].mxu0 %vm296_vm3, %v2607_v6  ;;  %3426 = vmatprep.subr.bf16.mxu1 %v3676_v17  ;;  %v933_v63 = vsel %vm300_vm1, %v3581_v62, 0  ;;  %v2701_v0 = vld [vmem:[%s4372_s1 + $0x8] sm:$0x7]  ;;  %v3587_v14 = vld [vmem:[%s4373_s2 + $0x60] sm:$0xff]  }
  0x25   : > { %3037 = vmatpush3.bf16.msra.mxu0 %v3560_v7  ;;  %3050 = vmatprep.mubr.msk.bf16.mxu0 %vm3675_vm2, %v3674_v1  ;;  %v923_v7 = vld [vmem:[%s4372_s1] sm:$0x7]  ;;  %v3588_v15 = vld [vmem:[%s4373_s2 + $0x68] sm:$0xff]  }
  0x26   : > { %3038 = vmatprep.subr.bf16.mxu0 %v3674_v1  ;;  %v3593_v62 = vld [vmem:[%s4373_s2 + $0x20] sm:$0xff]  }
  0x27   : > { %3428 = vmatpush3.bf16.msra.mxu1 %v3825_v23 }
  0x28   : > { %3429 = vmatprep.subr.bf16.mxu1 %v3676_v17 }
  0x29   : > { %3039 = vmatpush3.bf16.msra.mxu0 %v3561_v8  ;;  %v2669_v8 = vld [vmem:[%s4372_s1 + $0x4] sm:$0x7] }
  0x2a   : > { %3040 = vmatprep.subr.bf16.mxu0 %v3674_v1 }
  0x2b   : > { %3431 = vmatpush3.bf16.msra.mxu1 %v3835_v26 }
  0x2c   : > { %3432 = vmatprep.subr.bf16.mxu1 %v3676_v17 }
  0x2d   : > { %3041 = vmatpush3.bf16.msra.mxu0 %v3562_v9  ;;  %v3582_v9 = vld [vmem:[%s4373_s2 + $0x38] sm:$0xff]  }
  0x2e   : > { %3042 = vmatprep.subr.bf16.mxu0 %v3674_v1 }
  0x2f   : > { %3434 = vmatpush3.bf16.msra.mxu1 %v3845_v29 }
  0x30   : > { %3435 = vmatprep.subr.bf16.mxu1 %v3676_v17 }
  0x31   : > { %3043 = vmatpush3.bf16.msra.mxu0 %v3563_v10  ;;  %v3583_v10 = vld [vmem:[%s4373_s2 + $0x40] sm:$0xff]  }
  0x32   : > { %3044 = vmatprep.subr.bf16.mxu0 %v3674_v1 }
  0x33   : > { %3437 = vmatpush3.bf16.msra.mxu1 %v3855_v32 }
  0x34   : > { %3438 = vmatprep.subr.bf16.mxu1 %v3676_v17 }
  0x35   : > { %3045 = vmatpush3.bf16.msra.mxu0 %v3564_v11  ;;  %v3584_v11 = vld [vmem:[%s4373_s2 + $0x48] sm:$0xff]  }
  0x36   : > { %3046 = vmatprep.subr.bf16.mxu0 %v3674_v1 }
  0x39   : > { %3047 = vmatpush3.bf16.msra.mxu0 %v3565_v12  ;;  %v3585_v12 = vld [vmem:[%s4373_s2 + $0x50] sm:$0xff]  }
  0x3a   : > { %3048 = vmatprep.subr.bf16.mxu0 %v3674_v1 }
  0x3d   : > { %3049 = vmatpush3.bf16.msra.mxu0 %v3566_v13  ;;  %v3586_v13 = vld [vmem:[%s4373_s2 + $0x58] sm:$0xff]  }
  0x3e   : > { %3054 = vmatprep.subr.bf16.mxu0 %v3674_v1 }
  0xef   : > { %v338_v33 = vpop.f32.mrb[0].mxu0  ;;  %v630_v34 = vpop.f32.mrb[0].mxu1 }
  0xf0   : > { %v3028_v35 = vpop.f32.mrb[1].mxu0  ;;  %v3076_v36 = vpop.f32.mrb[1].mxu1  ;;  %v344_v54 = vpack.c.bf16 %v338_v33, %v338_v33  ;;  %v636_v61 = vpack.c.bf16 %v630_v34, %v630_v34 }
  0xf1   : > { %v341_v37 = vpop.f32.mrb[2].mxu0  ;;  %v633_v38 = vpop.f32.mrb[2].mxu1  ;;  %v898_v35 = vld [vmem:[#allocation2] sm:$0x1] }
  0xf2   : > { %v3029_v39 = vpop.f32.mrb[3].mxu0  ;;  %v3077_v40 = vpop.f32.mrb[3].mxu1 }
  0xf7   : > { %v398_v41 = vpop.f32.mrb[4].mxu0 }
  0xf8   : > { %v404_v43 = vpack.c.bf16 %v398_v41, %v398_v41  ;;  %v3034_v44 = vpop.f32.mrb[5].mxu0 }
  0xf9   : > { %v401_v45 = vpop.f32.mrb[6].mxu0 }
  0xfa   : > { %v3035_v46 = vpop.f32.mrb[7].mxu0  ;;  %3051 = vmatmul.mubr.msk.bf16.vlgmr.msra.gmra.mrb[8].mxu0 %vm462_vm4, %v404_v43 }
  0xfb   : > { %3055 = vmatpush3.bf16.msra.mxu0 %v3567_v42  ;;  %3068 = vmatprep.mubr.msk.bf16.mxu0 %vm3675_vm2, %v3674_v1 }
  0xfc   : > { %3056 = vmatprep.subr.bf16.mxu0 %v3674_v1 }
  0xff   : > { %3057 = vmatpush3.bf16.msra.mxu0 %v3568_v47 }
 0x100   : > { %3058 = vmatprep.subr.bf16.mxu0 %v3674_v1 }
 0x103   : > { %3059 = vmatpush3.bf16.msra.mxu0 %v3569_v48 }
 0x104   : > { %3060 = vmatprep.subr.bf16.mxu0 %v3674_v1 }
 0x107   : > { %3061 = vmatpush3.bf16.msra.mxu0 %v3570_v49 }
 0x108   : > { %3062 = vmatprep.subr.bf16.mxu0 %v3674_v1 }
 0x10b   : > { %3063 = vmatpush3.bf16.msra.mxu0 %v3571_v50  ;;  %v910_v50 = vld [vmem:[#allocation3] sm:$0x1] }
 0x10c   : > { %3064 = vmatprep.subr.bf16.mxu0 %v3674_v1 }
 0x10f   : > { %3065 = vmatpush3.bf16.msra.mxu0 %v3572_v51 }
 0x110   : > { %3066 = vmatprep.subr.bf16.mxu0 %v3674_v1 }
 0x113   : > { %3067 = vmatpush3.bf16.msra.mxu0 %v3573_v52 }
 0x114   : > { %3078 = vmatprep.subr.bf16.mxu0 %v3674_v1 }
 0x116   : > { %3069 = vmatmul.mubr.msk.bf16.vlgmr.msra.gmra.mrb[8].mxu0 %vm462_vm4, %v344_v54 }
 0x117   : > { %3079 = vmatpush3.bf16.msra.mxu0 %v3574_v53  ;;  %3092 = vmatprep.mubr.msk.bf16.mxu0 %vm3675_vm2, %v3674_v1  ;;  %v3589_v53 = vld [vmem:[%s4373_s2] sm:$0xff]  }
 0x118   : > { %3080 = vmatprep.subr.bf16.mxu0 %v3674_v1 }
 0x11b   : > { %3081 = vmatpush3.bf16.msra.mxu0 %v3575_v55 }
 0x11c   : > { %3082 = vmatprep.subr.bf16.mxu0 %v3674_v1 }
 0x11f   : > { %3083 = vmatpush3.bf16.msra.mxu0 %v3576_v56 }
 0x120   : > { %3084 = vmatprep.subr.bf16.mxu0 %v3674_v1 }
 0x123   : > { %3085 = vmatpush3.bf16.msra.mxu0 %v3577_v57 }
 0x124   : > { %3086 = vmatprep.subr.bf16.mxu0 %v3674_v1 }
 0x127   : > { %3087 = vmatpush3.bf16.msra.mxu0 %v3578_v58 }
 0x128   : > { %3088 = vmatprep.subr.bf16.mxu0 %v3674_v1 }
 0x12b   : > { %3089 = vmatpush3.bf16.msra.mxu0 %v3579_v59  ;;  %v3590_v59 = vld [vmem:[%s4373_s2 + $0x8] sm:$0xff]  }
 0x12c   : > { %3090 = vmatprep.subr.bf16.mxu0 %v3674_v1 }
 0x12f   : > { %3091 = vmatpush3.bf16.msra.mxu0 %v3580_v60  ;;  %v3591_v60 = vld [vmem:[%s4373_s2 + $0x10] sm:$0xff]  }
 0x130   : > { %3198 = vmatprep.subr.bf16.mxu0 %v3674_v1 }
 0x132   : > { %3093 = vmatmul.mubr.msk.bf16.vlgmr.msra.gmra.mrb[8].mxu0 %vm462_vm4, %v636_v61  ;;  %v3592_v61 = vld [vmem:[%s4373_s2 + $0x18] sm:$0xff]  }
 0x133   : > { %3200 = vmatprep.mubr.msk.bf16.mxu0 %vm3675_vm2, %v3674_v1  ;;  %3199 = vmatpush3.bf16.msra.mxu0 %v933_v63 }
 0x134   : > { %3456 = vmatprep.subr.bf16.mxu0 %v3676_v17 }
 0x13a   : > { %3201 = vmatmul.mubr.msk.bf16.vlgmr.msra.gmra.mrb[12].mxu0 %vm296_vm3, %v2701_v0  ;;  %v3595_v0 = vld [vmem:[%s4373_s2 + $0x30] sm:$0xff]  }
 0x13b   : > { %3458 = vmatpush3.bf16.msra.mxu0 %v3809_v18  ;;  %3246 = vmatprep.mubr.msk.f32.mxu0 %vm3675_vm2, %v3674_v1 }
 0x13c   : > { %3459 = vmatprep.subr.bf16.mxu0 %v3676_v17 }
 0x13f   : > { %3461 = vmatpush3.bf16.msra.mxu0 %v3815_v20 }
 0x140   : > { %3462 = vmatprep.subr.bf16.mxu0 %v3676_v17 }
 0x143   : > { %3464 = vmatpush3.bf16.msra.mxu0 %v3825_v23 }
 0x144   : > { %3465 = vmatprep.subr.bf16.mxu0 %v3676_v17 }
 0x147   : > { %3467 = vmatpush3.bf16.msra.mxu0 %v3835_v26 }
 0x148   : > { %3468 = vmatprep.subr.bf16.mxu0 %v3676_v17 }
 0x14b   : > { %3470 = vmatpush3.bf16.msra.mxu0 %v3845_v29 }
 0x14c   : > { %3471 = vmatprep.subr.bf16.mxu0 %v3676_v17 }
 0x14f   : > { %3473 = vmatpush3.bf16.msra.mxu0 %v3855_v32 }
 0x150   : > { %3474 = vmatprep.subr.bf16.mxu0 %v3676_v17 }
 0x205   : > { %v731_v2 = vpop.f32.mrb[8].mxu0 }
 0x206   : > { %v3094_v3 = vpop.f32.mrb[9].mxu0  ;;  %3121 = vmatmul.mubr.msk.f32.vlgmr.msra.gmra.mrb[4].mxu1 %vm750_vm5, %v731_v2  ;;  %v824_v6 = vmul.f32 %v731_v2, %v731_v2  ;;  %v3596_v2 = vld [vmem:[%s4373_s2 + $0x70] sm:$0xff]  }
 0x207   : > { %3440 = vmatpush3.bf16.msra.mxu1 %v3809_v18  ;;  %v734_v4 = vpop.f32.mrb[10].mxu0  ;;  %3147 = vmatprep.mubr.msk.f32.mxu1 %vm3675_vm2, %v3674_v1 }
 0x208   : > { %v3095_v5 = vpop.f32.mrb[11].mxu0  ;;  %3441 = vmatprep.subr.bf16.mxu1 %v3676_v17  ;;  %v3597_v4 = vld [vmem:[%s4373_s2 + $0x78] sm:$0xff]  }
 0x209   : > { %v3598_v5 = vld [vmem:[%s4373_s2 + $0x80] sm:$0xff]  }
 0x20b   : > { %3443 = vmatpush3.bf16.msra.mxu1 %v3815_v20 }
 0x20c   : > { %3444 = vmatprep.subr.bf16.mxu1 %v3676_v17 }
 0x20d   : > { %v4008_v16 = vpop.f32.mrb[12].mxu0 }
 0x20e   : > { %v3202_v19 = vpop.f32.mrb[13].mxu0 }
 0x20f   : > { %3446 = vmatpush3.bf16.msra.mxu1 %v3825_v23  ;;  %v1260_v21 = vpop.f32.mrb[14].mxu0 }
 0x210   : > { %3447 = vmatprep.subr.bf16.mxu1 %v3676_v17  ;;  %v3203_v22 = vpop.f32.mrb[15].mxu0 }
 0x213   : > { %3449 = vmatpush3.bf16.msra.mxu1 %v3835_v26 }
 0x214   : > { %3450 = vmatprep.subr.bf16.mxu1 %v3676_v17 }
 0x217   : > { %3452 = vmatpush3.bf16.msra.mxu1 %v3845_v29 }
 0x218   : > { %3453 = vmatprep.subr.bf16.mxu1 %v3676_v17 }
 0x21b   : > { %3455 = vmatpush3.bf16.msra.mxu1 %v3855_v32 }
 0x21c   : > { %3150 = vmatprep.subr.bf16.mxu1 %v3674_v1 }
 0x21e   : > { %3148 = vmatmul.mubr.msk.f32.vlgmr.msra.gmra.mrb[6].mxu1 %vm750_vm5, %v824_v6  ;;  %v3599_v6 = vld [vmem:[%s4373_s2 + $0x88] sm:$0xff]  }
 0x21f   : > { %3151 = vmatpush3.bf16.msra.mxu1 %v933_v63  ;;  %3152 = vmatprep.mubr.msk.bf16.mxu1 %vm3675_vm2, %v3674_v1 }
 0x220   : > { %3156 = vmatprep.subr.bf16.mxu1 %v3674_v1 }
 0x222   : > { %3153 = vmatmul.mubr.msk.bf16.vlgmr.msra.gmra.mrb[8].mxu1 %vm296_vm3, %v923_v7  ;;  %v3600_v7 = vld [vmem:[%s4373_s2 + $0x90] sm:$0xff]  }
 0x223   : > { %3157 = vmatpush3.bf16.msra.mxu1 %v933_v63  ;;  %3158 = vmatprep.mubr.msk.bf16.mxu1 %vm3675_vm2, %v3674_v1  ;;  %v3594_v63 = vld [vmem:[%s4373_s2 + $0x28] sm:$0xff]  }
 0x224   : > { %3162 = vmatprep.subr.bf16.mxu1 %v3674_v1 }
 0x22a   : > { %3159 = vmatmul.mubr.msk.bf16.vlgmr.msra.gmra.mrb[12].mxu1 %vm296_vm3, %v2669_v8  ;;  %v3601_v8 = vld [vmem:[%s4373_s2 + $0x98] sm:$0xff]  }
 0x22b   : > { %3176 = vmatprep.mubr.msk.bf16.mxu1 %vm3675_vm2, %v3674_v1  ;;  %3163 = vmatpush3.bf16.msra.mxu1 %v3582_v9  ;;  %v3602_v9 = vld [vmem:[%s4373_s2 + $0xa0] sm:$0xff]  }
 0x22c   : > { %3164 = vmatprep.subr.bf16.mxu1 %v3674_v1 }
 0x22f   : > { %3165 = vmatpush3.bf16.msra.mxu1 %v3583_v10  ;;  %v1263_v10 = vpack.c.bf16 %v4008_v16, %v4008_v16 }
 0x230   : > { %3166 = vmatprep.subr.bf16.mxu1 %v3674_v1 }
 0x233   : > { %3167 = vmatpush3.bf16.msra.mxu1 %v3584_v11 }
 0x234   : > { %3168 = vmatprep.subr.bf16.mxu1 %v3674_v1 }
 0x237   : > { %3169 = vmatpush3.bf16.msra.mxu1 %v3585_v12 }
 0x238   : > { %3170 = vmatprep.subr.bf16.mxu1 %v3674_v1 }
 0x23b   : > { %3171 = vmatpush3.bf16.msra.mxu1 %v3586_v13 }
 0x23c   : > { %3172 = vmatprep.subr.bf16.mxu1 %v3674_v1 }
 0x23f   : > { %3173 = vmatpush3.bf16.msra.mxu1 %v3587_v14 }
 0x240   : > { %3174 = vmatprep.subr.bf16.mxu1 %v3674_v1 }
 0x243   : > { %3175 = vmatpush3.bf16.msra.mxu1 %v3588_v15 }
 0x244   : > { %3180 = vmatprep.subr.bf16.mxu1 %v3674_v1 }
 0x2d9   : > { %v820_v24 = vpop.f32.mrb[4].mxu1 }
 0x2da   : > { %v900_v25 = vsel %vm899_vm6, %v820_v24, 0.0  ;;  %v3122_v27 = vpop.f32.mrb[5].mxu1 }
 0x2db   : > { %v901_v28 = vrot.slane %v900_v25, 4 }
 0x2dd   : > { %v902_v30 = vadd.f32 %v901_v28, %v900_v25 }
 0x2df   : > { %v903_v31 = vrot.slane %v902_v30, 2 }
 0x2e1   : > { %v904_v33 = vadd.f32 %v903_v31, %v902_v30 }
 0x2e3   : > { %v905_v34 = vrot.slane %v904_v33, 1 }
 0x2e5   : > { %v906_v36 = vadd.f32 %v905_v34, %v904_v33 }
 0x2e7   : > { %v907_v37 = vadd.f32 %v906_v36, %v898_v35 }
 0x2e9   : > { %909 = vst.msk [vmem:[#allocation2] sm:$0x1] %vm908_vm7, %v907_v37 }
 0x2f0   : > { %v1523_v24 = vld [vmem:[#allocation2] sm:$0x1] }
 0x2f1   : > { %v894_v38 = vpop.f32.mrb[6].mxu1 }
 0x2f2   : > { %v911_v39 = vsel %vm899_vm6, %v894_v38, 0.0  ;;  %v3149_v40 = vpop.f32.mrb[7].mxu1 }
 0x2f3   : > { %v912_v41 = vrot.slane %v911_v39, 4 }
 0x2f5   : > { %v913_v42 = vadd.f32 %v912_v41, %v911_v39  ;;  %v969_v43 = vpop.f32.mrb[8].mxu1 }
 0x2f6   : > { %v3154_v44 = vpop.f32.mrb[9].mxu1  ;;  %v975_v3 = vpack.c.bf16 %v969_v43, %v969_v43 }
 0x2f7   : > { %v914_v45 = vrot.slane %v913_v42, 2  ;;  %v972_v46 = vpop.f32.mrb[10].mxu1 }
 0x2f8   : > { %v3155_v47 = vpop.f32.mrb[11].mxu1 }
 0x2f9   : > { %v915_v48 = vadd.f32 %v914_v45, %v913_v42 }
 0x2fb   : > { %v916_v49 = vrot.slane %v915_v48, 1 }
 0x2fd   : > { %v917_v51 = vadd.f32 %v916_v49, %v915_v48  ;;  %v1028_v52 = vpop.f32.mrb[12].mxu1 }
 0x2fe   : > { %v1034_v54 = vpack.c.bf16 %v1028_v52, %v1028_v52  ;;  %v3160_v55 = vpop.f32.mrb[13].mxu1 }
 0x2ff   : > { %v918_v56 = vadd.f32 %v917_v51, %v910_v50  ;;  %v1031_v57 = vpop.f32.mrb[14].mxu1 }
 0x300   : > { %v3161_v58 = vpop.f32.mrb[15].mxu1  ;;  %3177 = vmatmul.mubr.msk.bf16.vlgmr.msra.gmra.mrb[16].mxu1 %vm462_vm4, %v1034_v54 }
 0x301   : > { %919 = vst.msk [vmem:[#allocation3] sm:$0x1] %vm908_vm7, %v918_v56  ;;  %3181 = vmatpush3.bf16.msra.mxu1 %v3589_v53  ;;  %3194 = vmatprep.mubr.msk.bf16.mxu1 %vm3675_vm2, %v3674_v1 }
 0x302   : > { %3182 = vmatprep.subr.bf16.mxu1 %v3674_v1 }
 0x305   : > { %3183 = vmatpush3.bf16.msra.mxu1 %v3590_v59 }
 0x306   : > { %3184 = vmatprep.subr.bf16.mxu1 %v3674_v1 }
 0x308   : > { %v1533_v35 = vld [vmem:[#allocation3] sm:$0x1] }
 0x309   : > { %3185 = vmatpush3.bf16.msra.mxu1 %v3591_v60 }
 0x30a   : > { %3186 = vmatprep.subr.bf16.mxu1 %v3674_v1 }
 0x30d   : > { %3187 = vmatpush3.bf16.msra.mxu1 %v3592_v61 }
 0x30e   : > { %3188 = vmatprep.subr.bf16.mxu1 %v3674_v1 }
 0x311   : > { %3189 = vmatpush3.bf16.msra.mxu1 %v3593_v62 }
 0x312   : > { %3190 = vmatprep.subr.bf16.mxu1 %v3674_v1 }
 0x315   : > { %3191 = vmatpush3.bf16.msra.mxu1 %v3594_v63 }
 0x316   : > { %3192 = vmatprep.subr.bf16.mxu1 %v3674_v1 }
 0x319   : > { %3193 = vmatpush3.bf16.msra.mxu1 %v3595_v0 }
 0x31a   : > { %3204 = vmatprep.subr.bf16.mxu1 %v3674_v1 }
 0x31c   : > { %3195 = vmatmul.mubr.msk.bf16.vlgmr.msra.gmra.mrb[16].mxu1 %vm462_vm4, %v975_v3 }
 0x31d   : > { %3205 = vmatpush3.bf16.msra.mxu1 %v3596_v2  ;;  %3218 = vmatprep.mubr.msk.bf16.mxu1 %vm3675_vm2, %v3674_v1 }
 0x31e   : > { %3206 = vmatprep.subr.bf16.mxu1 %v3674_v1 }
 0x321   : > { %3207 = vmatpush3.bf16.msra.mxu1 %v3597_v4 }
 0x322   : > { %3208 = vmatprep.subr.bf16.mxu1 %v3674_v1 }
 0x325   : > { %3209 = vmatpush3.bf16.msra.mxu1 %v3598_v5 }
 0x326   : > { %3210 = vmatprep.subr.bf16.mxu1 %v3674_v1 }
 0x329   : > { %3211 = vmatpush3.bf16.msra.mxu1 %v3599_v6 }
 0x32a   : > { %3212 = vmatprep.subr.bf16.mxu1 %v3674_v1 }
 0x32d   : > { %3213 = vmatpush3.bf16.msra.mxu1 %v3600_v7 }
 0x32e   : > { %3214 = vmatprep.subr.bf16.mxu1 %v3674_v1 }
 0x331   : > { %3215 = vmatpush3.bf16.msra.mxu1 %v3601_v8 }
 0x332   : > { %3216 = vmatprep.subr.bf16.mxu1 %v3674_v1 }
 0x335   : > { %3217 = vmatpush3.bf16.msra.mxu1 %v3602_v9 }
 0x338   : > { %3219 = vmatmul.mubr.msk.bf16.vlgmr.msra.gmra.mrb[16].mxu1 %vm462_vm4, %v1263_v10 }
 0x40b   : > { %v1357_v11 = vpop.f32.mrb[16].mxu1 }
 0x40c   : > { %v3220_v12 = vpop.f32.mrb[17].mxu1  ;;  %3247 = vmatmul.mubr.msk.f32.vlgmr.msra.gmra.mrb[16].mxu0 %vm750_vm5, %v1357_v11 }
 0x40d   : > { %3476 = vmatpush3.bf16.msra.mxu0 %v3809_v18  ;;  %v1360_v13 = vpop.f32.mrb[18].mxu1  ;;  %3273 = vmatprep.mubr.msk.f32.mxu0 %vm3675_vm2, %v3674_v1  ;;  %v1449_v1 = vmul.f32 %v1357_v11, %v1357_v11 }
 0x40e   : > { %v3221_v14 = vpop.f32.mrb[19].mxu1  ;;  %3477 = vmatprep.subr.bf16.mxu0 %v3676_v17 }
 0x411   : > { %3479 = vmatpush3.bf16.msra.mxu0 %v3815_v20 }
 0x412   : > { %3480 = vmatprep.subr.bf16.mxu0 %v3676_v17 }
 0x415   : > { %3482 = vmatpush3.bf16.msra.mxu0 %v3825_v23 }
 0x416   : > { %3483 = vmatprep.subr.bf16.mxu0 %v3676_v17 }
 0x419   : > { %3485 = vmatpush3.bf16.msra.mxu0 %v3835_v26 }
 0x41a   : > { %3486 = vmatprep.subr.bf16.mxu0 %v3676_v17 }
 0x41d   : > { %3488 = vmatpush3.bf16.msra.mxu0 %v3845_v29 }
 0x41e   : > { %3489 = vmatprep.subr.bf16.mxu0 %v3676_v17 }
 0x421   : > { %3491 = vmatpush3.bf16.msra.mxu0 %v3855_v32 }
 0x424   : > { %3274 = vmatmul.mubr.msk.f32.vlgmr.msra.gmra.mrb[18].mxu0 %vm750_vm5, %v1449_v1 }
 0x4df   : > { %v1445_v18 = vpop.f32.mrb[16].mxu0 }
 0x4e0   : > { %v1524_v20 = vsel %vm899_vm6, %v1445_v18, 0.0  ;;  %v3248_v15 = vpop.f32.mrb[17].mxu0 }
 0x4e1   : > { %v1525_v23 = vrot.slane %v1524_v20, 4 }
 0x4e3   : > { %v1526_v16 = vadd.f32 %v1525_v23, %v1524_v20 }
 0x4e5   : > { %v1527_v19 = vrot.slane %v1526_v16, 2 }
 0x4e7   : > { %v1528_v21 = vadd.f32 %v1527_v19, %v1526_v16 }
 0x4e9   : > { %v1529_v26 = vrot.slane %v1528_v21, 1 }
 0x4eb   : > { %v1530_v22 = vadd.f32 %v1529_v26, %v1528_v21 }
 0x4ed   : > { %v1531_v25 = vadd.f32 %v1530_v22, %v1523_v24 }
 0x4ef   : > { %1532 = vst.msk [vmem:[#allocation2] sm:$0x1] %vm908_vm7, %v1531_v25 }
 0x4f7   : > { %v1519_v17 = vpop.f32.mrb[18].mxu0 }
 0x4f8   : > { %v1534_v29 = vsel %vm899_vm6, %v1519_v17, 0.0  ;;  %v3275_v32 = vpop.f32.mrb[19].mxu0 }
 0x4f9   : > { %v1535_v27 = vrot.slane %v1534_v29, 4 }
 0x4fb   : > { %v1536_v28 = vadd.f32 %v1535_v27, %v1534_v29 }
 0x4fd   : > { %v1537_v30 = vrot.slane %v1536_v28, 2 }
 0x4ff   : > { %v1538_v31 = vadd.f32 %v1537_v30, %v1536_v28 }
 0x501   : > { %v1539_v33 = vrot.slane %v1538_v31, 1 }
 0x503   : > { %v1540_v34 = vadd.f32 %v1539_v33, %v1538_v31 }
 0x505   : > { %v1541_v36 = vadd.f32 %v1540_v34, %v1533_v35 }
 0x507   : > { %1542 = vst.msk [vmem:[#allocation3] sm:$0x1] %vm908_vm7, %v1541_v36 }
 0x508 PF: > { %p2727_p6 = scmp.ne.s32.totalorder %s3663_s21, 1 }
 0x509   : > { %vm1627_vm8 = vcmask (!%p2727_p6), 1046528   ;;  %v3677_v37 = vmov (!%p2727_p6), 0.0   ;;  %v3603_v38 = vld [vmem:[%s4371_s0] sm:$0x7f] (!%p2727_p6)   ;;  %v3604_v39 = vld [vmem:[%s4371_s0 + $0x8] sm:$0x7f] (!%p2727_p6)  }
 0x50a   : > { %1546 = sbr.rel (%p2727_p6) target bundleno = 1986 (0x7c2), region = 56  ;;  %3276 = vmatprep.subr.bf16.mxu0 (!%p2727_p6), %v3677_v37  ;;  %3348 = vmatprep.subr.bf16.mxu1 (!%p2727_p6), %v3677_v37  ;;  %v4106_v40 = vsel (!%p2727_p6), %vm1627_vm8, %v3603_v38, 0  ;;  %vm3678_vm9 = vmmov (!%p2727_p6), 0   ;;  %v1617_v41 = vld [vmem:[%s4372_s1] sm:$0x7] (!%p2727_p6)  ;;  %v4116_v42 = vsel (!%p2727_p6), %vm1627_vm8, %v3604_v39, 0 }
 0x50b   : > { %3278 = vmatprep.mubr.msk.bf16.mxu0 (!%p2727_p6), %vm3678_vm9, %v3677_v37  ;;  %3350 = vmatprep.mubr.msk.bf16.mxu1 (!%p2727_p6), %vm3678_vm9, %v3677_v37  ;;  %vm1623_vm10 = vcmask (!%p2727_p6), 113664   ;;  %v2081_v43 = vld [vmem:[%s4372_s1] sm:$0x7] (!%p2727_p6)  ;;  %v2730_v44 = vld [vmem:[%s4372_s1 + $0x4] sm:$0x7] (!%p2727_p6)  ;;  %v3605_v45 = vld [vmem:[%s4373_s2 + $0x38] sm:$0xff] (!%p2727_p6)  }
 0x50c   : > { %3277 = vmatpush3.bf16.msra.mxu0 (!%p2727_p6), %v4106_v40  ;;  %3349 = vmatpush3.bf16.msra.mxu1 (!%p2727_p6), %v4116_v42  ;;  %v2790_v46 = vld [vmem:[%s4372_s1 + $0x4] sm:$0x7] (!%p2727_p6)  ;;  %v3606_v47 = vld [vmem:[%s4373_s2 + $0x38] sm:$0xff] (!%p2727_p6)   ;;  %v3609_v50 = vld [vmem:[%s4373_s2 + $0x48] sm:$0xff] (!%p2727_p6)   ;;  %vm1789_vm11 = vcmask (!%p2727_p6), 916480   ;;  %s3679_s28 = smov (!%p2727_p6), 16  }
 0x50d   : > { %3282 = vmatprep.subr.bf16.mxu0 (!%p2727_p6), %v3677_v37  ;;  %3354 = vmatprep.subr.bf16.mxu1 (!%p2727_p6), %v3677_v37  ;;  %v3607_v48 = vld [vmem:[%s4373_s2 + $0x40] sm:$0xff] (!%p2727_p6)   ;;  %v3610_v51 = vld [vmem:[%s4373_s2 + $0x48] sm:$0xff] (!%p2727_p6)   ;;  %v3611_v52 = vld [vmem:[%s4373_s2 + $0x50] sm:$0xff] (!%p2727_p6)   ;;  %s3680_s29 = smov (!%p2727_p6), 48   ;;  %s3681_s30 = smov (!%p2727_p6), 32   ;;  %vm1580_vm12 = vcmask (!%p2727_p6), 130048  }
 0x50e   : > { %v3608_v49 = vld [vmem:[%s4373_s2 + $0x40] sm:$0xff] (!%p2727_p6)   ;;  %v3612_v53 = vld [vmem:[%s4373_s2 + $0x50] sm:$0xff] (!%p2727_p6)   ;;  %v3613_v54 = vld [vmem:[%s4373_s2 + $0x58] sm:$0xff] (!%p2727_p6)   ;;  %s3682_s7 = smov (!%p2727_p6), 64   ;;  %s3683_s8 = smov (!%p2727_p6), 80   ;;  %vm1582_vm13 = vcmask (!%p2727_p6), 261120  }
 0x50f   : > { %3279 = vmatmul.mubr.msk.bf16.vlgmr.msra.gmra.mrb[0].mxu0 (!%p2727_p6), %vm1623_vm10, %v1617_v41  ;;  %3351 = vmatmul.mubr.msk.bf16.vlgmr.msra.gmra.mrb[0].mxu1 (!%p2727_p6), %vm1623_vm10, %v2081_v43  ;;  %v3614_v55 = vld [vmem:[%s4373_s2 + $0x58] sm:$0xff] (!%p2727_p6)   ;;  %v3615_v56 = vld [vmem:[%s4373_s2 + $0x60] sm:$0xff] (!%p2727_p6)   ;;  %v3617_v58 = vld [vmem:[%s4373_s2 + $0x68] sm:$0xff] (!%p2727_p6)   ;;  %vm1584_vm14 = vcmask (!%p2727_p6), 392192   ;;  %vm1586_vm15 = vcmask (!%p2727_p6), 523264   ;;  %vm1588_vm0 = vcmask (!%p2727_p6), 654336  }
 0x510   : > { %3283 = vmatpush3.bf16.msra.mxu0 (!%p2727_p6), %v4106_v40  ;;  %3355 = vmatpush3.bf16.msra.mxu1 (!%p2727_p6), %v4116_v42  ;;  %v3616_v57 = vld [vmem:[%s4373_s2 + $0x60] sm:$0xff] (!%p2727_p6)   ;;  %v3618_v59 = vld [vmem:[%s4373_s2 + $0x68] sm:$0xff] (!%p2727_p6)   ;;  %v3623_v23 = vld [vmem:[%s4373_s2 + $0x10] sm:$0xff] (!%p2727_p6)   ;;  %vm2076_vm1 = vcmask (!%p2727_p6), 783360  }
 0x511   : > { %3284 = vmatprep.mubr.msk.bf16.mxu0 %vm3678_vm9, %v3677_v37  ;;  %3356 = vmatprep.mubr.msk.bf16.mxu1 %vm3678_vm9, %v3677_v37  ;;  %v3619_v6 = vld [vmem:[%s4373_s2] sm:$0xff]   ;;  %v3621_v20 = vld [vmem:[%s4373_s2 + $0x8] sm:$0xff]   ;;  %v3624_v16 = vld [vmem:[%s4373_s2 + $0x10] sm:$0xff]  }
 0x512   : > { %3288 = vmatprep.subr.bf16.mxu0 %v3677_v37  ;;  %3360 = vmatprep.subr.bf16.mxu1 %v3677_v37  ;;  %v3620_v10 = vld [vmem:[%s4373_s2] sm:$0xff]   ;;  %v3622_v15 = vld [vmem:[%s4373_s2 + $0x8] sm:$0xff]   ;;  %v3625_v19 = vld [vmem:[%s4373_s2 + $0x18] sm:$0xff]  }
 0x513   : > { %v3626_v21 = vld [vmem:[%s4373_s2 + $0x18] sm:$0xff]   ;;  %v3627_v26 = vld [vmem:[%s4373_s2 + $0x20] sm:$0xff]   ;;  %v3629_v24 = vld [vmem:[%s4373_s2 + $0x28] sm:$0xff]  }
 0x514   : > { %v3628_v22 = vld [vmem:[%s4373_s2 + $0x20] sm:$0xff]   ;;  %v3630_v25 = vld [vmem:[%s4373_s2 + $0x28] sm:$0xff]   ;;  %v3631_v17 = vld [vmem:[%s4373_s2 + $0x30] sm:$0xff]  }
 0x515   : > { %v3632_v29 = vld [vmem:[%s4373_s2 + $0x30] sm:$0xff]   ;;  %v2762_v28 = vld [vmem:[%s4372_s1 + $0x8] sm:$0x7]  ;;  %v3635_v34 = vld [vmem:[%s4373_s2 + $0x78] sm:$0xff]  }
 0x516   : > { %v3633_v30 = vld [vmem:[%s4373_s2 + $0x70] sm:$0xff]   ;;  %v2822_v31 = vld [vmem:[%s4372_s1 + $0x8] sm:$0x7]  ;;  %v3636_v35 = vld [vmem:[%s4373_s2 + $0x78] sm:$0xff]  }
 0x517   : > { %3285 = vmatmul.mubr.msk.bf16.vlgmr.msra.gmra.mrb[4].mxu0 %vm1623_vm10, %v2730_v44  ;;  %3357 = vmatmul.mubr.msk.bf16.vlgmr.msra.gmra.mrb[4].mxu1 %vm1623_vm10, %v2790_v46  ;;  %v3634_v33 = vld [vmem:[%s4373_s2 + $0x70] sm:$0xff]   ;;  %v3637_v36 = vld [vmem:[%s4373_s2 + $0x80] sm:$0xff]   ;;  %v3639_v39 = vld [vmem:[%s4373_s2 + $0x88] sm:$0xff]  }
 0x518   : > { %3289 = vmatpush3.bf16.msra.mxu0 %v3605_v45  ;;  %3361 = vmatpush3.bf16.msra.mxu1 %v3606_v47  ;;  %v3638_v38 = vld [vmem:[%s4373_s2 + $0x80] sm:$0xff]   ;;  %v3641_v41 = vld [vmem:[%s4373_s2 + $0x90] sm:$0xff]   ;;  %v3643_v43 = vld [vmem:[%s4373_s2 + $0x98] sm:$0xff]  }
 0x519   : > { %3290 = vmatprep.subr.bf16.mxu0 %v3677_v37  ;;  %3362 = vmatprep.subr.bf16.mxu1 %v3677_v37  ;;  %v3644_v44 = vld [vmem:[%s4373_s2 + $0x98] sm:$0xff]   ;;  %v3645_v45 = vld [vmem:[%s4373_s2 + $0xa0] sm:$0xff]  }
 0x51a   : > { %3302 = vmatprep.mubr.msk.bf16.mxu0 %vm3678_vm9, %v3677_v37  ;;  %3374 = vmatprep.mubr.msk.bf16.mxu1 %vm3678_vm9, %v3677_v37  ;;  %v3646_v46 = vld [vmem:[%s4373_s2 + $0xa0] sm:$0xff]  }
 0x51b   : > { %v1547_v47 = vld [vmem:[#allocation2] sm:$0x1] }
 0x51c   : > { %3291 = vmatpush3.bf16.msra.mxu0 %v3607_v48  ;;  %3363 = vmatpush3.bf16.msra.mxu1 %v3608_v49  ;;  %v1549_v48 = vld [vmem:[#allocation3] sm:$0x1]  ;;  %v1548_v49 = vmul.f32 0.013888889, %v1547_v47 }
 0x51d   : > { %3292 = vmatprep.subr.bf16.mxu0 %v3677_v37  ;;  %3364 = vmatprep.subr.bf16.mxu1 %v3677_v37 }
 0x520   : > { %3293 = vmatpush3.bf16.msra.mxu0 %v3609_v50  ;;  %3365 = vmatpush3.bf16.msra.mxu1 %v3610_v51  ;;  %v1550_v50 = vmul.f32 0.013888889, %v1549_v48  ;;  %v1551_v51 = vmul.f32 %v1548_v49, %v1548_v49 }
 0x521   : > { %3294 = vmatprep.subr.bf16.mxu0 %v3677_v37  ;;  %3366 = vmatprep.subr.bf16.mxu1 %v3677_v37 }
 0x524   : > { %3295 = vmatpush3.bf16.msra.mxu0 %v3611_v52  ;;  %3367 = vmatpush3.bf16.msra.mxu1 %v3612_v53  ;;  %v1552_v52 = vsub.f32 %v1550_v50, %v1551_v51 }
 0x525   : > { %3296 = vmatprep.subr.bf16.mxu0 %v3677_v37  ;;  %3368 = vmatprep.subr.bf16.mxu1 %v3677_v37 }
 0x526   : > { %v1553_v53 = vadd.f32 1e-05, %v1552_v52 }
 0x528   : > { %3297 = vmatpush3.bf16.msra.mxu0 %v3613_v54  ;;  %3369 = vmatpush3.bf16.msra.mxu1 %v3614_v55  ;;  %3647 = vrsqrt.f32 %v1553_v53  ;;  %v1561_v54 = vlaneseq  ;;  %v1555_v55 = vld [vmem:[%s4375_s4] sm:$0x1] }
 0x529   : > { %3298 = vmatprep.subr.bf16.mxu0 %v3677_v37  ;;  %3370 = vmatprep.subr.bf16.mxu1 %v3677_v37 }
 0x52c   : > { %3299 = vmatpush3.bf16.msra.mxu0 %v3615_v56  ;;  %3371 = vmatpush3.bf16.msra.mxu1 %v3616_v57 }
 0x52d   : > { %3300 = vmatprep.subr.bf16.mxu0 %v3677_v37  ;;  %3372 = vmatprep.subr.bf16.mxu1 %v3677_v37 }
 0x530   : > { %3301 = vmatpush3.bf16.msra.mxu0 %v3617_v58  ;;  %3373 = vmatpush3.bf16.msra.mxu1 %v3618_v59  ;;  %v1557_v59 = vld [vmem:[%s4376_s5] sm:$0x1] }
 0x531   : > { %3306 = vmatprep.subr.bf16.mxu0 %v3677_v37  ;;  %3378 = vmatprep.subr.bf16.mxu1 %v3677_v37 }
 0x532   : > { %v3648_v57 = vpop.eup %3647 }
 0x533   : > { %v1556_v58 = vmul.f32 %v3648_v57, %v1555_v55 }
 0x5e2   : > { %v4202_v60 = vpop.f32.mrb[0].mxu0  ;;  %v4204_v61 = vpop.f32.mrb[0].mxu1 }
 0x5e3   : > { %v3280_v62 = vpop.f32.mrb[1].mxu0  ;;  %v3352_v63 = vpop.f32.mrb[1].mxu1  ;;  %v1671_v32 = vpack.c.bf16 %v4202_v60, %v4202_v60  ;;  %v2133_v27 = vpack.c.bf16 %v4204_v61, %v4204_v61  ;;  %v1558_v61 = vmul.f32 %v1556_v58, %v1548_v49 }
 0x5e4   : > { %v1668_v0 = vpop.f32.mrb[2].mxu0  ;;  %v2130_v2 = vpop.f32.mrb[2].mxu1 }
 0x5e5   : > { %v3281_v3 = vpop.f32.mrb[3].mxu0  ;;  %v3353_v4 = vpop.f32.mrb[3].mxu1  ;;  %v1559_v62 = vsub.f32 %v1557_v59, %v1558_v61 }
 0x5ea   : > { %v1725_v5 = vpop.f32.mrb[4].mxu0  ;;  %v2186_v8 = vpop.f32.mrb[4].mxu1 }
 0x5eb   : > { %v1731_v7 = vpack.c.bf16 %v1725_v5, %v1725_v5  ;;  %v3286_v9 = vpop.f32.mrb[5].mxu0  ;;  %v2192_v11 = vpack.c.bf16 %v2186_v8, %v2186_v8  ;;  %v3358_v12 = vpop.f32.mrb[5].mxu1 }
 0x5ec   : > { %v1728_v13 = vpop.f32.mrb[6].mxu0  ;;  %v2189_v14 = vpop.f32.mrb[6].mxu1 }
 0x5ed   : > { %v3287_v1 = vpop.f32.mrb[7].mxu0  ;;  %3303 = vmatmul.mubr.msk.bf16.vlgmr.msra.gmra.mrb[8].mxu0 %vm1789_vm11, %v1731_v7  ;;  %v3359_v18 = vpop.f32.mrb[7].mxu1  ;;  %3375 = vmatmul.mubr.msk.bf16.vlgmr.msra.gmra.mrb[8].mxu1 %vm1789_vm11, %v2192_v11 }
 0x5ee   : > { %3307 = vmatpush3.bf16.msra.mxu0 %v3619_v6  ;;  %3379 = vmatpush3.bf16.msra.mxu1 %v3620_v10 }
 0x5ef   : > { %3308 = vmatprep.subr.bf16.mxu0 %v3677_v37  ;;  %3380 = vmatprep.subr.bf16.mxu1 %v3677_v37 }
 0x5f0   : > { %3320 = vmatprep.mubr.msk.bf16.mxu0 %vm3678_vm9, %v3677_v37  ;;  %3392 = vmatprep.mubr.msk.bf16.mxu1 %vm3678_vm9, %v3677_v37 }
 0x5f2   : > { %3309 = vmatpush3.bf16.msra.mxu0 %v3621_v20  ;;  %3381 = vmatpush3.bf16.msra.mxu1 %v3622_v15 }
 0x5f3   : > { %3310 = vmatprep.subr.bf16.mxu0 %v3677_v37  ;;  %3382 = vmatprep.subr.bf16.mxu1 %v3677_v37 }
 0x5f6   : > { %3311 = vmatpush3.bf16.msra.mxu0 %v3623_v23  ;;  %3383 = vmatpush3.bf16.msra.mxu1 %v3624_v16 }
 0x5f7   : > { %3312 = vmatprep.subr.bf16.mxu0 %v3677_v37  ;;  %3384 = vmatprep.subr.bf16.mxu1 %v3677_v37 }
 0x5fa   : > { %3313 = vmatpush3.bf16.msra.mxu0 %v3625_v19  ;;  %3385 = vmatpush3.bf16.msra.mxu1 %v3626_v21 }
 0x5fb   : > { %3314 = vmatprep.subr.bf16.mxu0 %v3677_v37  ;;  %3386 = vmatprep.subr.bf16.mxu1 %v3677_v37 }
 0x5fe   : > { %3315 = vmatpush3.bf16.msra.mxu0 %v3627_v26  ;;  %3387 = vmatpush3.bf16.msra.mxu1 %v3628_v22 }
 0x5ff   : > { %3316 = vmatprep.subr.bf16.mxu0 %v3677_v37  ;;  %3388 = vmatprep.subr.bf16.mxu1 %v3677_v37 }
 0x602   : > { %3317 = vmatpush3.bf16.msra.mxu0 %v3629_v24  ;;  %3389 = vmatpush3.bf16.msra.mxu1 %v3630_v25 }
 0x603   : > { %3318 = vmatprep.subr.bf16.mxu0 %v3677_v37  ;;  %3390 = vmatprep.subr.bf16.mxu1 %v3677_v37 }
 0x606   : > { %3319 = vmatpush3.bf16.msra.mxu0 %v3631_v17  ;;  %3391 = vmatpush3.bf16.msra.mxu1 %v3632_v29 }
 0x607   : > { %3324 = vmatprep.subr.bf16.mxu0 %v3677_v37  ;;  %3396 = vmatprep.subr.bf16.mxu1 %v3677_v37 }
 0x609   : > { %3321 = vmatmul.mubr.msk.bf16.vlgmr.msra.gmra.mrb[8].mxu0 %vm1789_vm11, %v1671_v32  ;;  %3393 = vmatmul.mubr.msk.bf16.vlgmr.msra.gmra.mrb[8].mxu1 %vm1789_vm11, %v2133_v27 }
 0x60a   : > { %3325 = vmatpush3.bf16.msra.mxu0 %v4106_v40  ;;  %3397 = vmatpush3.bf16.msra.mxu1 %v4116_v42  ;;  %v3640_v40 = vld [vmem:[%s4373_s2 + $0x88] sm:$0xff]   ;;  %v3642_v42 = vld [vmem:[%s4373_s2 + $0x90] sm:$0xff]  }
 0x60b   : > { %3326 = vmatprep.mubr.msk.bf16.mxu0 %vm3678_vm9, %v3677_v37  ;;  %3398 = vmatprep.mubr.msk.bf16.mxu1 %vm3678_vm9, %v3677_v37 }
 0x60c   : > { %3330 = vmatprep.subr.bf16.mxu0 %v3677_v37  ;;  %3402 = vmatprep.subr.bf16.mxu1 %v3677_v37 }
 0x611   : > { %3327 = vmatmul.mubr.msk.bf16.vlgmr.msra.gmra.mrb[12].mxu0 %vm1623_vm10, %v2762_v28  ;;  %3399 = vmatmul.mubr.msk.bf16.vlgmr.msra.gmra.mrb[12].mxu1 %vm1623_vm10, %v2822_v31 }
 0x612   : > { %3331 = vmatpush3.bf16.msra.mxu0 %v3633_v30  ;;  %3403 = vmatpush3.bf16.msra.mxu1 %v3634_v33 }
 0x613   : > { %3332 = vmatprep.subr.bf16.mxu0 %v3677_v37  ;;  %3404 = vmatprep.subr.bf16.mxu1 %v3677_v37 }
 0x614   : > { %3344 = vmatprep.mubr.msk.bf16.mxu0 %vm3678_vm9, %v3677_v37  ;;  %3416 = vmatprep.mubr.msk.bf16.mxu1 %vm3678_vm9, %v3677_v37 }
 0x616   : > { %3333 = vmatpush3.bf16.msra.mxu0 %v3635_v34  ;;  %3405 = vmatpush3.bf16.msra.mxu1 %v3636_v35 }
 0x617   : > { %3334 = vmatprep.subr.bf16.mxu0 %v3677_v37  ;;  %3406 = vmatprep.subr.bf16.mxu1 %v3677_v37 }
 0x61a   : > { %3335 = vmatpush3.bf16.msra.mxu0 %v3637_v36  ;;  %3407 = vmatpush3.bf16.msra.mxu1 %v3638_v38 }
 0x61b   : > { %3336 = vmatprep.subr.bf16.mxu0 %v3677_v37  ;;  %3408 = vmatprep.subr.bf16.mxu1 %v3677_v37 }
 0x61e   : > { %3337 = vmatpush3.bf16.msra.mxu0 %v3639_v39  ;;  %3409 = vmatpush3.bf16.msra.mxu1 %v3640_v40 }
 0x61f   : > { %3338 = vmatprep.subr.bf16.mxu0 %v3677_v37  ;;  %3410 = vmatprep.subr.bf16.mxu1 %v3677_v37 }
 0x622   : > { %3339 = vmatpush3.bf16.msra.mxu0 %v3641_v41  ;;  %3411 = vmatpush3.bf16.msra.mxu1 %v3642_v42 }
 0x623   : > { %3340 = vmatprep.subr.bf16.mxu0 %v3677_v37  ;;  %3412 = vmatprep.subr.bf16.mxu1 %v3677_v37 }
 0x626   : > { %3341 = vmatpush3.bf16.msra.mxu0 %v3643_v43  ;;  %3413 = vmatpush3.bf16.msra.mxu1 %v3644_v44 }
 0x627   : > { %3342 = vmatprep.subr.bf16.mxu0 %v3677_v37  ;;  %3414 = vmatprep.subr.bf16.mxu1 %v3677_v37  ;;  %v1562_v37 = vshrl.u32 %v1561_v54, 7 }
 0x629   : > { %v1563_v56 = vsub.s32 0, %v1562_v37 }
 0x62a   : > { %3343 = vmatpush3.bf16.msra.mxu0 %v3645_v45  ;;  %3415 = vmatpush3.bf16.msra.mxu1 %v3646_v46 }
 0x62b   : > { %v1564_v60 = vrot.slane %v1556_v58, %v1563_v56  ;;  %v1594_v63 = vrot.slane %v1559_v62, %v1563_v56 }
 0x62d   : > { %1565 = vrot.lane.b32.xlu0 %v1564_v60, %s3679_s28  ;;  %1571 = vrot.lane.b32.xlu1 %v1564_v60, %s3680_s29 }
 0x631   : > { %1568 = vrot.lane.b32.xlu0 %v1564_v60, %s3681_s30  ;;  %1595 = vrot.lane.b32.xlu1 %v1594_v63, %s3679_s28 }
 0x635   : > { %1574 = vrot.lane.b32.xlu0 %v1564_v60, %s3682_s7  ;;  %1598 = vrot.lane.b32.xlu1 %v1594_v63, %s3681_s30 }
 0x639   : > { %1577 = vrot.lane.b32.xlu0 %v1564_v60, %s3683_s8  ;;  %1601 = vrot.lane.b32.xlu1 %v1594_v63, %s3680_s29 }
 0x63d   : > { %1604 = vrot.lane.b32.xlu0 %v1594_v63, %s3682_s7  ;;  %1607 = vrot.lane.b32.xlu1 %v1594_v63, %s3683_s8 }
 0x69f   : > { %v1566_v11 = vpop.permute.xlu0 %1565  ;;  %v1572_v12 = vpop.permute.xlu1 %1571 }
 0x6a0   : > { %v1581_v20 = vsel %vm1580_vm12, %v1556_v58, %v1566_v11 }
 0x6a3   : > { %v1569_v13 = vpop.permute.xlu0 %1568  ;;  %v1596_v14 = vpop.permute.xlu1 %1595 }
 0x6a4   : > { %v1610_v15 = vsel %vm1580_vm12, %v1559_v62, %v1596_v14  ;;  %v1583_v16 = vsel %vm1582_vm13, %v1581_v20, %v1569_v13 }
 0x6a5   : > { %v1585_v26 = vsel %vm1584_vm14, %v1583_v16, %v1572_v12 }
 0x6a7   : > { %v1575_v1 = vpop.permute.xlu0 %1574  ;;  %v1599_v18 = vpop.permute.xlu1 %1598 }
 0x6a8   : > { %v1611_v19 = vsel %vm1582_vm13, %v1610_v15, %v1599_v18  ;;  %v1587_v25 = vsel %vm1586_vm15, %v1585_v26, %v1575_v1 }
 0x6ab   : > { %v1578_v23 = vpop.permute.xlu0 %1577  ;;  %v1602_v21 = vpop.permute.xlu1 %1601 }
 0x6ac   : > { %v1612_v22 = vsel %vm1584_vm14, %v1611_v19, %v1602_v21  ;;  %v1589_v32 = vsel %vm1588_vm0, %v1587_v25, %v1578_v23 }
 0x6ad   : > { %v2068_v28 = vrot.slane %v1589_v32, %v1563_v56 }
 0x6af   : > { %v1605_v24 = vpop.permute.xlu0 %1604  ;;  %v1608_v29 = vpop.permute.xlu1 %1607 }
 0x6b0   : > { %v1613_v17 = vsel %vm1586_vm15, %v1612_v22, %v1605_v24 }
 0x6b1   : > { %v1614_v27 = vsel %vm1588_vm0, %v1613_v17, %v1608_v29 }
 0x6b2   : > { %v2073_v31 = vrot.slane %v1614_v27, %v1563_v56 }
 0x6e4   : > { %v1957_v0 = vpop.f32.mrb[12].mxu0  ;;  %v2415_v3 = vpop.f32.mrb[12].mxu1 }
 0x6e5   : > { %v1963_v2 = vpack.c.bf16 %v1957_v0, %v1957_v0  ;;  %v3328_v4 = vpop.f32.mrb[13].mxu0  ;;  %v2421_v5 = vpack.c.bf16 %v2415_v3, %v2415_v3  ;;  %v3400_v6 = vpop.f32.mrb[13].mxu1 }
 0x6e6   : > { %v1960_v7 = vpop.f32.mrb[14].mxu0  ;;  %v2418_v8 = vpop.f32.mrb[14].mxu1 }
 0x6e7   : > { %v3329_v9 = vpop.f32.mrb[15].mxu0  ;;  %3345 = vmatmul.mubr.msk.bf16.vlgmr.msra.gmra.mrb[8].mxu0 %vm1789_vm11, %v1963_v2  ;;  %v3401_v10 = vpop.f32.mrb[15].mxu1  ;;  %3417 = vmatmul.mubr.msk.bf16.vlgmr.msra.gmra.mrb[8].mxu1 %vm1789_vm11, %v2421_v5 }
 0x7ba   : > { %v2058_v30 = vpop.f32.mrb[8].mxu0  ;;  %v2515_v34 = vpop.f32.mrb[8].mxu1 }
 0x7bb   : > { %v2069_v33 = vmul.f32 %v2068_v28, %v2058_v30  ;;  %v3346_v35 = vpop.f32.mrb[9].mxu0  ;;  %v2522_v36 = vmul.f32 %v2515_v34, %v2068_v28  ;;  %v3418_v38 = vpop.f32.mrb[9].mxu1 }
 0x7bc   : > { %v2061_v39 = vpop.f32.mrb[10].mxu0  ;;  %v2518_v41 = vpop.f32.mrb[10].mxu1 }
 0x7bd   : > { %v2074_v40 = vadd.f32 %v2073_v31, %v2069_v33  ;;  %v3347_v42 = vpop.f32.mrb[11].mxu0  ;;  %v2523_v43 = vadd.f32 %v2522_v36, %v2073_v31  ;;  %v3419_v44 = vpop.f32.mrb[11].mxu1 }
 0x7bf   : > { %v2075_v45 = vmax.f32 %v2074_v40, 0.0  ;;  %v2524_v46 = vmax.f32 %v2523_v43, 0.0 }
 0x7c1   : > { %2077 = vst.msk [vmem:[%s4377_s6] sm:$0x3f] %vm2076_vm1, %v2075_v45  ;;  %2846 = vst.msk [vmem:[%s4377_s6 + $0x8] sm:$0x3f] %vm2076_vm1, %v2524_v46 }
 0x7c2 PF: > { %s16_s23 = sadd.s32 1, %s3671_s23   ;;  %s4378_s21 = smov %s3667_s22 }
 0x7c3   : > { %p13_p7 = scmp.ge.s32.totalorder %s16_s23, 4   ;;  %s4379_s22 = smov %s4381_s24 }
 0x7c5   :  { %15 = sbr.rel (!%p13_p7) target bundleno = 2 (0x2), region = 97 }

</bundles_post_ra>
